<compile_context>
chip_gen: v7x
topology: tpu7x:2x2x1
jax: 0.10.0
libtpu: 0.0.40
codegen_flags: <defaults>
</compile_context>

<pallas_src>
import functools

import numpy as np
import jax
import jax.numpy as jnp
from jax import lax
from jax.experimental import pallas as pl
from jax.experimental.pallas import tpu as pltpu  # noqa: F401  (TPU backend)

F32 = jnp.float32


# ------------------------------------------------------------------ Pallas kernels

def _stem_kernel(xp_ref, sf_ref,
                 wst_ref, bst_ref, wfe_ref, bfe_ref, w0_ref, b0_ref,
                 x0_ref, fea_ref, sk_ref, *, B):
    """Fused stem: start 1x1 conv + static node-feature encoder + skip0 full-time conv."""
    xp = xp_ref[...]                                              # (B*N, T*cin) cols (t, cin)
    x0_ref[...] = jnp.dot(xp, wst_ref[...], preferred_element_type=F32) + bst_ref[...]
    fea = jnp.dot(sf_ref[...], wfe_ref[...], preferred_element_type=F32) + bfe_ref[...]
    fea_ref[...] = jnp.concatenate([fea] * B, axis=0)             # tile static feats over batch
    sk_ref[...] = jnp.dot(xp, w0_ref[...], preferred_element_type=F32) + b0_ref[...]


def _layer_kernel(x_ref, fea_ref, sk_ref, mask_ref, eye_ref,
                  wt_ref, bt_ref, wsk_ref, bsk_ref,
                  ws2d_ref, bs2d_ref,
                  wgx_ref, wgs_ref, wgh_ref, bg_ref,
                  we_ref, be_ref,
                  wm_ref, bm_ref, lnw_ref, lnb_ref,
                  xo_ref, sko_ref,
                  *, B, N, cc, rc, t_len, gdep, alpha, chunks, eps):
    """One Extractor layer fully fused:
       TConv (banded matmul) -> gating -> skip conv -> Evolving_GConv (all dy_interval
       chunks, GRU state resident) -> mix-hop MLP -> residual -> LayerNorm."""
    F = t_len * cc
    x = x_ref[...]                                                # (B*N, T_in*rc), cols (t, c)

    # --- TConv: both dilated-inception branches, filter + gate, as ONE banded matmul
    pre = jnp.dot(x, wt_ref[...], preferred_element_type=F32) + bt_ref[...]
    tco = jnp.tanh(pre[:, :F]) * jax.nn.sigmoid(pre[:, F:])       # (B*N, t_len*cc), cols (t, c)
    # dropout: identity (eval mode)

    # --- skip conv + running skip accumulation
    sko_ref[...] = (sk_ref[...]
                    + jnp.dot(tco, wsk_ref[...], preferred_element_type=F32)
                    + bsk_ref[...])

    # --- per-layer dynamic-state init: linear_s2d(static node features)
    states = (jnp.dot(fea_ref[...], ws2d_ref[...], preferred_element_type=F32)
              + bs2d_ref[...])                                    # (B*N, D)
    D = states.shape[1]

    mask = mask_ref[...]
    eye = eye_ref[...]
    wgx = wgx_ref[...]
    wgs = wgs_ref[...]
    wgh = wgh_ref[...]
    bg = bg_ref[...]
    we = we_ref[...]
    be = be_ref[...]

    hop_parts = [[] for _ in range(gdep + 1)]
    for (i0, i1) in chunks:                                       # static unroll; state stays in VMEM
        tc = i1 - i0
        xc = tco[:, i0 * cc:i1 * cc]                              # (B*N, tc*cc)

        # GRU input: mean over the chunk's time steps
        inp = xc[:, 0:cc]
        for t in range(1, tc):
            inp = inp + xc[:, t * cc:(t + 1) * cc]
        inp = inp * (1.0 / tc)

        # GRU cell (fused projections: [z|r|h] on inputs, [z|r] on state)
        px = jnp.dot(inp, wgx, preferred_element_type=F32) + bg   # (B*N, 3D)
        ps = jnp.dot(states, wgs, preferred_element_type=F32)     # (B*N, 2D)
        z = jax.nn.sigmoid(px[:, 0:D] + ps[:, 0:D])
        r = jax.nn.sigmoid(px[:, D:2 * D] + ps[:, D:2 * D])
        hcan = jnp.tanh(px[:, 2 * D:3 * D]
                        + jnp.dot(r * states, wgh, preferred_element_type=F32))
        states = z * states + (1.0 - z) * hcan

        # dynamic graph: per-batch row-softmax(relu(tanh(E E^T))), block-diagonal over batch
        emb = jnp.tanh(jnp.dot(states, we, preferred_element_type=F32) + be)
        logits = lax.dot_general(emb, emb, (((1,), (1,)), ((), ())),
                                 preferred_element_type=F32)      # (B*N, B*N)
        adj = jnp.maximum(jnp.tanh(logits), 0.0) * mask           # zero cross-batch entries
        m = jnp.max(adj, axis=-1, keepdims=True)
        e = jnp.exp(adj - m) * mask                               # masked entries exactly zero
        a = e / jnp.sum(e, axis=-1, keepdims=True)                # per-batch row softmax
        ahat = a + eye
        an = ahat / jnp.sum(ahat, axis=-1, keepdims=True)         # degree-normalized adjacency

        # mix-hop propagation, all hops kept resident in VMEM
        h = xc
        hop_parts[0].append(h)
        for g in range(1, gdep + 1):
            h = alpha * xc + (1.0 - alpha) * jnp.dot(an, h, preferred_element_type=F32)
            hop_parts[g].append(h)
        # TODO(synk): Moran's-I autocorrelation + Logbook registration are host-side
        # numpy/matplotlib side effects with no Pallas equivalent; omitted.

    # --- mix-hop 1x1 MLP over the whole layer as one lane-dense matmul, + residual
    hops = jnp.concatenate([jnp.concatenate(p, axis=1) for p in hop_parts], axis=1)
    y = (jnp.dot(hops, wm_ref[...], preferred_element_type=F32) + bm_ref[...]
         + x[:, x.shape[1] - t_len * rc:])                        # residual: last t_len steps

    # --- LayerNorm over (C, N, T) per sample + affine
    lnw = lnw_ref[...]
    lnb = lnb_ref[...]
    rows = []
    for b in range(B):
        yb = y[b * N:(b + 1) * N, :]
        mu = jnp.mean(yb, keepdims=True)
        var = jnp.mean(jnp.square(yb - mu), keepdims=True)
        rows.append((yb - mu) * lax.rsqrt(var + eps)
                    * lnw[b * N:(b + 1) * N, :] + lnb[b * N:(b + 1) * N, :])
    xo_ref[...] = jnp.concatenate(rows, axis=0)


def _head_kernel(xe_ref, sk_ref, wse_ref, bse_ref,
                 w1_ref, b1_ref, w2_ref, b2_ref, out_ref):
    """Fused head: skipE conv + ReLU -> 1x1 conv -> ReLU -> 1x1 conv."""
    s = (sk_ref[...]
         + jnp.dot(xe_ref[...], wse_ref[...], preferred_element_type=F32)
         + bse_ref[...])
    y = jnp.maximum(s, 0.0)
    y = jnp.maximum(jnp.dot(y, w1_ref[...], preferred_element_type=F32) + b1_ref[...], 0.0)
    out_ref[...] = jnp.dot(y, w2_ref[...], preferred_element_type=F32) + b2_ref[...]


# ------------------------------------------------------------------ model structure

def layer_configs(cfg):
    ks = cfg["kernel_set"]
    k = ks[-1]
    de, nL, nb = cfg["dilation_exp"], cfg["n_layers"], cfg["n_blocks"]
    if de > 1:
        rf = int(1 + nb * (k - 1) * (de ** nL - 1) / (de - 1))
    else:
        rf = nb * nL * (k - 1) + 1
    total_t = max(rf, cfg["seq_length"])
    cfgs = []
    for block_id in range(nb):
        if de > 1:
            rf_block = int(1 + block_id * (k - 1) * (de ** nL - 1) / (de - 1))
        else:
            rf_block = block_id * nL * (k - 1) + 1
        dil = 1
        for i in range(1, nL + 1):
            if de > 1:
                rf_i = int(rf_block + (k - 1) * (de ** i - 1) / (de - 1))
            else:
                rf_i = rf_block + i * (k - 1)
            cfgs.append(dict(t_len=total_t - rf_i + 1, dilation=dil,
                             dy_interval=cfg["dy_interval"][i - 1]))
            dil *= de
    return cfgs, rf, total_t


def esg_forward(cfg, prep, inp, static_feat):
    lcfgs, rf, total_t = layer_configs(cfg)
    B, cin, N, T = inp.shape
    assert T == cfg["seq_length"], "input sequence length not equal to preset"
    if cfg["seq_length"] < rf:
        # F.pad(..., mode='replicate') on the time axis (left pad)
        inp = jnp.pad(inp, ((0, 0), (0, 0), (0, 0), (rf - cfg["seq_length"], 0)),
                      mode="edge")
    T = total_t
    BN = B * N
    rc = cfg["residual_channels"]
    sc = cfg["skip_channels"]
    cc = cfg["conv_channels"]
    stemb = cfg["st_embedding_dim"]
    gdep = cfg["gcn_depth"]

    # only layout shuffle in the forward: (B, cin, N, T) -> (B*N, T*cin), cols (t, cin)
    xp = jnp.transpose(inp, (0, 2, 3, 1)).reshape(BN, T * cin)

    sp = prep["stem"]
    x, fea_b, skip_acc = pl.pallas_call(
        functools.partial(_stem_kernel, B=B),
        out_shape=(jax.ShapeDtypeStruct((BN, T * rc), F32),
                   jax.ShapeDtypeStruct((BN, stemb), F32),
                   jax.ShapeDtypeStruct((BN, sc), F32)),
    )(xp, static_feat, sp["w_start"], sp["b_start"], sp["w_fe"], sp["b_fe"],
      sp["w_sk0"], sp["b_sk0"])

    for li, lc in enumerate(lcfgs):
        lp = prep["layers"][li]
        t_len = lc["t_len"]
        chunks = tuple((i0, min(i0 + lc["dy_interval"], t_len))
                       for i0 in range(0, t_len, lc["dy_interval"]))
        x, skip_acc = pl.pallas_call(
            functools.partial(_layer_kernel, B=B, N=N, cc=cc, rc=rc, t_len=t_len,
                              gdep=gdep, alpha=cfg["propalpha"], chunks=chunks, eps=1e-5),
            out_shape=(jax.ShapeDtypeStruct((BN, t_len * rc), F32),
                       jax.ShapeDtypeStruct((BN, sc), F32)),
        )(x, fea_b, skip_acc, prep["mask"], prep["eye"],
          lp["w_tconv"], lp["b_tconv"], lp["w_skip"], lp["b_skip"],
          lp["w_s2d"], lp["b_s2d"],
          lp["w_gx"], lp["w_gs"], lp["w_gh"], lp["b_g"],
          lp["w_e"], lp["b_e"],
          lp["w_mlp"], lp["b_mlp"], lp["ln_w"], lp["ln_b"])

    hd = prep["head"]
    fin = hd["w2"].shape[1]
    out = pl.pallas_call(
        _head_kernel,
        out_shape=jax.ShapeDtypeStruct((BN, fin), F32),
    )(x, skip_acc, hd["w_se"], hd["b_se"], hd["w1"], hd["b1"], hd["w2"], hd["b2"])

    y = out.reshape(B, N, cfg["pred_len"], cfg["out_dim"])
    return jnp.transpose(y, (0, 2, 1, 3))


# ------------------------------------------------------------------ raw parameters

def build_raw_params(cfg, key):
    keys = iter(jax.random.split(key, 512))

    def w(shape, scale=0.1):
        return scale * jax.random.normal(next(keys), shape, dtype=F32)

    def zeros(shape):
        return jnp.zeros(shape, F32)

    cc, rc, sc = cfg["conv_channels"], cfg["residual_channels"], cfg["skip_channels"]
    ec, N, ks = cfg["end_channels"], cfg["num_nodes"], cfg["kernel_set"]
    st, dy = cfg["st_embedding_dim"], cfg["dy_embedding_dim"]
    cout_k = cc // len(ks)
    lcfgs, rf, total_t = layer_configs(cfg)

    layers = []
    for lc in lcfgs:
        t_len = lc["t_len"]
        layers.append({
            "filter": [(w((cout_k, rc, k)), zeros((cout_k,))) for k in ks],
            "gate":   [(w((cout_k, rc, k)), zeros((cout_k,))) for k in ks],
            "skip_w": w((sc, cc, t_len)), "skip_b": zeros((sc,)),
            "s2d_w": w((st, dy)), "s2d_b": zeros((dy,)),
            "egl": dict(wz_x=w((cc, dy)), wz_s=w((dy, dy)), bz=zeros((dy,)),
                        wr_x=w((cc, dy)), wr_s=w((dy, dy)), br=zeros((dy,)),
                        wh_x=w((cc, dy)), wh_s=w((dy, dy)), bh=zeros((dy,)),
                        we=w((dy, dy)), be=zeros((dy,))),
            "mlp_w": w((rc, (cfg["gcn_depth"] + 1) * cc)), "mlp_b": zeros((rc,)),
            "ln_w": jnp.ones((rc, N, t_len), F32),
            "ln_b": jnp.zeros((rc, N, t_len), F32),
        })

    return {
        "start_w": w((rc, cfg["in_dim"])), "start_b": zeros((rc,)),
        "stfea_w": w((cfg["fc_dim"], st)), "stfea_b": zeros((st,)),
        "skip0_w": w((sc, cfg["in_dim"], total_t)), "skip0_b": zeros((sc,)),
        "skipE_w": w((sc, rc, total_t - rf + 1)), "skipE_b": zeros((sc,)),
        "out1_w": w((ec, sc)), "out1_b": zeros((ec,)),
        "out2_w": w((cfg["pred_len"] * cfg["out_dim"], ec)),
        "out2_b": zeros((cfg["pred_len"] * cfg["out_dim"],)),
        "layers": layers,
    }


# ------------------------------------------------------------------ one-time param prep

def prepare_params(cfg, raw, batch_size):
    """All weight re-layouts / banded & block-diagonal assemblies, done ONCE on the host."""
    lcfgs, rf, total_t = layer_configs(cfg)
    B = batch_size
    N = cfg["num_nodes"]
    BN = B * N
    cin = cfg["in_dim"]
    rc = cfg["residual_channels"]
    cc = cfg["conv_channels"]
    sc = cfg["skip_channels"]
    st = cfg["st_embedding_dim"]
    D = cfg["dy_embedding_dim"]
    gdep = cfg["gcn_depth"]
    ks = tuple(cfg["kernel_set"])
    kmax = ks[-1]
    cout_k = cc // len(ks)
    T = total_t

    def np_(a):
        return np.asarray(a, dtype=np.float32)

    # --- stem
    w_start = np.zeros((T * cin, T * rc), np.float32)
    sw = np_(raw["start_w"])                                      # (rc, cin)
    for t in range(T):
        w_start[t * cin:(t + 1) * cin, t * rc:(t + 1) * rc] = sw.T
    b_start = np.tile(np_(raw["start_b"]).reshape(1, rc), (1, T))
    w_sk0 = np.transpose(np_(raw["skip0_w"]), (2, 1, 0)).reshape(T * cin, sc)
    stem = dict(
        w_start=jnp.asarray(w_start), b_start=jnp.asarray(b_start),
        w_fe=jnp.asarray(np_(raw["stfea_w"])),
        b_fe=jnp.asarray(np_(raw["stfea_b"]).reshape(1, st)),
        w_sk0=jnp.asarray(w_sk0),
        b_sk0=jnp.asarray(np_(raw["skip0_b"]).reshape(1, sc)),
    )

    # --- same-batch mask and identity for the block-diagonal dynamic graph
    rows = np.arange(BN)
    mask = (rows[:, None] // N == rows[None, :] // N).astype(np.float32)
    eye = np.eye(BN, dtype=np.float32)

    # --- per layer
    layers = []
    T_in = T
    for li, lc in enumerate(lcfgs):
        t_len = lc["t_len"]
        d = lc["dilation"]
        lraw = raw["layers"][li]

        # TConv: banded weight folding both branches + all taps + filter&gate
        w_t = np.zeros((T_in * rc, 2 * t_len * cc), np.float32)
        b_t = np.zeros((1, 2 * t_len * cc), np.float32)
        for half, branch_params in ((0, lraw["filter"]), (1, lraw["gate"])):
            base = half * t_len * cc
            for bi, k in enumerate(ks):
                wk, bk = branch_params[bi]                        # (cout_k, rc, k), (cout_k,)
                wk = np_(wk)
                bk = np_(bk)
                for t in range(t_len):
                    c0 = base + t * cc + bi * cout_k
                    for j in range(k):
                        t_in = t + d * (kmax - k + j)
                        w_t[t_in * rc:(t_in + 1) * rc, c0:c0 + cout_k] = wk[:, :, j].T
                    b_t[0, c0:c0 + cout_k] = bk

        # skip conv (contraction over (t, c) per pixel row)
        w_skip = np.transpose(np_(lraw["skip_w"]), (2, 1, 0)).reshape(t_len * cc, sc)

        # GRU (fused) + graph learner
        egl = lraw["egl"]
        w_gx = np.concatenate([np_(egl["wz_x"]), np_(egl["wr_x"]), np_(egl["wh_x"])], axis=1)
        w_gs = np.concatenate([np_(egl["wz_s"]), np_(egl["wr_s"])], axis=1)
        b_g = np.concatenate([np_(egl["bz"]), np_(egl["br"]), np_(egl["bh"])]).reshape(1, 3 * D)

        # mix-hop MLP as block-diagonal-over-time weight: rows (g, t, c), cols (t, r)
        mw = np_(lraw["mlp_w"])                                   # (rc, (gdep+1)*cc)
        w_mlp = np.zeros(((gdep + 1) * t_len * cc, t_len * rc), np.float32)
        for g in range(gdep + 1):
            blk = mw[:, g * cc:(g + 1) * cc].T                    # (cc, rc)
            for t in range(t_len):
                r0 = g * t_len * cc + t * cc
                w_mlp[r0:r0 + cc, t * rc:(t + 1) * rc] = blk
        b_mlp = np.tile(np_(lraw["mlp_b"]).reshape(1, rc), (1, t_len))

        # LayerNorm affine re-laid out to (B*N, t_len*rc), cols (t, r)
        lnw = np.transpose(np_(lraw["ln_w"]), (1, 2, 0)).reshape(N, t_len * rc)
        lnb = np.transpose(np_(lraw["ln_b"]), (1, 2, 0)).reshape(N, t_len * rc)

        layers.append(dict(
            w_tconv=jnp.asarray(w_t), b_tconv=jnp.asarray(b_t),
            w_skip=jnp.asarray(w_skip),
            b_skip=jnp.asarray(np_(lraw["skip_b"]).reshape(1, sc)),
            w_s2d=jnp.asarray(np_(lraw["s2d_w"])),
            b_s2d=jnp.asarray(np_(lraw["s2d_b"]).reshape(1, D)),
            w_gx=jnp.asarray(w_gx), w_gs=jnp.asarray(w_gs),
            w_gh=jnp.asarray(np_(egl["wh_s"])), b_g=jnp.asarray(b_g),
            w_e=jnp.asarray(np_(egl["we"])),
            b_e=jnp.asarray(np_(egl["be"]).reshape(1, D)),
            w_mlp=jnp.asarray(w_mlp), b_mlp=jnp.asarray(b_mlp),
            ln_w=jnp.asarray(np.tile(lnw, (B, 1))),
            ln_b=jnp.asarray(np.tile(lnb, (B, 1))),
        ))
        T_in = t_len

    # --- head
    tE = lcfgs[-1]["t_len"]
    ec = np_(raw["out1_w"]).shape[0]
    fin = np_(raw["out2_w"]).shape[0]
    w_se = np.transpose(np_(raw["skipE_w"]), (2, 1, 0)).reshape(tE * rc, sc)
    head = dict(
        w_se=jnp.asarray(w_se),
        b_se=jnp.asarray(np_(raw["skipE_b"]).reshape(1, sc)),
        w1=jnp.asarray(np_(raw["out1_w"]).T), b1=jnp.asarray(np_(raw["out1_b"]).reshape(1, ec)),
        w2=jnp.asarray(np_(raw["out2_w"]).T), b2=jnp.asarray(np_(raw["out2_b"]).reshape(1, fin)),
    )

    return dict(stem=stem, layers=layers, head=head,
                mask=jnp.asarray(mask), eye=jnp.asarray(eye))


# ------------------------------------------------------------------ main

CFG = dict(
    num_nodes=8, seq_length=16, pred_len=4, in_dim=2, out_dim=1,
    n_blocks=1, n_layers=2, conv_channels=8, residual_channels=8,
    skip_channels=8, end_channels=16, kernel_set=(2, 3), dilation_exp=1,
    gcn_depth=2, st_embedding_dim=8, dy_embedding_dim=8, fc_dim=16,
    dy_interval=(7, 6), propalpha=0.05,
)

if __name__ == "__main__":
    key = jax.random.PRNGKey(0)
    k_in, k_feat, k_par = jax.random.split(key, 3)
    B = 2
    x = jax.random.normal(k_in, (B, CFG["in_dim"], CFG["num_nodes"], CFG["seq_length"]),
                          dtype=F32)
    static_feat = jax.random.normal(k_feat, (CFG["num_nodes"], CFG["fc_dim"]), dtype=F32)

    raw_params = build_raw_params(CFG, k_par)
    prep = prepare_params(CFG, raw_params, batch_size=B)   # one-time, outside the jitted forward

    fwd = jax.jit(lambda p, xx, sf: esg_forward(CFG, p, xx, sf))
    out = jax.block_until_ready(fwd(prep, x, static_feat))
    assert out.shape == (B, CFG["pred_len"], CFG["num_nodes"], CFG["out_dim"]), out.shape
    assert bool(jnp.all(jnp.isfinite(out)))
    print("KERNEL_OK")
</pallas_src>

<mosaic_0001>
module attributes {stable_mosaic.version = 11 : i64} {
  func.func @_stem_kernel(%arg0: memref<16x32xf32, #tpu.memory_space<vmem>>, %arg1: memref<8x16xf32, #tpu.memory_space<vmem>>, %arg2: memref<32x128xf32, #tpu.memory_space<vmem>>, %arg3: memref<1x128xf32, #tpu.memory_space<vmem>>, %arg4: memref<16x8xf32, #tpu.memory_space<vmem>>, %arg5: memref<1x8xf32, #tpu.memory_space<vmem>>, %arg6: memref<32x8xf32, #tpu.memory_space<vmem>>, %arg7: memref<1x8xf32, #tpu.memory_space<vmem>>, %arg8: memref<16x128xf32, #tpu.memory_space<vmem>>, %arg9: memref<16x8xf32, #tpu.memory_space<vmem>>, %arg10: memref<16x8xf32, #tpu.memory_space<vmem>>) attributes {dimension_semantics = [], scalar_prefetch = 0 : i64, scratch_operands = 0 : i64, tpu.core_type = #tpu.core_type<tc>} {
    %c0 = arith.constant 0 : index
    %c0_0 = arith.constant 0 : index
    %0 = vector.load %arg0[%c0, %c0_0] : memref<16x32xf32, #tpu.memory_space<vmem>>, vector<16x32xf32>
    %c0_1 = arith.constant 0 : index
    %c0_2 = arith.constant 0 : index
    %1 = vector.load %arg2[%c0_1, %c0_2] : memref<32x128xf32, #tpu.memory_space<vmem>>, vector<32x128xf32>
    %cst = arith.constant dense<0.000000e+00> : vector<16x128xf32>
    %2 = tpu.matmul %0, %1, %cst {dimension_numbers = #tpu.dot_dimension_numbers<[1], [0], [0], [1], [0, 0, 1, 1], [], []>} : vector<16x32xf32>, vector<32x128xf32>, vector<16x128xf32> -> vector<16x128xf32>
    %c0_3 = arith.constant 0 : index
    %c0_4 = arith.constant 0 : index
    %3 = vector.load %arg3[%c0_3, %c0_4] : memref<1x128xf32, #tpu.memory_space<vmem>>, vector<1x128xf32>
    %4 = vector.broadcast %3 : vector<1x128xf32> to vector<16x128xf32>
    %5 = arith.addf %2, %4 : vector<16x128xf32>
    %c0_5 = arith.constant 0 : index
    %c0_6 = arith.constant 0 : index
    %6 = vector.load %arg8[%c0_5, %c0_6] : memref<16x128xf32, #tpu.memory_space<vmem>>, vector<16x128xf32>
    tpu.vector_store %arg8[%c0_5, %c0_6], %5 {strides = array<i32>} : memref<16x128xf32, #tpu.memory_space<vmem>>, vector<16x128xf32>,
    %c0_7 = arith.constant 0 : index
    %c0_8 = arith.constant 0 : index
    %7 = vector.load %arg1[%c0_7, %c0_8] : memref<8x16xf32, #tpu.memory_space<vmem>>, vector<8x16xf32>
    %c0_9 = arith.constant 0 : index
    %c0_10 = arith.constant 0 : index
    %8 = vector.load %arg4[%c0_9, %c0_10] : memref<16x8xf32, #tpu.memory_space<vmem>>, vector<16x8xf32>
    %cst_11 = arith.constant dense<0.000000e+00> : vector<8x8xf32>
    %9 = tpu.matmul %7, %8, %cst_11 {dimension_numbers = #tpu.dot_dimension_numbers<[1], [0], [0], [1], [0, 0, 1, 1], [], []>} : vector<8x16xf32>, vector<16x8xf32>, vector<8x8xf32> -> vector<8x8xf32>
    %c0_12 = arith.constant 0 : index
    %c0_13 = arith.constant 0 : index
    %10 = vector.load %arg5[%c0_12, %c0_13] : memref<1x8xf32, #tpu.memory_space<vmem>>, vector<1x8xf32>
    %11 = vector.broadcast %10 : vector<1x8xf32> to vector<8x8xf32>
    %12 = arith.addf %9, %11 : vector<8x8xf32>
    %13 = tpu.concatenate %12, %12 in 0 : vector<8x8xf32>, vector<8x8xf32> -> vector<16x8xf32>
    %c0_14 = arith.constant 0 : index
    %c0_15 = arith.constant 0 : index
    %14 = vector.load %arg9[%c0_14, %c0_15] : memref<16x8xf32, #tpu.memory_space<vmem>>, vector<16x8xf32>
    tpu.vector_store %arg9[%c0_14, %c0_15], %13 {strides = array<i32>} : memref<16x8xf32, #tpu.memory_space<vmem>>, vector<16x8xf32>,
    %c0_16 = arith.constant 0 : index
    %c0_17 = arith.constant 0 : index
    %15 = vector.load %arg6[%c0_16, %c0_17] : memref<32x8xf32, #tpu.memory_space<vmem>>, vector<32x8xf32>
    %cst_18 = arith.constant dense<0.000000e+00> : vector<16x8xf32>
    %16 = tpu.matmul %0, %15, %cst_18 {dimension_numbers = #tpu.dot_dimension_numbers<[1], [0], [0], [1], [0, 0, 1, 1], [], []>} : vector<16x32xf32>, vector<32x8xf32>, vector<16x8xf32> -> vector<16x8xf32>
    %c0_19 = arith.constant 0 : index
    %c0_20 = arith.constant 0 : index
    %17 = vector.load %arg7[%c0_19, %c0_20] : memref<1x8xf32, #tpu.memory_space<vmem>>, vector<1x8xf32>
    %18 = vector.broadcast %17 : vector<1x8xf32> to vector<16x8xf32>
    %19 = arith.addf %16, %18 : vector<16x8xf32>
    %c0_21 = arith.constant 0 : index
    %c0_22 = arith.constant 0 : index
    %20 = vector.load %arg10[%c0_21, %c0_22] : memref<16x8xf32, #tpu.memory_space<vmem>>, vector<16x8xf32>
    tpu.vector_store %arg10[%c0_21, %c0_22], %19 {strides = array<i32>} : memref<16x8xf32, #tpu.memory_space<vmem>>, vector<16x8xf32>,
    return
  }
}

module attributes {stable_mosaic.version = 11 : i64} {
  func.func @_layer_kernel(%arg0: memref<16x128xf32, #tpu.memory_space<vmem>>, %arg1: memref<16x8xf32, #tpu.memory_space<vmem>>, %arg2: memref<16x8xf32, #tpu.memory_space<vmem>>, %arg3: memref<16x16xf32, #tpu.memory_space<vmem>>, %arg4: memref<16x16xf32, #tpu.memory_space<vmem>>, %arg5: memref<128x224xf32, #tpu.memory_space<vmem>>, %arg6: memref<1x224xf32, #tpu.memory_space<vmem>>, %arg7: memref<112x8xf32, #tpu.memory_space<vmem>>, %arg8: memref<1x8xf32, #tpu.memory_space<vmem>>, %arg9: memref<8x8xf32, #tpu.memory_space<vmem>>, %arg10: memref<1x8xf32, #tpu.memory_space<vmem>>, %arg11: memref<8x24xf32, #tpu.memory_space<vmem>>, %arg12: memref<8x16xf32, #tpu.memory_space<vmem>>, %arg13: memref<8x8xf32, #tpu.memory_space<vmem>>, %arg14: memref<1x24xf32, #tpu.memory_space<vmem>>, %arg15: memref<8x8xf32, #tpu.memory_space<vmem>>, %arg16: memref<1x8xf32, #tpu.memory_space<vmem>>, %arg17: memref<336x112xf32, #tpu.memory_space<vmem>>, %arg18: memref<1x112xf32, #tpu.memory_space<vmem>>, %arg19: memref<16x112xf32, #tpu.memory_space<vmem>>, %arg20: memref<16x112xf32, #tpu.memory_space<vmem>>, %arg21: memref<16x112xf32, #tpu.memory_space<vmem>>, %arg22: memref<16x8xf32, #tpu.memory_space<vmem>>) attributes {dimension_semantics = [], scalar_prefetch = 0 : i64, scratch_operands = 0 : i64, tpu.core_type = #tpu.core_type<tc>} {
    %c0 = arith.constant 0 : index
    %c0_0 = arith.constant 0 : index
    %0 = vector.load %arg0[%c0, %c0_0] : memref<16x128xf32, #tpu.memory_space<vmem>>, vector<16x128xf32>
    %c0_1 = arith.constant 0 : index
    %c0_2 = arith.constant 0 : index
    %1 = vector.load %arg5[%c0_1, %c0_2] : memref<128x224xf32, #tpu.memory_space<vmem>>, vector<128x224xf32>
    %cst = arith.constant dense<0.000000e+00> : vector<16x224xf32>
    %2 = tpu.matmul %0, %1, %cst {dimension_numbers = #tpu.dot_dimension_numbers<[1], [0], [0], [1], [0, 0, 1, 1], [], []>} : vector<16x128xf32>, vector<128x224xf32>, vector<16x224xf32> -> vector<16x224xf32>
    %c0_3 = arith.constant 0 : index
    %c0_4 = arith.constant 0 : index
    %3 = vector.load %arg6[%c0_3, %c0_4] : memref<1x224xf32, #tpu.memory_space<vmem>>, vector<1x224xf32>
    %4 = vector.broadcast %3 : vector<1x224xf32> to vector<16x224xf32>
    %5 = arith.addf %2, %4 : vector<16x224xf32>
    %6 = vector.extract_strided_slice %5 {offsets = [0, 0], sizes = [16, 112], strides = [1, 1]} : vector<16x224xf32> to vector<16x112xf32>
    %7 = math.tanh %6 : vector<16x112xf32>
    %8 = vector.extract_strided_slice %5 {offsets = [0, 112], sizes = [16, 112], strides = [1, 1]} : vector<16x224xf32> to vector<16x112xf32>
    %9 = arith.negf %8 : vector<16x112xf32>
    %10 = math.exp %9 : vector<16x112xf32>
    %cst_5 = arith.constant 1.000000e+00 : f32
    %11 = vector.broadcast %cst_5 : f32 to vector<16x112xf32>
    %12 = arith.addf %11, %10 : vector<16x112xf32>
    %13 = arith.divf %11, %12 : vector<16x112xf32>
    %14 = arith.mulf %7, %13 : vector<16x112xf32>
    %c0_6 = arith.constant 0 : index
    %c0_7 = arith.constant 0 : index
    %15 = vector.load %arg2[%c0_6, %c0_7] : memref<16x8xf32, #tpu.memory_space<vmem>>, vector<16x8xf32>
    %c0_8 = arith.constant 0 : index
    %c0_9 = arith.constant 0 : index
    %16 = vector.load %arg7[%c0_8, %c0_9] : memref<112x8xf32, #tpu.memory_space<vmem>>, vector<112x8xf32>
    %cst_10 = arith.constant dense<0.000000e+00> : vector<16x8xf32>
    %17 = tpu.matmul %14, %16, %cst_10 {dimension_numbers = #tpu.dot_dimension_numbers<[1], [0], [0], [1], [0, 0, 1, 1], [], []>} : vector<16x112xf32>, vector<112x8xf32>, vector<16x8xf32> -> vector<16x8xf32>
    %18 = arith.addf %15, %17 : vector<16x8xf32>
    %c0_11 = arith.constant 0 : index
    %c0_12 = arith.constant 0 : index
    %19 = vector.load %arg8[%c0_11, %c0_12] : memref<1x8xf32, #tpu.memory_space<vmem>>, vector<1x8xf32>
    %20 = vector.broadcast %19 : vector<1x8xf32> to vector<16x8xf32>
    %21 = arith.addf %18, %20 : vector<16x8xf32>
    %c0_13 = arith.constant 0 : index
    %c0_14 = arith.constant 0 : index
    %22 = vector.load %arg22[%c0_13, %c0_14] : memref<16x8xf32, #tpu.memory_space<vmem>>, vector<16x8xf32>
    tpu.vector_store %arg22[%c0_13, %c0_14], %21 {strides = array<i32>} : memref<16x8xf32, #tpu.memory_space<vmem>>, vector<16x8xf32>,
    %c0_15 = arith.constant 0 : index
    %c0_16 = arith.constant 0 : index
    %23 = vector.load %arg1[%c0_15, %c0_16] : memref<16x8xf32, #tpu.memory_space<vmem>>, vector<16x8xf32>
    %c0_17 = arith.constant 0 : index
    %c0_18 = arith.constant 0 : index
    %24 = vector.load %arg9[%c0_17, %c0_18] : memref<8x8xf32, #tpu.memory_space<vmem>>, vector<8x8xf32>
    %cst_19 = arith.constant dense<0.000000e+00> : vector<16x8xf32>
    %25 = tpu.matmul %23, %24, %cst_19 {dimension_numbers = #tpu.dot_dimension_numbers<[1], [0], [0], [1], [0, 0, 1, 1], [], []>} : vector<16x8xf32>, vector<8x8xf32>, vector<16x8xf32> -> vector<16x8xf32>
    %c0_20 = arith.constant 0 : index
    %c0_21 = arith.constant 0 : index
    %26 = vector.load %arg10[%c0_20, %c0_21] : memref<1x8xf32, #tpu.memory_space<vmem>>, vector<1x8xf32>
    %27 = vector.broadcast %26 : vector<1x8xf32> to vector<16x8xf32>
    %28 = arith.addf %25, %27 : vector<16x8xf32>
    %c0_22 = arith.constant 0 : index
    %c0_23 = arith.constant 0 : index
    %29 = vector.load %arg3[%c0_22, %c0_23] : memref<16x16xf32, #tpu.memory_space<vmem>>, vector<16x16xf32>
    %c0_24 = arith.constant 0 : index
    %c0_25 = arith.constant 0 : index
    %30 = vector.load %arg4[%c0_24, %c0_25] : memref<16x16xf32, #tpu.memory_space<vmem>>, vector<16x16xf32>
    %c0_26 = arith.constant 0 : index
    %c0_27 = arith.constant 0 : index
    %31 = vector.load %arg11[%c0_26, %c0_27] : memref<8x24xf32, #tpu.memory_space<vmem>>, vector<8x24xf32>
    %c0_28 = arith.constant 0 : index
    %c0_29 = arith.constant 0 : index
    %32 = vector.load %arg12[%c0_28, %c0_29] : memref<8x16xf32, #tpu.memory_space<vmem>>, vector<8x16xf32>
    %c0_30 = arith.constant 0 : index
    %c0_31 = arith.constant 0 : index
    %33 = vector.load %arg13[%c0_30, %c0_31] : memref<8x8xf32, #tpu.memory_space<vmem>>, vector<8x8xf32>
    %c0_32 = arith.constant 0 : index
    %c0_33 = arith.constant 0 : index
    %34 = vector.load %arg14[%c0_32, %c0_33] : memref<1x24xf32, #tpu.memory_space<vmem>>, vector<1x24xf32>
    %c0_34 = arith.constant 0 : index
    %c0_35 = arith.constant 0 : index
    %35 = vector.load %arg15[%c0_34, %c0_35] : memref<8x8xf32, #tpu.memory_space<vmem>>, vector<8x8xf32>
    %c0_36 = arith.constant 0 : index
    %c0_37 = arith.constant 0 : index
    %36 = vector.load %arg16[%c0_36, %c0_37] : memref<1x8xf32, #tpu.memory_space<vmem>>, vector<1x8xf32>
    %37 = vector.extract_strided_slice %14 {offsets = [0, 0], sizes = [16, 56], strides = [1, 1]} : vector<16x112xf32> to vector<16x56xf32>
    %38 = vector.extract_strided_slice %37 {offsets = [0, 0], sizes = [16, 8], strides = [1, 1]} : vector<16x56xf32> to vector<16x8xf32>
    %39 = vector.extract_strided_slice %37 {offsets = [0, 8], sizes = [16, 8], strides = [1, 1]} : vector<16x56xf32> to vector<16x8xf32>
    %40 = arith.addf %38, %39 : vector<16x8xf32>
    %41 = vector.extract_strided_slice %37 {offsets = [0, 16], sizes = [16, 8], strides = [1, 1]} : vector<16x56xf32> to vector<16x8xf32>
    %42 = arith.addf %40, %41 : vector<16x8xf32>
    %43 = vector.extract_strided_slice %37 {offsets = [0, 24], sizes = [16, 8], strides = [1, 1]} : vector<16x56xf32> to vector<16x8xf32>
    %44 = arith.addf %42, %43 : vector<16x8xf32>
    %45 = vector.extract_strided_slice %37 {offsets = [0, 32], sizes = [16, 8], strides = [1, 1]} : vector<16x56xf32> to vector<16x8xf32>
    %46 = arith.addf %44, %45 : vector<16x8xf32>
    %47 = vector.extract_strided_slice %37 {offsets = [0, 40], sizes = [16, 8], strides = [1, 1]} : vector<16x56xf32> to vector<16x8xf32>
    %48 = arith.addf %46, %47 : vector<16x8xf32>
    %49 = vector.extract_strided_slice %37 {offsets = [0, 48], sizes = [16, 8], strides = [1, 1]} : vector<16x56xf32> to vector<16x8xf32>
    %50 = arith.addf %48, %49 : vector<16x8xf32>
    %cst_38 = arith.constant 0.142857149 : f32
    %51 = vector.broadcast %cst_38 : f32 to vector<16x8xf32>
    %52 = arith.mulf %50, %51 : vector<16x8xf32>
    %cst_39 = arith.constant dense<0.000000e+00> : vector<16x24xf32>
    %53 = tpu.matmul %52, %31, %cst_39 {dimension_numbers = #tpu.dot_dimension_numbers<[1], [0], [0], [1], [0, 0, 1, 1], [], []>} : vector<16x8xf32>, vector<8x24xf32>, vector<16x24xf32> -> vector<16x24xf32>
    %54 = vector.broadcast %34 : vector<1x24xf32> to vector<16x24xf32>
    %55 = arith.addf %53, %54 : vector<16x24xf32>
    %cst_40 = arith.constant dense<0.000000e+00> : vector<16x16xf32>
    %56 = tpu.matmul %28, %32, %cst_40 {dimension_numbers = #tpu.dot_dimension_numbers<[1], [0], [0], [1], [0, 0, 1, 1], [], []>} : vector<16x8xf32>, vector<8x16xf32>, vector<16x16xf32> -> vector<16x16xf32>
    %57 = vector.extract_strided_slice %55 {offsets = [0, 0], sizes = [16, 8], strides = [1, 1]} : vector<16x24xf32> to vector<16x8xf32>
    %58 = vector.extract_strided_slice %56 {offsets = [0, 0], sizes = [16, 8], strides = [1, 1]} : vector<16x16xf32> to vector<16x8xf32>
    %59 = arith.addf %57, %58 : vector<16x8xf32>
    %60 = arith.negf %59 : vector<16x8xf32>
    %61 = math.exp %60 : vector<16x8xf32>
    %cst_41 = arith.constant 1.000000e+00 : f32
    %62 = vector.broadcast %cst_41 : f32 to vector<16x8xf32>
    %63 = arith.addf %62, %61 : vector<16x8xf32>
    %64 = arith.divf %62, %63 : vector<16x8xf32>
    %65 = vector.extract_strided_slice %55 {offsets = [0, 8], sizes = [16, 8], strides = [1, 1]} : vector<16x24xf32> to vector<16x8xf32>
    %66 = vector.extract_strided_slice %56 {offsets = [0, 8], sizes = [16, 8], strides = [1, 1]} : vector<16x16xf32> to vector<16x8xf32>
    %67 = arith.addf %65, %66 : vector<16x8xf32>
    %68 = arith.negf %67 : vector<16x8xf32>
    %69 = math.exp %68 : vector<16x8xf32>
    %cst_42 = arith.constant 1.000000e+00 : f32
    %70 = vector.broadcast %cst_42 : f32 to vector<16x8xf32>
    %71 = arith.addf %70, %69 : vector<16x8xf32>
    %72 = arith.divf %70, %71 : vector<16x8xf32>
    %73 = vector.extract_strided_slice %55 {offsets = [0, 16], sizes = [16, 8], strides = [1, 1]} : vector<16x24xf32> to vector<16x8xf32>
    %74 = arith.mulf %72, %28 : vector<16x8xf32>
    %cst_43 = arith.constant dense<0.000000e+00> : vector<16x8xf32>
    %75 = tpu.matmul %74, %33, %cst_43 {dimension_numbers = #tpu.dot_dimension_numbers<[1], [0], [0], [1], [0, 0, 1, 1], [], []>} : vector<16x8xf32>, vector<8x8xf32>, vector<16x8xf32> -> vector<16x8xf32>
    %76 = arith.addf %73, %75 : vector<16x8xf32>
    %77 = math.tanh %76 : vector<16x8xf32>
    %78 = arith.mulf %64, %28 : vector<16x8xf32>
    %cst_44 = arith.constant 1.000000e+00 : f32
    %79 = vector.broadcast %cst_44 : f32 to vector<16x8xf32>
    %80 = arith.subf %79, %64 : vector<16x8xf32>
    %81 = arith.mulf %80, %77 : vector<16x8xf32>
    %82 = arith.addf %78, %81 : vector<16x8xf32>
    %cst_45 = arith.constant dense<0.000000e+00> : vector<16x8xf32>
    %83 = tpu.matmul %82, %35, %cst_45 {dimension_numbers = #tpu.dot_dimension_numbers<[1], [0], [0], [1], [0, 0, 1, 1], [], []>} : vector<16x8xf32>, vector<8x8xf32>, vector<16x8xf32> -> vector<16x8xf32>
    %84 = vector.broadcast %36 : vector<1x8xf32> to vector<16x8xf32>
    %85 = arith.addf %83, %84 : vector<16x8xf32>
    %86 = math.tanh %85 : vector<16x8xf32>
    %cst_46 = arith.constant dense<0.000000e+00> : vector<16x16xf32>
    %87 = tpu.matmul %86, %86, %cst_46 {dimension_numbers = #tpu.dot_dimension_numbers<[1], [1], [0], [0], [0, 0, 1, 0], [], []>} : vector<16x8xf32>, vector<16x8xf32>, vector<16x16xf32> -> vector<16x16xf32>
    %88 = math.tanh %87 : vector<16x16xf32>
    %cst_47 = arith.constant 0.000000e+00 : f32
    %89 = vector.broadcast %cst_47 : f32 to vector<16x16xf32>
    %90 = arith.maximumf %88, %89 : vector<16x16xf32>
    %91 = arith.mulf %90, %29 : vector<16x16xf32>
    %cst_48 = arith.constant dense<0xFF800000> : vector<16xf32>
    %92 = vector.multi_reduction <maximumf>, %91, %cst_48 [1] : vector<16x16xf32> to vector<16xf32>
    %93 = vector.shape_cast %92 : vector<16xf32> to vector<16x1xf32>
    %94 = vector.broadcast %93 : vector<16x1xf32> to vector<16x16xf32>
    %95 = arith.subf %91, %94 : vector<16x16xf32>
    %96 = math.exp %95 : vector<16x16xf32>
    %97 = arith.mulf %96, %29 : vector<16x16xf32>
    %cst_49 = arith.constant dense<0.000000e+00> : vector<16xf32>
    %98 = vector.multi_reduction <add>, %97, %cst_49 [1] : vector<16x16xf32> to vector<16xf32>
    %99 = vector.shape_cast %98 : vector<16xf32> to vector<16x1xf32>
    %100 = vector.broadcast %99 : vector<16x1xf32> to vector<16x16xf32>
    %101 = arith.divf %97, %100 : vector<16x16xf32>
    %102 = arith.addf %101, %30 : vector<16x16xf32>
    %cst_50 = arith.constant dense<0.000000e+00> : vector<16xf32>
    %103 = vector.multi_reduction <add>, %102, %cst_50 [1] : vector<16x16xf32> to vector<16xf32>
    %104 = vector.shape_cast %103 : vector<16xf32> to vector<16x1xf32>
    %105 = vector.broadcast %104 : vector<16x1xf32> to vector<16x16xf32>
    %106 = arith.divf %102, %105 : vector<16x16xf32>
    %cst_51 = arith.constant 5.000000e-02 : f32
    %107 = vector.broadcast %cst_51 : f32 to vector<16x56xf32>
    %108 = arith.mulf %107, %37 : vector<16x56xf32>
    %cst_52 = arith.constant dense<0.000000e+00> : vector<16x56xf32>
    %109 = tpu.matmul %106, %37, %cst_52 {dimension_numbers = #tpu.dot_dimension_numbers<[1], [0], [0], [1], [0, 0, 1, 1], [], []>} : vector<16x16xf32>, vector<16x56xf32>, vector<16x56xf32> -> vector<16x56xf32>
    %cst_53 = arith.constant 0.949999988 : f32
    %110 = vector.broadcast %cst_53 : f32 to vector<16x56xf32>
    %111 = arith.mulf %110, %109 : vector<16x56xf32>
    %112 = arith.addf %108, %111 : vector<16x56xf32>
    %cst_54 = arith.constant 5.000000e-02 : f32
    %113 = vector.broadcast %cst_54 : f32 to vector<16x56xf32>
    %114 = arith.mulf %113, %37 : vector<16x56xf32>
    %cst_55 = arith.constant dense<0.000000e+00> : vector<16x56xf32>
    %115 = tpu.matmul %106, %112, %cst_55 {dimension_numbers = #tpu.dot_dimension_numbers<[1], [0], [0], [1], [0, 0, 1, 1], [], []>} : vector<16x16xf32>, vector<16x56xf32>, vector<16x56xf32> -> vector<16x56xf32>
    %cst_56 = arith.constant 0.949999988 : f32
    %116 = vector.broadcast %cst_56 : f32 to vector<16x56xf32>
    %117 = arith.mulf %116, %115 : vector<16x56xf32>
    %118 = arith.addf %114, %117 : vector<16x56xf32>
    %119 = vector.extract_strided_slice %14 {offsets = [0, 56], sizes = [16, 56], strides = [1, 1]} : vector<16x112xf32> to vector<16x56xf32>
    %120 = vector.extract_strided_slice %119 {offsets = [0, 0], sizes = [16, 8], strides = [1, 1]} : vector<16x56xf32> to vector<16x8xf32>
    %121 = vector.extract_strided_slice %119 {offsets = [0, 8], sizes = [16, 8], strides = [1, 1]} : vector<16x56xf32> to vector<16x8xf32>
    %122 = arith.addf %120, %121 : vector<16x8xf32>
    %123 = vector.extract_strided_slice %119 {offsets = [0, 16], sizes = [16, 8], strides = [1, 1]} : vector<16x56xf32> to vector<16x8xf32>
    %124 = arith.addf %122, %123 : vector<16x8xf32>
    %125 = vector.extract_strided_slice %119 {offsets = [0, 24], sizes = [16, 8], strides = [1, 1]} : vector<16x56xf32> to vector<16x8xf32>
    %126 = arith.addf %124, %125 : vector<16x8xf32>
    %127 = vector.extract_strided_slice %119 {offsets = [0, 32], sizes = [16, 8], strides = [1, 1]} : vector<16x56xf32> to vector<16x8xf32>
    %128 = arith.addf %126, %127 : vector<16x8xf32>
    %129 = vector.extract_strided_slice %119 {offsets = [0, 40], sizes = [16, 8], strides = [1, 1]} : vector<16x56xf32> to vector<16x8xf32>
    %130 = arith.addf %128, %129 : vector<16x8xf32>
    %131 = vector.extract_strided_slice %119 {offsets = [0, 48], sizes = [16, 8], strides = [1, 1]} : vector<16x56xf32> to vector<16x8xf32>
    %132 = arith.addf %130, %131 : vector<16x8xf32>
    %cst_57 = arith.constant 0.142857149 : f32
    %133 = vector.broadcast %cst_57 : f32 to vector<16x8xf32>
    %134 = arith.mulf %132, %133 : vector<16x8xf32>
    %cst_58 = arith.constant dense<0.000000e+00> : vector<16x24xf32>
    %135 = tpu.matmul %134, %31, %cst_58 {dimension_numbers = #tpu.dot_dimension_numbers<[1], [0], [0], [1], [0, 0, 1, 1], [], []>} : vector<16x8xf32>, vector<8x24xf32>, vector<16x24xf32> -> vector<16x24xf32>
    %136 = vector.broadcast %34 : vector<1x24xf32> to vector<16x24xf32>
    %137 = arith.addf %135, %136 : vector<16x24xf32>
    %cst_59 = arith.constant dense<0.000000e+00> : vector<16x16xf32>
    %138 = tpu.matmul %82, %32, %cst_59 {dimension_numbers = #tpu.dot_dimension_numbers<[1], [0], [0], [1], [0, 0, 1, 1], [], []>} : vector<16x8xf32>, vector<8x16xf32>, vector<16x16xf32> -> vector<16x16xf32>
    %139 = vector.extract_strided_slice %137 {offsets = [0, 0], sizes = [16, 8], strides = [1, 1]} : vector<16x24xf32> to vector<16x8xf32>
    %140 = vector.extract_strided_slice %138 {offsets = [0, 0], sizes = [16, 8], strides = [1, 1]} : vector<16x16xf32> to vector<16x8xf32>
    %141 = arith.addf %139, %140 : vector<16x8xf32>
    %142 = arith.negf %141 : vector<16x8xf32>
    %143 = math.exp %142 : vector<16x8xf32>
    %cst_60 = arith.constant 1.000000e+00 : f32
    %144 = vector.broadcast %cst_60 : f32 to vector<16x8xf32>
    %145 = arith.addf %144, %143 : vector<16x8xf32>
    %146 = arith.divf %144, %145 : vector<16x8xf32>
    %147 = vector.extract_strided_slice %137 {offsets = [0, 8], sizes = [16, 8], strides = [1, 1]} : vector<16x24xf32> to vector<16x8xf32>
    %148 = vector.extract_strided_slice %138 {offsets = [0, 8], sizes = [16, 8], strides = [1, 1]} : vector<16x16xf32> to vector<16x8xf32>
    %149 = arith.addf %147, %148 : vector<16x8xf32>
    %150 = arith.negf %149 : vector<16x8xf32>
    %151 = math.exp %150 : vector<16x8xf32>
    %cst_61 = arith.constant 1.000000e+00 : f32
    %152 = vector.broadcast %cst_61 : f32 to vector<16x8xf32>
    %153 = arith.addf %152, %151 : vector<16x8xf32>
    %154 = arith.divf %152, %153 : vector<16x8xf32>
    %155 = vector.extract_strided_slice %137 {offsets = [0, 16], sizes = [16, 8], strides = [1, 1]} : vector<16x24xf32> to vector<16x8xf32>
    %156 = arith.mulf %154, %82 : vector<16x8xf32>
    %cst_62 = arith.constant dense<0.000000e+00> : vector<16x8xf32>
    %157 = tpu.matmul %156, %33, %cst_62 {dimension_numbers = #tpu.dot_dimension_numbers<[1], [0], [0], [1], [0, 0, 1, 1], [], []>} : vector<16x8xf32>, vector<8x8xf32>, vector<16x8xf32> -> vector<16x8xf32>
    %158 = arith.addf %155, %157 : vector<16x8xf32>
    %159 = math.tanh %158 : vector<16x8xf32>
    %160 = arith.mulf %146, %82 : vector<16x8xf32>
    %cst_63 = arith.constant 1.000000e+00 : f32
    %161 = vector.broadcast %cst_63 : f32 to vector<16x8xf32>
    %162 = arith.subf %161, %146 : vector<16x8xf32>
    %163 = arith.mulf %162, %159 : vector<16x8xf32>
    %164 = arith.addf %160, %163 : vector<16x8xf32>
    %cst_64 = arith.constant dense<0.000000e+00> : vector<16x8xf32>
    %165 = tpu.matmul %164, %35, %cst_64 {dimension_numbers = #tpu.dot_dimension_numbers<[1], [0], [0], [1], [0, 0, 1, 1], [], []>} : vector<16x8xf32>, vector<8x8xf32>, vector<16x8xf32> -> vector<16x8xf32>
    %166 = vector.broadcast %36 : vector<1x8xf32> to vector<16x8xf32>
    %167 = arith.addf %165, %166 : vector<16x8xf32>
    %168 = math.tanh %167 : vector<16x8xf32>
    %cst_65 = arith.constant dense<0.000000e+00> : vector<16x16xf32>
    %169 = tpu.matmul %168, %168, %cst_65 {dimension_numbers = #tpu.dot_dimension_numbers<[1], [1], [0], [0], [0, 0, 1, 0], [], []>} : vector<16x8xf32>, vector<16x8xf32>, vector<16x16xf32> -> vector<16x16xf32>
    %170 = math.tanh %169 : vector<16x16xf32>
    %cst_66 = arith.constant 0.000000e+00 : f32
    %171 = vector.broadcast %cst_66 : f32 to vector<16x16xf32>
    %172 = arith.maximumf %170, %171 : vector<16x16xf32>
    %173 = arith.mulf %172, %29 : vector<16x16xf32>
    %cst_67 = arith.constant dense<0xFF800000> : vector<16xf32>
    %174 = vector.multi_reduction <maximumf>, %173, %cst_67 [1] : vector<16x16xf32> to vector<16xf32>
    %175 = vector.shape_cast %174 : vector<16xf32> to vector<16x1xf32>
    %176 = vector.broadcast %175 : vector<16x1xf32> to vector<16x16xf32>
    %177 = arith.subf %173, %176 : vector<16x16xf32>
    %178 = math.exp %177 : vector<16x16xf32>
    %179 = arith.mulf %178, %29 : vector<16x16xf32>
    %cst_68 = arith.constant dense<0.000000e+00> : vector<16xf32>
    %180 = vector.multi_reduction <add>, %179, %cst_68 [1] : vector<16x16xf32> to vector<16xf32>
    %181 = vector.shape_cast %180 : vector<16xf32> to vector<16x1xf32>
    %182 = vector.broadcast %181 : vector<16x1xf32> to vector<16x16xf32>
    %183 = arith.divf %179, %182 : vector<16x16xf32>
    %184 = arith.addf %183, %30 : vector<16x16xf32>
    %cst_69 = arith.constant dense<0.000000e+00> : vector<16xf32>
    %185 = vector.multi_reduction <add>, %184, %cst_69 [1] : vector<16x16xf32> to vector<16xf32>
    %186 = vector.shape_cast %185 : vector<16xf32> to vector<16x1xf32>
    %187 = vector.broadcast %186 : vector<16x1xf32> to vector<16x16xf32>
    %188 = arith.divf %184, %187 : vector<16x16xf32>
    %cst_70 = arith.constant 5.000000e-02 : f32
    %189 = vector.broadcast %cst_70 : f32 to vector<16x56xf32>
    %190 = arith.mulf %189, %119 : vector<16x56xf32>
    %cst_71 = arith.constant dense<0.000000e+00> : vector<16x56xf32>
    %191 = tpu.matmul %188, %119, %cst_71 {dimension_numbers = #tpu.dot_dimension_numbers<[1], [0], [0], [1], [0, 0, 1, 1], [], []>} : vector<16x16xf32>, vector<16x56xf32>, vector<16x56xf32> -> vector<16x56xf32>
    %cst_72 = arith.constant 0.949999988 : f32
    %192 = vector.broadcast %cst_72 : f32 to vector<16x56xf32>
    %193 = arith.mulf %192, %191 : vector<16x56xf32>
    %194 = arith.addf %190, %193 : vector<16x56xf32>
    %cst_73 = arith.constant 5.000000e-02 : f32
    %195 = vector.broadcast %cst_73 : f32 to vector<16x56xf32>
    %196 = arith.mulf %195, %119 : vector<16x56xf32>
    %cst_74 = arith.constant dense<0.000000e+00> : vector<16x56xf32>
    %197 = tpu.matmul %188, %194, %cst_74 {dimension_numbers = #tpu.dot_dimension_numbers<[1], [0], [0], [1], [0, 0, 1, 1], [], []>} : vector<16x16xf32>, vector<16x56xf32>, vector<16x56xf32> -> vector<16x56xf32>
    %cst_75 = arith.constant 0.949999988 : f32
    %198 = vector.broadcast %cst_75 : f32 to vector<16x56xf32>
    %199 = arith.mulf %198, %197 : vector<16x56xf32>
    %200 = arith.addf %196, %199 : vector<16x56xf32>
    %201 = tpu.concatenate %37, %119 in 1 : vector<16x56xf32>, vector<16x56xf32> -> vector<16x112xf32>
    %202 = tpu.concatenate %112, %194 in 1 : vector<16x56xf32>, vector<16x56xf32> -> vector<16x112xf32>
    %203 = tpu.concatenate %118, %200 in 1 : vector<16x56xf32>, vector<16x56xf32> -> vector<16x112xf32>
    %204 = tpu.concatenate %201, %202, %203 in 1 : vector<16x112xf32>, vector<16x112xf32>, vector<16x112xf32> -> vector<16x336xf32>
    %c0_76 = arith.constant 0 : index
    %c0_77 = arith.constant 0 : index
    %205 = vector.load %arg17[%c0_76, %c0_77] : memref<336x112xf32, #tpu.memory_space<vmem>>, vector<336x112xf32>
    %cst_78 = arith.constant dense<0.000000e+00> : vector<16x112xf32>
    %206 = tpu.matmul %204, %205, %cst_78 {dimension_numbers = #tpu.dot_dimension_numbers<[1], [0], [0], [1], [0, 0, 1, 1], [], []>} : vector<16x336xf32>, vector<336x112xf32>, vector<16x112xf32> -> vector<16x112xf32>
    %c0_79 = arith.constant 0 : index
    %c0_80 = arith.constant 0 : index
    %207 = vector.load %arg18[%c0_79, %c0_80] : memref<1x112xf32, #tpu.memory_space<vmem>>, vector<1x112xf32>
    %208 = vector.broadcast %207 : vector<1x112xf32> to vector<16x112xf32>
    %209 = arith.addf %206, %208 : vector<16x112xf32>
    %210 = vector.extract_strided_slice %0 {offsets = [0, 16], sizes = [16, 112], strides = [1, 1]} : vector<16x128xf32> to vector<16x112xf32>
    %211 = arith.addf %209, %210 : vector<16x112xf32>
    %c0_81 = arith.constant 0 : index
    %c0_82 = arith.constant 0 : index
    %212 = vector.load %arg19[%c0_81, %c0_82] : memref<16x112xf32, #tpu.memory_space<vmem>>, vector<16x112xf32>
    %c0_83 = arith.constant 0 : index
    %c0_84 = arith.constant 0 : index
    %213 = vector.load %arg20[%c0_83, %c0_84] : memref<16x112xf32, #tpu.memory_space<vmem>>, vector<16x112xf32>
    %214 = vector.extract_strided_slice %211 {offsets = [0, 0], sizes = [8, 112], strides = [1, 1]} : vector<16x112xf32> to vector<8x112xf32>
    %215 = vector.shape_cast %214 : vector<8x112xf32> to vector<1x8x112xf32>
    %cst_85 = arith.constant dense<0.000000e+00> : vector<1xf32>
    %216 = vector.multi_reduction <add>, %215, %cst_85 [1, 2] : vector<1x8x112xf32> to vector<1xf32>
    %217 = vector.shape_cast %216 : vector<1xf32> to vector<1x1x1xf32>
    %218 = vector.extract %217[0, 0, 0] : f32 from vector<1x1x1xf32>
    %219 = vector.broadcast %218 : f32 to vector<1x1xf32>
    %cst_86 = arith.constant 8.960000e+02 : f32
    %220 = vector.broadcast %cst_86 : f32 to vector<1x1xf32>
    %221 = arith.divf %219, %220 : vector<1x1xf32>
    %222 = vector.broadcast %221 : vector<1x1xf32> to vector<8x112xf32>
    %223 = arith.subf %214, %222 : vector<8x112xf32>
    %224 = arith.mulf %223, %223 : vector<8x112xf32>
    %225 = vector.shape_cast %224 : vector<8x112xf32> to vector<1x8x112xf32>
    %cst_87 = arith.constant dense<0.000000e+00> : vector<1xf32>
    %226 = vector.multi_reduction <add>, %225, %cst_87 [1, 2] : vector<1x8x112xf32> to vector<1xf32>
    %227 = vector.shape_cast %226 : vector<1xf32> to vector<1x1x1xf32>
    %228 = vector.extract %227[0, 0, 0] : f32 from vector<1x1x1xf32>
    %229 = vector.broadcast %228 : f32 to vector<1x1xf32>
    %cst_88 = arith.constant 8.960000e+02 : f32
    %230 = vector.broadcast %cst_88 : f32 to vector<1x1xf32>
    %231 = arith.divf %229, %230 : vector<1x1xf32>
    %232 = vector.broadcast %221 : vector<1x1xf32> to vector<8x112xf32>
    %233 = arith.subf %214, %232 : vector<8x112xf32>
    %cst_89 = arith.constant 9.99999974E-6 : f32
    %234 = vector.broadcast %cst_89 : f32 to vector<1x1xf32>
    %235 = arith.addf %231, %234 : vector<1x1xf32>
    %236 = math.rsqrt %235 : vector<1x1xf32>
    %237 = vector.broadcast %236 : vector<1x1xf32> to vector<8x112xf32>
    %238 = arith.mulf %233, %237 : vector<8x112xf32>
    %239 = vector.extract_strided_slice %212 {offsets = [0, 0], sizes = [8, 112], strides = [1, 1]} : vector<16x112xf32> to vector<8x112xf32>
    %240 = arith.mulf %238, %239 : vector<8x112xf32>
    %241 = vector.extract_strided_slice %213 {offsets = [0, 0], sizes = [8, 112], strides = [1, 1]} : vector<16x112xf32> to vector<8x112xf32>
    %242 = arith.addf %240, %241 : vector<8x112xf32>
    %243 = vector.extract_strided_slice %211 {offsets = [8, 0], sizes = [8, 112], strides = [1, 1]} : vector<16x112xf32> to vector<8x112xf32>
    %244 = vector.shape_cast %243 : vector<8x112xf32> to vector<1x8x112xf32>
    %cst_90 = arith.constant dense<0.000000e+00> : vector<1xf32>
    %245 = vector.multi_reduction <add>, %244, %cst_90 [1, 2] : vector<1x8x112xf32> to vector<1xf32>
    %246 = vector.shape_cast %245 : vector<1xf32> to vector<1x1x1xf32>
    %247 = vector.extract %246[0, 0, 0] : f32 from vector<1x1x1xf32>
    %248 = vector.broadcast %247 : f32 to vector<1x1xf32>
    %cst_91 = arith.constant 8.960000e+02 : f32
    %249 = vector.broadcast %cst_91 : f32 to vector<1x1xf32>
    %250 = arith.divf %248, %249 : vector<1x1xf32>
    %251 = vector.broadcast %250 : vector<1x1xf32> to vector<8x112xf32>
    %252 = arith.subf %243, %251 : vector<8x112xf32>
    %253 = arith.mulf %252, %252 : vector<8x112xf32>
    %254 = vector.shape_cast %253 : vector<8x112xf32> to vector<1x8x112xf32>
    %cst_92 = arith.constant dense<0.000000e+00> : vector<1xf32>
    %255 = vector.multi_reduction <add>, %254, %cst_92 [1, 2] : vector<1x8x112xf32> to vector<1xf32>
    %256 = vector.shape_cast %255 : vector<1xf32> to vector<1x1x1xf32>
    %257 = vector.extract %256[0, 0, 0] : f32 from vector<1x1x1xf32>
    %258 = vector.broadcast %257 : f32 to vector<1x1xf32>
    %cst_93 = arith.constant 8.960000e+02 : f32
    %259 = vector.broadcast %cst_93 : f32 to vector<1x1xf32>
    %260 = arith.divf %258, %259 : vector<1x1xf32>
    %261 = vector.broadcast %250 : vector<1x1xf32> to vector<8x112xf32>
    %262 = arith.subf %243, %261 : vector<8x112xf32>
    %cst_94 = arith.constant 9.99999974E-6 : f32
    %263 = vector.broadcast %cst_94 : f32 to vector<1x1xf32>
    %264 = arith.addf %260, %263 : vector<1x1xf32>
    %265 = math.rsqrt %264 : vector<1x1xf32>
    %266 = vector.broadcast %265 : vector<1x1xf32> to vector<8x112xf32>
    %267 = arith.mulf %262, %266 : vector<8x112xf32>
    %268 = vector.extract_strided_slice %212 {offsets = [8, 0], sizes = [8, 112], strides = [1, 1]} : vector<16x112xf32> to vector<8x112xf32>
    %269 = arith.mulf %267, %268 : vector<8x112xf32>
    %270 = vector.extract_strided_slice %213 {offsets = [8, 0], sizes = [8, 112], strides = [1, 1]} : vector<16x112xf32> to vector<8x112xf32>
    %271 = arith.addf %269, %270 : vector<8x112xf32>
    %272 = tpu.concatenate %242, %271 in 0 : vector<8x112xf32>, vector<8x112xf32> -> vector<16x112xf32>
    %c0_95 = arith.constant 0 : index
    %c0_96 = arith.constant 0 : index
    %273 = vector.load %arg21[%c0_95, %c0_96] : memref<16x112xf32, #tpu.memory_space<vmem>>, vector<16x112xf32>
    tpu.vector_store %arg21[%c0_95, %c0_96], %272 {strides = array<i32>} : memref<16x112xf32, #tpu.memory_space<vmem>>, vector<16x112xf32>,
    return
  }
}

module attributes {stable_mosaic.version = 11 : i64} {
  func.func @_head_kernel(%arg0: memref<16x96xf32, #tpu.memory_space<vmem>>, %arg1: memref<16x8xf32, #tpu.memory_space<vmem>>, %arg2: memref<96x8xf32, #tpu.memory_space<vmem>>, %arg3: memref<1x8xf32, #tpu.memory_space<vmem>>, %arg4: memref<8x16xf32, #tpu.memory_space<vmem>>, %arg5: memref<1x16xf32, #tpu.memory_space<vmem>>, %arg6: memref<16x4xf32, #tpu.memory_space<vmem>>, %arg7: memref<1x4xf32, #tpu.memory_space<vmem>>, %arg8: memref<16x4xf32, #tpu.memory_space<vmem>>) attributes {dimension_semantics = [], scalar_prefetch = 0 : i64, scratch_operands = 0 : i64, tpu.core_type = #tpu.core_type<tc>} {
    %c0 = arith.constant 0 : index
    %c0_0 = arith.constant 0 : index
    %0 = vector.load %arg1[%c0, %c0_0] : memref<16x8xf32, #tpu.memory_space<vmem>>, vector<16x8xf32>
    %c0_1 = arith.constant 0 : index
    %c0_2 = arith.constant 0 : index
    %1 = vector.load %arg0[%c0_1, %c0_2] : memref<16x96xf32, #tpu.memory_space<vmem>>, vector<16x96xf32>
    %c0_3 = arith.constant 0 : index
    %c0_4 = arith.constant 0 : index
    %2 = vector.load %arg2[%c0_3, %c0_4] : memref<96x8xf32, #tpu.memory_space<vmem>>, vector<96x8xf32>
    %cst = arith.constant dense<0.000000e+00> : vector<16x8xf32>
    %3 = tpu.matmul %1, %2, %cst {dimension_numbers = #tpu.dot_dimension_numbers<[1], [0], [0], [1], [0, 0, 1, 1], [], []>} : vector<16x96xf32>, vector<96x8xf32>, vector<16x8xf32> -> vector<16x8xf32>
    %4 = arith.addf %0, %3 : vector<16x8xf32>
    %c0_5 = arith.constant 0 : index
    %c0_6 = arith.constant 0 : index
    %5 = vector.load %arg3[%c0_5, %c0_6] : memref<1x8xf32, #tpu.memory_space<vmem>>, vector<1x8xf32>
    %6 = vector.broadcast %5 : vector<1x8xf32> to vector<16x8xf32>
    %7 = arith.addf %4, %6 : vector<16x8xf32>
    %cst_7 = arith.constant 0.000000e+00 : f32
    %8 = vector.broadcast %cst_7 : f32 to vector<16x8xf32>
    %9 = arith.maximumf %7, %8 : vector<16x8xf32>
    %c0_8 = arith.constant 0 : index
    %c0_9 = arith.constant 0 : index
    %10 = vector.load %arg4[%c0_8, %c0_9] : memref<8x16xf32, #tpu.memory_space<vmem>>, vector<8x16xf32>
    %cst_10 = arith.constant dense<0.000000e+00> : vector<16x16xf32>
    %11 = tpu.matmul %9, %10, %cst_10 {dimension_numbers = #tpu.dot_dimension_numbers<[1], [0], [0], [1], [0, 0, 1, 1], [], []>} : vector<16x8xf32>, vector<8x16xf32>, vector<16x16xf32> -> vector<16x16xf32>
    %c0_11 = arith.constant 0 : index
    %c0_12 = arith.constant 0 : index
    %12 = vector.load %arg5[%c0_11, %c0_12] : memref<1x16xf32, #tpu.memory_space<vmem>>, vector<1x16xf32>
    %13 = vector.broadcast %12 : vector<1x16xf32> to vector<16x16xf32>
    %14 = arith.addf %11, %13 : vector<16x16xf32>
    %cst_13 = arith.constant 0.000000e+00 : f32
    %15 = vector.broadcast %cst_13 : f32 to vector<16x16xf32>
    %16 = arith.maximumf %14, %15 : vector<16x16xf32>
    %c0_14 = arith.constant 0 : index
    %c0_15 = arith.constant 0 : index
    %17 = vector.load %arg6[%c0_14, %c0_15] : memref<16x4xf32, #tpu.memory_space<vmem>>, vector<16x4xf32>
    %cst_16 = arith.constant dense<0.000000e+00> : vector<16x4xf32>
    %18 = tpu.matmul %16, %17, %cst_16 {dimension_numbers = #tpu.dot_dimension_numbers<[1], [0], [0], [1], [0, 0, 1, 1], [], []>} : vector<16x16xf32>, vector<16x4xf32>, vector<16x4xf32> -> vector<16x4xf32>
    %c0_17 = arith.constant 0 : index
    %c0_18 = arith.constant 0 : index
    %19 = vector.load %arg7[%c0_17, %c0_18] : memref<1x4xf32, #tpu.memory_space<vmem>>, vector<1x4xf32>
    %20 = vector.broadcast %19 : vector<1x4xf32> to vector<16x4xf32>
    %21 = arith.addf %18, %20 : vector<16x4xf32>
    %c0_19 = arith.constant 0 : index
    %c0_20 = arith.constant 0 : index
    %22 = vector.load %arg8[%c0_19, %c0_20] : memref<16x4xf32, #tpu.memory_space<vmem>>, vector<16x4xf32>
    tpu.vector_store %arg8[%c0_19, %c0_20], %21 {strides = array<i32>} : memref<16x4xf32, #tpu.memory_space<vmem>>, vector<16x4xf32>,
    return
  }
}

module attributes {stable_mosaic.version = 11 : i64} {
  func.func @_layer_kernel(%arg0: memref<16x112xf32, #tpu.memory_space<vmem>>, %arg1: memref<16x8xf32, #tpu.memory_space<vmem>>, %arg2: memref<16x8xf32, #tpu.memory_space<vmem>>, %arg3: memref<16x16xf32, #tpu.memory_space<vmem>>, %arg4: memref<16x16xf32, #tpu.memory_space<vmem>>, %arg5: memref<112x192xf32, #tpu.memory_space<vmem>>, %arg6: memref<1x192xf32, #tpu.memory_space<vmem>>, %arg7: memref<96x8xf32, #tpu.memory_space<vmem>>, %arg8: memref<1x8xf32, #tpu.memory_space<vmem>>, %arg9: memref<8x8xf32, #tpu.memory_space<vmem>>, %arg10: memref<1x8xf32, #tpu.memory_space<vmem>>, %arg11: memref<8x24xf32, #tpu.memory_space<vmem>>, %arg12: memref<8x16xf32, #tpu.memory_space<vmem>>, %arg13: memref<8x8xf32, #tpu.memory_space<vmem>>, %arg14: memref<1x24xf32, #tpu.memory_space<vmem>>, %arg15: memref<8x8xf32, #tpu.memory_space<vmem>>, %arg16: memref<1x8xf32, #tpu.memory_space<vmem>>, %arg17: memref<288x96xf32, #tpu.memory_space<vmem>>, %arg18: memref<1x96xf32, #tpu.memory_space<vmem>>, %arg19: memref<16x96xf32, #tpu.memory_space<vmem>>, %arg20: memref<16x96xf32, #tpu.memory_space<vmem>>, %arg21: memref<16x96xf32, #tpu.memory_space<vmem>>, %arg22: memref<16x8xf32, #tpu.memory_space<vmem>>) attributes {dimension_semantics = [], scalar_prefetch = 0 : i64, scratch_operands = 0 : i64, tpu.core_type = #tpu.core_type<tc>} {
    %c0 = arith.constant 0 : index
    %c0_0 = arith.constant 0 : index
    %0 = vector.load %arg0[%c0, %c0_0] : memref<16x112xf32, #tpu.memory_space<vmem>>, vector<16x112xf32>
    %c0_1 = arith.constant 0 : index
    %c0_2 = arith.constant 0 : index
    %1 = vector.load %arg5[%c0_1, %c0_2] : memref<112x192xf32, #tpu.memory_space<vmem>>, vector<112x192xf32>
    %cst = arith.constant dense<0.000000e+00> : vector<16x192xf32>
    %2 = tpu.matmul %0, %1, %cst {dimension_numbers = #tpu.dot_dimension_numbers<[1], [0], [0], [1], [0, 0, 1, 1], [], []>} : vector<16x112xf32>, vector<112x192xf32>, vector<16x192xf32> -> vector<16x192xf32>
    %c0_3 = arith.constant 0 : index
    %c0_4 = arith.constant 0 : index
    %3 = vector.load %arg6[%c0_3, %c0_4] : memref<1x192xf32, #tpu.memory_space<vmem>>, vector<1x192xf32>
    %4 = vector.broadcast %3 : vector<1x192xf32> to vector<16x192xf32>
    %5 = arith.addf %2, %4 : vector<16x192xf32>
    %6 = vector.extract_strided_slice %5 {offsets = [0, 0], sizes = [16, 96], strides = [1, 1]} : vector<16x192xf32> to vector<16x96xf32>
    %7 = math.tanh %6 : vector<16x96xf32>
    %8 = vector.extract_strided_slice %5 {offsets = [0, 96], sizes = [16, 96], strides = [1, 1]} : vector<16x192xf32> to vector<16x96xf32>
    %9 = arith.negf %8 : vector<16x96xf32>
    %10 = math.exp %9 : vector<16x96xf32>
    %cst_5 = arith.constant 1.000000e+00 : f32
    %11 = vector.broadcast %cst_5 : f32 to vector<16x96xf32>
    %12 = arith.addf %11, %10 : vector<16x96xf32>
    %13 = arith.divf %11, %12 : vector<16x96xf32>
    %14 = arith.mulf %7, %13 : vector<16x96xf32>
    %c0_6 = arith.constant 0 : index
    %c0_7 = arith.constant 0 : index
    %15 = vector.load %arg2[%c0_6, %c0_7] : memref<16x8xf32, #tpu.memory_space<vmem>>, vector<16x8xf32>
    %c0_8 = arith.constant 0 : index
    %c0_9 = arith.constant 0 : index
    %16 = vector.load %arg7[%c0_8, %c0_9] : memref<96x8xf32, #tpu.memory_space<vmem>>, vector<96x8xf32>
    %cst_10 = arith.constant dense<0.000000e+00> : vector<16x8xf32>
    %17 = tpu.matmul %14, %16, %cst_10 {dimension_numbers = #tpu.dot_dimension_numbers<[1], [0], [0], [1], [0, 0, 1, 1], [], []>} : vector<16x96xf32>, vector<96x8xf32>, vector<16x8xf32> -> vector<16x8xf32>
    %18 = arith.addf %15, %17 : vector<16x8xf32>
    %c0_11 = arith.constant 0 : index
    %c0_12 = arith.constant 0 : index
    %19 = vector.load %arg8[%c0_11, %c0_12] : memref<1x8xf32, #tpu.memory_space<vmem>>, vector<1x8xf32>
    %20 = vector.broadcast %19 : vector<1x8xf32> to vector<16x8xf32>
    %21 = arith.addf %18, %20 : vector<16x8xf32>
    %c0_13 = arith.constant 0 : index
    %c0_14 = arith.constant 0 : index
    %22 = vector.load %arg22[%c0_13, %c0_14] : memref<16x8xf32, #tpu.memory_space<vmem>>, vector<16x8xf32>
    tpu.vector_store %arg22[%c0_13, %c0_14], %21 {strides = array<i32>} : memref<16x8xf32, #tpu.memory_space<vmem>>, vector<16x8xf32>,
    %c0_15 = arith.constant 0 : index
    %c0_16 = arith.constant 0 : index
    %23 = vector.load %arg1[%c0_15, %c0_16] : memref<16x8xf32, #tpu.memory_space<vmem>>, vector<16x8xf32>
    %c0_17 = arith.constant 0 : index
    %c0_18 = arith.constant 0 : index
    %24 = vector.load %arg9[%c0_17, %c0_18] : memref<8x8xf32, #tpu.memory_space<vmem>>, vector<8x8xf32>
    %cst_19 = arith.constant dense<0.000000e+00> : vector<16x8xf32>
    %25 = tpu.matmul %23, %24, %cst_19 {dimension_numbers = #tpu.dot_dimension_numbers<[1], [0], [0], [1], [0, 0, 1, 1], [], []>} : vector<16x8xf32>, vector<8x8xf32>, vector<16x8xf32> -> vector<16x8xf32>
    %c0_20 = arith.constant 0 : index
    %c0_21 = arith.constant 0 : index
    %26 = vector.load %arg10[%c0_20, %c0_21] : memref<1x8xf32, #tpu.memory_space<vmem>>, vector<1x8xf32>
    %27 = vector.broadcast %26 : vector<1x8xf32> to vector<16x8xf32>
    %28 = arith.addf %25, %27 : vector<16x8xf32>
    %c0_22 = arith.constant 0 : index
    %c0_23 = arith.constant 0 : index
    %29 = vector.load %arg3[%c0_22, %c0_23] : memref<16x16xf32, #tpu.memory_space<vmem>>, vector<16x16xf32>
    %c0_24 = arith.constant 0 : index
    %c0_25 = arith.constant 0 : index
    %30 = vector.load %arg4[%c0_24, %c0_25] : memref<16x16xf32, #tpu.memory_space<vmem>>, vector<16x16xf32>
    %c0_26 = arith.constant 0 : index
    %c0_27 = arith.constant 0 : index
    %31 = vector.load %arg11[%c0_26, %c0_27] : memref<8x24xf32, #tpu.memory_space<vmem>>, vector<8x24xf32>
    %c0_28 = arith.constant 0 : index
    %c0_29 = arith.constant 0 : index
    %32 = vector.load %arg12[%c0_28, %c0_29] : memref<8x16xf32, #tpu.memory_space<vmem>>, vector<8x16xf32>
    %c0_30 = arith.constant 0 : index
    %c0_31 = arith.constant 0 : index
    %33 = vector.load %arg13[%c0_30, %c0_31] : memref<8x8xf32, #tpu.memory_space<vmem>>, vector<8x8xf32>
    %c0_32 = arith.constant 0 : index
    %c0_33 = arith.constant 0 : index
    %34 = vector.load %arg14[%c0_32, %c0_33] : memref<1x24xf32, #tpu.memory_space<vmem>>, vector<1x24xf32>
    %c0_34 = arith.constant 0 : index
    %c0_35 = arith.constant 0 : index
    %35 = vector.load %arg15[%c0_34, %c0_35] : memref<8x8xf32, #tpu.memory_space<vmem>>, vector<8x8xf32>
    %c0_36 = arith.constant 0 : index
    %c0_37 = arith.constant 0 : index
    %36 = vector.load %arg16[%c0_36, %c0_37] : memref<1x8xf32, #tpu.memory_space<vmem>>, vector<1x8xf32>
    %37 = vector.extract_strided_slice %14 {offsets = [0, 0], sizes = [16, 48], strides = [1, 1]} : vector<16x96xf32> to vector<16x48xf32>
    %38 = vector.extract_strided_slice %37 {offsets = [0, 0], sizes = [16, 8], strides = [1, 1]} : vector<16x48xf32> to vector<16x8xf32>
    %39 = vector.extract_strided_slice %37 {offsets = [0, 8], sizes = [16, 8], strides = [1, 1]} : vector<16x48xf32> to vector<16x8xf32>
    %40 = arith.addf %38, %39 : vector<16x8xf32>
    %41 = vector.extract_strided_slice %37 {offsets = [0, 16], sizes = [16, 8], strides = [1, 1]} : vector<16x48xf32> to vector<16x8xf32>
    %42 = arith.addf %40, %41 : vector<16x8xf32>
    %43 = vector.extract_strided_slice %37 {offsets = [0, 24], sizes = [16, 8], strides = [1, 1]} : vector<16x48xf32> to vector<16x8xf32>
    %44 = arith.addf %42, %43 : vector<16x8xf32>
    %45 = vector.extract_strided_slice %37 {offsets = [0, 32], sizes = [16, 8], strides = [1, 1]} : vector<16x48xf32> to vector<16x8xf32>
    %46 = arith.addf %44, %45 : vector<16x8xf32>
    %47 = vector.extract_strided_slice %37 {offsets = [0, 40], sizes = [16, 8], strides = [1, 1]} : vector<16x48xf32> to vector<16x8xf32>
    %48 = arith.addf %46, %47 : vector<16x8xf32>
    %cst_38 = arith.constant 0.166666672 : f32
    %49 = vector.broadcast %cst_38 : f32 to vector<16x8xf32>
    %50 = arith.mulf %48, %49 : vector<16x8xf32>
    %cst_39 = arith.constant dense<0.000000e+00> : vector<16x24xf32>
    %51 = tpu.matmul %50, %31, %cst_39 {dimension_numbers = #tpu.dot_dimension_numbers<[1], [0], [0], [1], [0, 0, 1, 1], [], []>} : vector<16x8xf32>, vector<8x24xf32>, vector<16x24xf32> -> vector<16x24xf32>
    %52 = vector.broadcast %34 : vector<1x24xf32> to vector<16x24xf32>
    %53 = arith.addf %51, %52 : vector<16x24xf32>
    %cst_40 = arith.constant dense<0.000000e+00> : vector<16x16xf32>
    %54 = tpu.matmul %28, %32, %cst_40 {dimension_numbers = #tpu.dot_dimension_numbers<[1], [0], [0], [1], [0, 0, 1, 1], [], []>} : vector<16x8xf32>, vector<8x16xf32>, vector<16x16xf32> -> vector<16x16xf32>
    %55 = vector.extract_strided_slice %53 {offsets = [0, 0], sizes = [16, 8], strides = [1, 1]} : vector<16x24xf32> to vector<16x8xf32>
    %56 = vector.extract_strided_slice %54 {offsets = [0, 0], sizes = [16, 8], strides = [1, 1]} : vector<16x16xf32> to vector<16x8xf32>
    %57 = arith.addf %55, %56 : vector<16x8xf32>
    %58 = arith.negf %57 : vector<16x8xf32>
    %59 = math.exp %58 : vector<16x8xf32>
    %cst_41 = arith.constant 1.000000e+00 : f32
    %60 = vector.broadcast %cst_41 : f32 to vector<16x8xf32>
    %61 = arith.addf %60, %59 : vector<16x8xf32>
    %62 = arith.divf %60, %61 : vector<16x8xf32>
    %63 = vector.extract_strided_slice %53 {offsets = [0, 8], sizes = [16, 8], strides = [1, 1]} : vector<16x24xf32> to vector<16x8xf32>
    %64 = vector.extract_strided_slice %54 {offsets = [0, 8], sizes = [16, 8], strides = [1, 1]} : vector<16x16xf32> to vector<16x8xf32>
    %65 = arith.addf %63, %64 : vector<16x8xf32>
    %66 = arith.negf %65 : vector<16x8xf32>
    %67 = math.exp %66 : vector<16x8xf32>
    %cst_42 = arith.constant 1.000000e+00 : f32
    %68 = vector.broadcast %cst_42 : f32 to vector<16x8xf32>
    %69 = arith.addf %68, %67 : vector<16x8xf32>
    %70 = arith.divf %68, %69 : vector<16x8xf32>
    %71 = vector.extract_strided_slice %53 {offsets = [0, 16], sizes = [16, 8], strides = [1, 1]} : vector<16x24xf32> to vector<16x8xf32>
    %72 = arith.mulf %70, %28 : vector<16x8xf32>
    %cst_43 = arith.constant dense<0.000000e+00> : vector<16x8xf32>
    %73 = tpu.matmul %72, %33, %cst_43 {dimension_numbers = #tpu.dot_dimension_numbers<[1], [0], [0], [1], [0, 0, 1, 1], [], []>} : vector<16x8xf32>, vector<8x8xf32>, vector<16x8xf32> -> vector<16x8xf32>
    %74 = arith.addf %71, %73 : vector<16x8xf32>
    %75 = math.tanh %74 : vector<16x8xf32>
    %76 = arith.mulf %62, %28 : vector<16x8xf32>
    %cst_44 = arith.constant 1.000000e+00 : f32
    %77 = vector.broadcast %cst_44 : f32 to vector<16x8xf32>
    %78 = arith.subf %77, %62 : vector<16x8xf32>
    %79 = arith.mulf %78, %75 : vector<16x8xf32>
    %80 = arith.addf %76, %79 : vector<16x8xf32>
    %cst_45 = arith.constant dense<0.000000e+00> : vector<16x8xf32>
    %81 = tpu.matmul %80, %35, %cst_45 {dimension_numbers = #tpu.dot_dimension_numbers<[1], [0], [0], [1], [0, 0, 1, 1], [], []>} : vector<16x8xf32>, vector<8x8xf32>, vector<16x8xf32> -> vector<16x8xf32>
    %82 = vector.broadcast %36 : vector<1x8xf32> to vector<16x8xf32>
    %83 = arith.addf %81, %82 : vector<16x8xf32>
    %84 = math.tanh %83 : vector<16x8xf32>
    %cst_46 = arith.constant dense<0.000000e+00> : vector<16x16xf32>
    %85 = tpu.matmul %84, %84, %cst_46 {dimension_numbers = #tpu.dot_dimension_numbers<[1], [1], [0], [0], [0, 0, 1, 0], [], []>} : vector<16x8xf32>, vector<16x8xf32>, vector<16x16xf32> -> vector<16x16xf32>
    %86 = math.tanh %85 : vector<16x16xf32>
    %cst_47 = arith.constant 0.000000e+00 : f32
    %87 = vector.broadcast %cst_47 : f32 to vector<16x16xf32>
    %88 = arith.maximumf %86, %87 : vector<16x16xf32>
    %89 = arith.mulf %88, %29 : vector<16x16xf32>
    %cst_48 = arith.constant dense<0xFF800000> : vector<16xf32>
    %90 = vector.multi_reduction <maximumf>, %89, %cst_48 [1] : vector<16x16xf32> to vector<16xf32>
    %91 = vector.shape_cast %90 : vector<16xf32> to vector<16x1xf32>
    %92 = vector.broadcast %91 : vector<16x1xf32> to vector<16x16xf32>
    %93 = arith.subf %89, %92 : vector<16x16xf32>
    %94 = math.exp %93 : vector<16x16xf32>
    %95 = arith.mulf %94, %29 : vector<16x16xf32>
    %cst_49 = arith.constant dense<0.000000e+00> : vector<16xf32>
    %96 = vector.multi_reduction <add>, %95, %cst_49 [1] : vector<16x16xf32> to vector<16xf32>
    %97 = vector.shape_cast %96 : vector<16xf32> to vector<16x1xf32>
    %98 = vector.broadcast %97 : vector<16x1xf32> to vector<16x16xf32>
    %99 = arith.divf %95, %98 : vector<16x16xf32>
    %100 = arith.addf %99, %30 : vector<16x16xf32>
    %cst_50 = arith.constant dense<0.000000e+00> : vector<16xf32>
    %101 = vector.multi_reduction <add>, %100, %cst_50 [1] : vector<16x16xf32> to vector<16xf32>
    %102 = vector.shape_cast %101 : vector<16xf32> to vector<16x1xf32>
    %103 = vector.broadcast %102 : vector<16x1xf32> to vector<16x16xf32>
    %104 = arith.divf %100, %103 : vector<16x16xf32>
    %cst_51 = arith.constant 5.000000e-02 : f32
    %105 = vector.broadcast %cst_51 : f32 to vector<16x48xf32>
    %106 = arith.mulf %105, %37 : vector<16x48xf32>
    %cst_52 = arith.constant dense<0.000000e+00> : vector<16x48xf32>
    %107 = tpu.matmul %104, %37, %cst_52 {dimension_numbers = #tpu.dot_dimension_numbers<[1], [0], [0], [1], [0, 0, 1, 1], [], []>} : vector<16x16xf32>, vector<16x48xf32>, vector<16x48xf32> -> vector<16x48xf32>
    %cst_53 = arith.constant 0.949999988 : f32
    %108 = vector.broadcast %cst_53 : f32 to vector<16x48xf32>
    %109 = arith.mulf %108, %107 : vector<16x48xf32>
    %110 = arith.addf %106, %109 : vector<16x48xf32>
    %cst_54 = arith.constant 5.000000e-02 : f32
    %111 = vector.broadcast %cst_54 : f32 to vector<16x48xf32>
    %112 = arith.mulf %111, %37 : vector<16x48xf32>
    %cst_55 = arith.constant dense<0.000000e+00> : vector<16x48xf32>
    %113 = tpu.matmul %104, %110, %cst_55 {dimension_numbers = #tpu.dot_dimension_numbers<[1], [0], [0], [1], [0, 0, 1, 1], [], []>} : vector<16x16xf32>, vector<16x48xf32>, vector<16x48xf32> -> vector<16x48xf32>
    %cst_56 = arith.constant 0.949999988 : f32
    %114 = vector.broadcast %cst_56 : f32 to vector<16x48xf32>
    %115 = arith.mulf %114, %113 : vector<16x48xf32>
    %116 = arith.addf %112, %115 : vector<16x48xf32>
    %117 = vector.extract_strided_slice %14 {offsets = [0, 48], sizes = [16, 48], strides = [1, 1]} : vector<16x96xf32> to vector<16x48xf32>
    %118 = vector.extract_strided_slice %117 {offsets = [0, 0], sizes = [16, 8], strides = [1, 1]} : vector<16x48xf32> to vector<16x8xf32>
    %119 = vector.extract_strided_slice %117 {offsets = [0, 8], sizes = [16, 8], strides = [1, 1]} : vector<16x48xf32> to vector<16x8xf32>
    %120 = arith.addf %118, %119 : vector<16x8xf32>
    %121 = vector.extract_strided_slice %117 {offsets = [0, 16], sizes = [16, 8], strides = [1, 1]} : vector<16x48xf32> to vector<16x8xf32>
    %122 = arith.addf %120, %121 : vector<16x8xf32>
    %123 = vector.extract_strided_slice %117 {offsets = [0, 24], sizes = [16, 8], strides = [1, 1]} : vector<16x48xf32> to vector<16x8xf32>
    %124 = arith.addf %122, %123 : vector<16x8xf32>
    %125 = vector.extract_strided_slice %117 {offsets = [0, 32], sizes = [16, 8], strides = [1, 1]} : vector<16x48xf32> to vector<16x8xf32>
    %126 = arith.addf %124, %125 : vector<16x8xf32>
    %127 = vector.extract_strided_slice %117 {offsets = [0, 40], sizes = [16, 8], strides = [1, 1]} : vector<16x48xf32> to vector<16x8xf32>
    %128 = arith.addf %126, %127 : vector<16x8xf32>
    %cst_57 = arith.constant 0.166666672 : f32
    %129 = vector.broadcast %cst_57 : f32 to vector<16x8xf32>
    %130 = arith.mulf %128, %129 : vector<16x8xf32>
    %cst_58 = arith.constant dense<0.000000e+00> : vector<16x24xf32>
    %131 = tpu.matmul %130, %31, %cst_58 {dimension_numbers = #tpu.dot_dimension_numbers<[1], [0], [0], [1], [0, 0, 1, 1], [], []>} : vector<16x8xf32>, vector<8x24xf32>, vector<16x24xf32> -> vector<16x24xf32>
    %132 = vector.broadcast %34 : vector<1x24xf32> to vector<16x24xf32>
    %133 = arith.addf %131, %132 : vector<16x24xf32>
    %cst_59 = arith.constant dense<0.000000e+00> : vector<16x16xf32>
    %134 = tpu.matmul %80, %32, %cst_59 {dimension_numbers = #tpu.dot_dimension_numbers<[1], [0], [0], [1], [0, 0, 1, 1], [], []>} : vector<16x8xf32>, vector<8x16xf32>, vector<16x16xf32> -> vector<16x16xf32>
    %135 = vector.extract_strided_slice %133 {offsets = [0, 0], sizes = [16, 8], strides = [1, 1]} : vector<16x24xf32> to vector<16x8xf32>
    %136 = vector.extract_strided_slice %134 {offsets = [0, 0], sizes = [16, 8], strides = [1, 1]} : vector<16x16xf32> to vector<16x8xf32>
    %137 = arith.addf %135, %136 : vector<16x8xf32>
    %138 = arith.negf %137 : vector<16x8xf32>
    %139 = math.exp %138 : vector<16x8xf32>
    %cst_60 = arith.constant 1.000000e+00 : f32
    %140 = vector.broadcast %cst_60 : f32 to vector<16x8xf32>
    %141 = arith.addf %140, %139 : vector<16x8xf32>
    %142 = arith.divf %140, %141 : vector<16x8xf32>
    %143 = vector.extract_strided_slice %133 {offsets = [0, 8], sizes = [16, 8], strides = [1, 1]} : vector<16x24xf32> to vector<16x8xf32>
    %144 = vector.extract_strided_slice %134 {offsets = [0, 8], sizes = [16, 8], strides = [1, 1]} : vector<16x16xf32> to vector<16x8xf32>
    %145 = arith.addf %143, %144 : vector<16x8xf32>
    %146 = arith.negf %145 : vector<16x8xf32>
    %147 = math.exp %146 : vector<16x8xf32>
    %cst_61 = arith.constant 1.000000e+00 : f32
    %148 = vector.broadcast %cst_61 : f32 to vector<16x8xf32>
    %149 = arith.addf %148, %147 : vector<16x8xf32>
    %150 = arith.divf %148, %149 : vector<16x8xf32>
    %151 = vector.extract_strided_slice %133 {offsets = [0, 16], sizes = [16, 8], strides = [1, 1]} : vector<16x24xf32> to vector<16x8xf32>
    %152 = arith.mulf %150, %80 : vector<16x8xf32>
    %cst_62 = arith.constant dense<0.000000e+00> : vector<16x8xf32>
    %153 = tpu.matmul %152, %33, %cst_62 {dimension_numbers = #tpu.dot_dimension_numbers<[1], [0], [0], [1], [0, 0, 1, 1], [], []>} : vector<16x8xf32>, vector<8x8xf32>, vector<16x8xf32> -> vector<16x8xf32>
    %154 = arith.addf %151, %153 : vector<16x8xf32>
    %155 = math.tanh %154 : vector<16x8xf32>
    %156 = arith.mulf %142, %80 : vector<16x8xf32>
    %cst_63 = arith.constant 1.000000e+00 : f32
    %157 = vector.broadcast %cst_63 : f32 to vector<16x8xf32>
    %158 = arith.subf %157, %142 : vector<16x8xf32>
    %159 = arith.mulf %158, %155 : vector<16x8xf32>
    %160 = arith.addf %156, %159 : vector<16x8xf32>
    %cst_64 = arith.constant dense<0.000000e+00> : vector<16x8xf32>
    %161 = tpu.matmul %160, %35, %cst_64 {dimension_numbers = #tpu.dot_dimension_numbers<[1], [0], [0], [1], [0, 0, 1, 1], [], []>} : vector<16x8xf32>, vector<8x8xf32>, vector<16x8xf32> -> vector<16x8xf32>
    %162 = vector.broadcast %36 : vector<1x8xf32> to vector<16x8xf32>
    %163 = arith.addf %161, %162 : vector<16x8xf32>
    %164 = math.tanh %163 : vector<16x8xf32>
    %cst_65 = arith.constant dense<0.000000e+00> : vector<16x16xf32>
    %165 = tpu.matmul %164, %164, %cst_65 {dimension_numbers = #tpu.dot_dimension_numbers<[1], [1], [0], [0], [0, 0, 1, 0], [], []>} : vector<16x8xf32>, vector<16x8xf32>, vector<16x16xf32> -> vector<16x16xf32>
    %166 = math.tanh %165 : vector<16x16xf32>
    %cst_66 = arith.constant 0.000000e+00 : f32
    %167 = vector.broadcast %cst_66 : f32 to vector<16x16xf32>
    %168 = arith.maximumf %166, %167 : vector<16x16xf32>
    %169 = arith.mulf %168, %29 : vector<16x16xf32>
    %cst_67 = arith.constant dense<0xFF800000> : vector<16xf32>
    %170 = vector.multi_reduction <maximumf>, %169, %cst_67 [1] : vector<16x16xf32> to vector<16xf32>
    %171 = vector.shape_cast %170 : vector<16xf32> to vector<16x1xf32>
    %172 = vector.broadcast %171 : vector<16x1xf32> to vector<16x16xf32>
    %173 = arith.subf %169, %172 : vector<16x16xf32>
    %174 = math.exp %173 : vector<16x16xf32>
    %175 = arith.mulf %174, %29 : vector<16x16xf32>
    %cst_68 = arith.constant dense<0.000000e+00> : vector<16xf32>
    %176 = vector.multi_reduction <add>, %175, %cst_68 [1] : vector<16x16xf32> to vector<16xf32>
    %177 = vector.shape_cast %176 : vector<16xf32> to vector<16x1xf32>
    %178 = vector.broadcast %177 : vector<16x1xf32> to vector<16x16xf32>
    %179 = arith.divf %175, %178 : vector<16x16xf32>
    %180 = arith.addf %179, %30 : vector<16x16xf32>
    %cst_69 = arith.constant dense<0.000000e+00> : vector<16xf32>
    %181 = vector.multi_reduction <add>, %180, %cst_69 [1] : vector<16x16xf32> to vector<16xf32>
    %182 = vector.shape_cast %181 : vector<16xf32> to vector<16x1xf32>
    %183 = vector.broadcast %182 : vector<16x1xf32> to vector<16x16xf32>
    %184 = arith.divf %180, %183 : vector<16x16xf32>
    %cst_70 = arith.constant 5.000000e-02 : f32
    %185 = vector.broadcast %cst_70 : f32 to vector<16x48xf32>
    %186 = arith.mulf %185, %117 : vector<16x48xf32>
    %cst_71 = arith.constant dense<0.000000e+00> : vector<16x48xf32>
    %187 = tpu.matmul %184, %117, %cst_71 {dimension_numbers = #tpu.dot_dimension_numbers<[1], [0], [0], [1], [0, 0, 1, 1], [], []>} : vector<16x16xf32>, vector<16x48xf32>, vector<16x48xf32> -> vector<16x48xf32>
    %cst_72 = arith.constant 0.949999988 : f32
    %188 = vector.broadcast %cst_72 : f32 to vector<16x48xf32>
    %189 = arith.mulf %188, %187 : vector<16x48xf32>
    %190 = arith.addf %186, %189 : vector<16x48xf32>
    %cst_73 = arith.constant 5.000000e-02 : f32
    %191 = vector.broadcast %cst_73 : f32 to vector<16x48xf32>
    %192 = arith.mulf %191, %117 : vector<16x48xf32>
    %cst_74 = arith.constant dense<0.000000e+00> : vector<16x48xf32>
    %193 = tpu.matmul %184, %190, %cst_74 {dimension_numbers = #tpu.dot_dimension_numbers<[1], [0], [0], [1], [0, 0, 1, 1], [], []>} : vector<16x16xf32>, vector<16x48xf32>, vector<16x48xf32> -> vector<16x48xf32>
    %cst_75 = arith.constant 0.949999988 : f32
    %194 = vector.broadcast %cst_75 : f32 to vector<16x48xf32>
    %195 = arith.mulf %194, %193 : vector<16x48xf32>
    %196 = arith.addf %192, %195 : vector<16x48xf32>
    %197 = tpu.concatenate %37, %117 in 1 : vector<16x48xf32>, vector<16x48xf32> -> vector<16x96xf32>
    %198 = tpu.concatenate %110, %190 in 1 : vector<16x48xf32>, vector<16x48xf32> -> vector<16x96xf32>
    %199 = tpu.concatenate %116, %196 in 1 : vector<16x48xf32>, vector<16x48xf32> -> vector<16x96xf32>
    %200 = tpu.concatenate %197, %198, %199 in 1 : vector<16x96xf32>, vector<16x96xf32>, vector<16x96xf32> -> vector<16x288xf32>
    %c0_76 = arith.constant 0 : index
    %c0_77 = arith.constant 0 : index
    %201 = vector.load %arg17[%c0_76, %c0_77] : memref<288x96xf32, #tpu.memory_space<vmem>>, vector<288x96xf32>
    %cst_78 = arith.constant dense<0.000000e+00> : vector<16x96xf32>
    %202 = tpu.matmul %200, %201, %cst_78 {dimension_numbers = #tpu.dot_dimension_numbers<[1], [0], [0], [1], [0, 0, 1, 1], [], []>} : vector<16x288xf32>, vector<288x96xf32>, vector<16x96xf32> -> vector<16x96xf32>
    %c0_79 = arith.constant 0 : index
    %c0_80 = arith.constant 0 : index
    %203 = vector.load %arg18[%c0_79, %c0_80] : memref<1x96xf32, #tpu.memory_space<vmem>>, vector<1x96xf32>
    %204 = vector.broadcast %203 : vector<1x96xf32> to vector<16x96xf32>
    %205 = arith.addf %202, %204 : vector<16x96xf32>
    %206 = vector.extract_strided_slice %0 {offsets = [0, 16], sizes = [16, 96], strides = [1, 1]} : vector<16x112xf32> to vector<16x96xf32>
    %207 = arith.addf %205, %206 : vector<16x96xf32>
    %c0_81 = arith.constant 0 : index
    %c0_82 = arith.constant 0 : index
    %208 = vector.load %arg19[%c0_81, %c0_82] : memref<16x96xf32, #tpu.memory_space<vmem>>, vector<16x96xf32>
    %c0_83 = arith.constant 0 : index
    %c0_84 = arith.constant 0 : index
    %209 = vector.load %arg20[%c0_83, %c0_84] : memref<16x96xf32, #tpu.memory_space<vmem>>, vector<16x96xf32>
    %210 = vector.extract_strided_slice %207 {offsets = [0, 0], sizes = [8, 96], strides = [1, 1]} : vector<16x96xf32> to vector<8x96xf32>
    %211 = vector.shape_cast %210 : vector<8x96xf32> to vector<1x8x96xf32>
    %cst_85 = arith.constant dense<0.000000e+00> : vector<1xf32>
    %212 = vector.multi_reduction <add>, %211, %cst_85 [1, 2] : vector<1x8x96xf32> to vector<1xf32>
    %213 = vector.shape_cast %212 : vector<1xf32> to vector<1x1x1xf32>
    %214 = vector.extract %213[0, 0, 0] : f32 from vector<1x1x1xf32>
    %215 = vector.broadcast %214 : f32 to vector<1x1xf32>
    %cst_86 = arith.constant 7.680000e+02 : f32
    %216 = vector.broadcast %cst_86 : f32 to vector<1x1xf32>
    %217 = arith.divf %215, %216 : vector<1x1xf32>
    %218 = vector.broadcast %217 : vector<1x1xf32> to vector<8x96xf32>
    %219 = arith.subf %210, %218 : vector<8x96xf32>
    %220 = arith.mulf %219, %219 : vector<8x96xf32>
    %221 = vector.shape_cast %220 : vector<8x96xf32> to vector<1x8x96xf32>
    %cst_87 = arith.constant dense<0.000000e+00> : vector<1xf32>
    %222 = vector.multi_reduction <add>, %221, %cst_87 [1, 2] : vector<1x8x96xf32> to vector<1xf32>
    %223 = vector.shape_cast %222 : vector<1xf32> to vector<1x1x1xf32>
    %224 = vector.extract %223[0, 0, 0] : f32 from vector<1x1x1xf32>
    %225 = vector.broadcast %224 : f32 to vector<1x1xf32>
    %cst_88 = arith.constant 7.680000e+02 : f32
    %226 = vector.broadcast %cst_88 : f32 to vector<1x1xf32>
    %227 = arith.divf %225, %226 : vector<1x1xf32>
    %228 = vector.broadcast %217 : vector<1x1xf32> to vector<8x96xf32>
    %229 = arith.subf %210, %228 : vector<8x96xf32>
    %cst_89 = arith.constant 9.99999974E-6 : f32
    %230 = vector.broadcast %cst_89 : f32 to vector<1x1xf32>
    %231 = arith.addf %227, %230 : vector<1x1xf32>
    %232 = math.rsqrt %231 : vector<1x1xf32>
    %233 = vector.broadcast %232 : vector<1x1xf32> to vector<8x96xf32>
    %234 = arith.mulf %229, %233 : vector<8x96xf32>
    %235 = vector.extract_strided_slice %208 {offsets = [0, 0], sizes = [8, 96], strides = [1, 1]} : vector<16x96xf32> to vector<8x96xf32>
    %236 = arith.mulf %234, %235 : vector<8x96xf32>
    %237 = vector.extract_strided_slice %209 {offsets = [0, 0], sizes = [8, 96], strides = [1, 1]} : vector<16x96xf32> to vector<8x96xf32>
    %238 = arith.addf %236, %237 : vector<8x96xf32>
    %239 = vector.extract_strided_slice %207 {offsets = [8, 0], sizes = [8, 96], strides = [1, 1]} : vector<16x96xf32> to vector<8x96xf32>
    %240 = vector.shape_cast %239 : vector<8x96xf32> to vector<1x8x96xf32>
    %cst_90 = arith.constant dense<0.000000e+00> : vector<1xf32>
    %241 = vector.multi_reduction <add>, %240, %cst_90 [1, 2] : vector<1x8x96xf32> to vector<1xf32>
    %242 = vector.shape_cast %241 : vector<1xf32> to vector<1x1x1xf32>
    %243 = vector.extract %242[0, 0, 0] : f32 from vector<1x1x1xf32>
    %244 = vector.broadcast %243 : f32 to vector<1x1xf32>
    %cst_91 = arith.constant 7.680000e+02 : f32
    %245 = vector.broadcast %cst_91 : f32 to vector<1x1xf32>
    %246 = arith.divf %244, %245 : vector<1x1xf32>
    %247 = vector.broadcast %246 : vector<1x1xf32> to vector<8x96xf32>
    %248 = arith.subf %239, %247 : vector<8x96xf32>
    %249 = arith.mulf %248, %248 : vector<8x96xf32>
    %250 = vector.shape_cast %249 : vector<8x96xf32> to vector<1x8x96xf32>
    %cst_92 = arith.constant dense<0.000000e+00> : vector<1xf32>
    %251 = vector.multi_reduction <add>, %250, %cst_92 [1, 2] : vector<1x8x96xf32> to vector<1xf32>
    %252 = vector.shape_cast %251 : vector<1xf32> to vector<1x1x1xf32>
    %253 = vector.extract %252[0, 0, 0] : f32 from vector<1x1x1xf32>
    %254 = vector.broadcast %253 : f32 to vector<1x1xf32>
    %cst_93 = arith.constant 7.680000e+02 : f32
    %255 = vector.broadcast %cst_93 : f32 to vector<1x1xf32>
    %256 = arith.divf %254, %255 : vector<1x1xf32>
    %257 = vector.broadcast %246 : vector<1x1xf32> to vector<8x96xf32>
    %258 = arith.subf %239, %257 : vector<8x96xf32>
    %cst_94 = arith.constant 9.99999974E-6 : f32
    %259 = vector.broadcast %cst_94 : f32 to vector<1x1xf32>
    %260 = arith.addf %256, %259 : vector<1x1xf32>
    %261 = math.rsqrt %260 : vector<1x1xf32>
    %262 = vector.broadcast %261 : vector<1x1xf32> to vector<8x96xf32>
    %263 = arith.mulf %258, %262 : vector<8x96xf32>
    %264 = vector.extract_strided_slice %208 {offsets = [8, 0], sizes = [8, 96], strides = [1, 1]} : vector<16x96xf32> to vector<8x96xf32>
    %265 = arith.mulf %263, %264 : vector<8x96xf32>
    %266 = vector.extract_strided_slice %209 {offsets = [8, 0], sizes = [8, 96], strides = [1, 1]} : vector<16x96xf32> to vector<8x96xf32>
    %267 = arith.addf %265, %266 : vector<8x96xf32>
    %268 = tpu.concatenate %238, %267 in 0 : vector<8x96xf32>, vector<8x96xf32> -> vector<16x96xf32>
    %c0_95 = arith.constant 0 : index
    %c0_96 = arith.constant 0 : index
    %269 = vector.load %arg21[%c0_95, %c0_96] : memref<16x96xf32, #tpu.memory_space<vmem>>, vector<16x96xf32>
    tpu.vector_store %arg21[%c0_95, %c0_96], %268 {strides = array<i32>} : memref<16x96xf32, #tpu.memory_space<vmem>>, vector<16x96xf32>,
    return
  }
}

</mosaic_0001>

<bundles_post_ra>
// kernel: _lambda_.4
= control target key start
LH: loop header
LB: loop body
LE: loop exit
PB: predicated region body
PF: predicated region fallthrough
CT: control target
= control target key end

     0   :  { %v390_v0 = vmov 0.0|0.0   ;;  %vm391_vm0 = vmmov 0   ;;  %v392_v4 = vmov 0.0   ;;  %vm45_vm1 = vcmask 261120   ;;  %s522_s4 = inlined_call_operand.vmem [shape: f32[16,8], index: 4, kind: input, shape index: {}]   ;;  %s523_s2 = inlined_call_operand.vmem [shape: f32[32,128], index: 2, kind: input, shape index: {}]   ;;  %s524_s1 = inlined_call_operand.vmem [shape: f32[8,16], index: 1, kind: input, shape index: {}]   ;;  %s525_s6 = inlined_call_operand.vmem [shape: f32[32,8], index: 6, kind: input, shape index: {}]   ;;  %s526_s0 = inlined_call_operand.vmem [shape: f32[16,32], index: 0, kind: input, shape index: {}]   ;;  %s527_s5 = inlined_call_operand.vmem [shape: f32[1,8], index: 5, kind: input, shape index: {}]   ;;  %s528_s9 = inlined_call_operand.vmem [shape: f32[16,8], index: 9, kind: output, shape index: {1}]   ;;  %s529_s3 = inlined_call_operand.vmem [shape: f32[1,128], index: 3, kind: input, shape index: {}]   ;;  %s530_s7 = inlined_call_operand.vmem [shape: f32[1,8], index: 7, kind: input, shape index: {}]   ;;  %s531_s8 = inlined_call_operand.vmem [shape: f32[16,128], index: 8, kind: output, shape index: {0}]   ;;  %s532_s10 = inlined_call_operand.vmem [shape: f32[16,8], index: 10, kind: output, shape index: {2}]  }
   0x1   :  { %376 = vmatprep.subr.bf16.mxu1 %v390_v0  ;;  %v130_v1 = vld [vmem:[%s522_s4] sm:$0xff]  ;;  %v131_v2 = vld [vmem:[%s522_s4 + $0x8] sm:$0xff]  ;;  %354 = vmatprep.mubr.msk.f32.mxu1 %vm391_vm0, %v392_v4  ;;  %v36_v11 = vld [vmem:[%s523_s2 + $0x10] sm:$0xff]  ;;  %vm139_vm2 = vcmask 130048   ;;  %vm213_vm3 = vcmask 64512  }
   0x2   :  { %v34_v3 = vld [vmem:[%s523_s2] sm:$0xff]  ;;  %v377_v5 = vpack.c.bf16 %v131_v2, %v130_v1  ;;  %v35_v6 = vld [vmem:[%s523_s2 + $0x8] sm:$0xff]  ;;  %v37_v12 = vld [vmem:[%s523_s2 + $0x18] sm:$0xff] }
   0x3   :  { %v129_v7 = vld [vmem:[%s524_s1] sm:$0xff]  ;;  %v368_v9 = vpack.c.bf16 %v35_v6, %v34_v3  ;;  %v217_v10 = vld [vmem:[%s525_s6 + $0x8] sm:$0xff]  ;;  %v372_v14 = vpack.c.bf16 %v37_v12, %v36_v11  ;;  %v218_v15 = vld [vmem:[%s525_s6 + $0x10] sm:$0xff] }
   0x4   :  { %v216_v8 = vld [vmem:[%s525_s6] sm:$0xff]  ;;  %378 = vmatpush3.bf16.msra.mxu1 %v377_v5  ;;  %v219_v16 = vld [vmem:[%s525_s6 + $0x18] sm:$0xff]  ;;  %v33_v19 = vld [vmem:[%s526_s0 + $0x8] sm:$0xff] }
   0x5   :  { %v379_v13 = vpack.c.bf16 %v217_v10, %v216_v8  ;;  %v32_v17 = vld [vmem:[%s526_s0] sm:$0xff]  ;;  %369 = vmatprep.subr.bf16.mxu0 %v368_v9  ;;  %v383_v18 = vpack.c.bf16 %v219_v16, %v218_v15 }
   0x6   :  { %347 = vmatprep.mubr.msk.f32.mxu0 %vm45_vm1, %v32_v17  ;;  %371 = vmatpush3.bf16.msra.mxu0 %v368_v9  ;;  %v319_v20 = vld [vmem:[%s527_s5] ss:$0 sm:$0xff] }
   0x7   :  { %380 = vmatprep.subr.bf16.mxu1 %v379_v13  ;;  %355 = vmatmul.mubr.msk.f32.vlgmr.msra.gmra.mrb[0].mxu1 %vm139_vm2, %v129_v7  ;;  %v316_v24 = vld [vmem:[%s529_s3] ss:$0 sm:$0xff] }
   0x8   :  { %373 = vmatprep.subr.bf16.mxu0 %v372_v14  ;;  %382 = vmatpush3.bf16.msra.mxu1 %v379_v13  ;;  %v321_v26 = vld [vmem:[%s530_s7] ss:$0 sm:$0xff] }
   0x9   :  { %365 = vmatprep.mubr.msk.f32.mxu1 %vm45_vm1, %v32_v17  ;;  %384 = vmatprep.subr.bf16.mxu1 %v383_v18 }
   0xa   :  { %375 = vmatpush3.bf16.msra.mxu0 %v372_v14 }
   0xc   :  { %386 = vmatpush3.bf16.msra.mxu1 %v383_v18 }
   0xd   :  { %348 = vmatmul.mubr.msk.f32.vlgmr.msra.gmra.mrb[0].mxu0 %vm45_vm1, %v33_v19 }
   0xf   :  { %366 = vmatmul.mubr.msk.f32.vlgmr.msra.gmra.mrb[2].mxu1 %vm45_vm1, %v33_v19 }
  0xda   :  { %v209_v21 = vpop.f32.mrb[0].mxu1 }
  0xdb   :  { %v210_v22 = vadd.f32 %v319_v20, %v209_v21  ;;  %v356_v23 = vpop.f32.mrb[1].mxu1 }
  0xdd   :  { %214 = vst.msk [vmem:[%s528_s9] sm:$0xff] %vm213_vm3, %v210_v22  ;;  %215 = vst.msk [vmem:[%s528_s9 + $0x8] sm:$0xff] %vm213_vm3, %v210_v22 }
  0xe0   :  { %v349_v25 = vpop.f32.mrb[0].mxu0 }
  0xe1   :  { %v124_v27 = vadd.f32 %v349_v25, %v316_v24  ;;  %v118_v28 = vpop.f32.mrb[1].mxu0 }
  0xe2   :  { %v119_v29 = vadd.f32 %v316_v24, %v118_v28  ;;  %v367_v30 = vpop.f32.mrb[2].mxu1 }
  0xe3   :  { %128 = vst [vmem:[%s531_s8 + $0x8] sm:$0xff] %v124_v27  ;;  %v299_v31 = vadd.f32 %v367_v30, %v321_v26  ;;  %v293_v32 = vpop.f32.mrb[3].mxu1 }
  0xe4   :  { %127 = vst [vmem:[%s531_s8] sm:$0xff] %v119_v29  ;;  %v294_v33 = vadd.f32 %v321_v26, %v293_v32 }
  0xe5   :  { %303 = vst.msk [vmem:[%s532_s10 + $0x8] sm:$0xff] %vm213_vm3, %v299_v31 }
  0xe6   :  { %302 = vst.msk [vmem:[%s532_s10] sm:$0xff] %vm213_vm3, %v294_v33 }

// kernel: _lambda_.7
= control target key start
LH: loop header
LB: loop body
LE: loop exit
PB: predicated region body
PF: predicated region fallthrough
CT: control target
= control target key end

     0   :  { %vm45_vm0 = vcmask 785408   ;;  %vm148_vm1 = vcmask 64512   ;;  %vm241_vm2 = vcmask 130048   ;;  %vm323_vm3 = vcmask 31744   ;;  %s546_s2 = inlined_call_operand.vmem [shape: f32[96,8], index: 2, kind: input, shape index: {}]   ;;  %s547_s0 = inlined_call_operand.vmem [shape: f32[16,96], index: 0, kind: input, shape index: {}]   ;;  %s548_s4 = inlined_call_operand.vmem [shape: f32[8,16], index: 4, kind: input, shape index: {}]   ;;  %s549_s1 = inlined_call_operand.vmem [shape: f32[16,8], index: 1, kind: input, shape index: {}]   ;;  %s550_s3 = inlined_call_operand.vmem [shape: f32[1,8], index: 3, kind: input, shape index: {}]   ;;  %s551_s6 = inlined_call_operand.vmem [shape: f32[16,4], index: 6, kind: input, shape index: {}]   ;;  %s552_s5 = inlined_call_operand.vmem [shape: f32[1,16], index: 5, kind: input, shape index: {}]   ;;  %s553_s7 = inlined_call_operand.vmem [shape: f32[1,4], index: 7, kind: input, shape index: {}]   ;;  %s554_s8 = inlined_call_operand.vmem [shape: f32[16,4], index: 8, kind: output, shape index: {}]  }
   0x1   :  { %v33_v0 = vld [vmem:[%s546_s2] sm:$0xff]  ;;  %v34_v1 = vld [vmem:[%s546_s2 + $0x8] sm:$0xff]  ;;  %v35_v2 = vld [vmem:[%s546_s2 + $0x10] sm:$0xff] }
   0x2   :  { %v399_v3 = vpack.c.bf16 %v34_v1, %v33_v0  ;;  %v36_v4 = vld [vmem:[%s546_s2 + $0x18] sm:$0xff]  ;;  %v37_v6 = vld [vmem:[%s546_s2 + $0x20] sm:$0xff]  ;;  %v38_v7 = vld [vmem:[%s546_s2 + $0x28] sm:$0xff] }
   0x3   :  { %v403_v5 = vpack.c.bf16 %v36_v4, %v35_v2  ;;  %v31_v8 = vld [vmem:[%s547_s0] sm:$0xff]  ;;  %v407_v9 = vpack.c.bf16 %v38_v7, %v37_v6  ;;  %v39_v10 = vld [vmem:[%s546_s2 + $0x30] sm:$0xff]  ;;  %v40_v11 = vld [vmem:[%s546_s2 + $0x38] sm:$0xff] }
   0x4   :  { %400 = vmatprep.subr.bf16.mxu0 %v399_v3  ;;  %384 = vmatprep.mubr.msk.f32.mxu0 %vm45_vm0, %v31_v8  ;;  %v411_v12 = vpack.c.bf16 %v40_v11, %v39_v10  ;;  %v41_v13 = vld [vmem:[%s546_s2 + $0x40] sm:$0xff]  ;;  %v42_v14 = vld [vmem:[%s546_s2 + $0x48] sm:$0xff]  ;;  %v43_v16 = vld [vmem:[%s546_s2 + $0x50] sm:$0xff] }
   0x5   :  { %402 = vmatpush3.bf16.msra.mxu0 %v399_v3  ;;  %v415_v15 = vpack.c.bf16 %v42_v14, %v41_v13  ;;  %v44_v17 = vld [vmem:[%s546_s2 + $0x58] sm:$0xff]  ;;  %v32_v19 = vld [vmem:[%s547_s0 + $0x8] sm:$0xff]  ;;  %v140_v20 = vld [vmem:[%s548_s4] sm:$0xff] }
   0x6   :  { %404 = vmatprep.subr.bf16.mxu0 %v403_v5  ;;  %v419_v18 = vpack.c.bf16 %v44_v17, %v43_v16  ;;  %387 = vmatprep.subr.mxu1 %v140_v20  ;;  %v30_v21 = vld [vmem:[%s549_s1 + $0x8] sm:$0xff]  ;;  %v29_v22 = vld [vmem:[%s549_s1] sm:$0xff] }
   0x7   :  { %388 = vmatpush3.msra.mxu1 %v140_v20  ;;  %v332_v24 = vld [vmem:[%s550_s3] ss:$0 sm:$0xff]  ;;  %v233_v33 = vld [vmem:[%s551_s6 + $0x8] sm:$0xff] }
   0x8   :  { %v232_v32 = vld [vmem:[%s551_s6] sm:$0xff] }
   0x9   :  { %406 = vmatpush3.bf16.msra.mxu0 %v403_v5  ;;  %v423_v34 = vpack.c.bf16 %v233_v33, %v232_v32  ;;  %v333_v35 = vld [vmem:[%s552_s5] ss:$0 sm:$0xff] }
   0xa   :  { %408 = vmatprep.subr.bf16.mxu0 %v407_v9  ;;  %v336_v42 = vld [vmem:[%s553_s7] ss:$0 sm:$0xff] }
   0xb   :  { %424 = vmatprep.subr.bf16.mxu1 %v423_v34 }
   0xd   :  { %410 = vmatpush3.bf16.msra.mxu0 %v407_v9 }
   0xe   :  { %412 = vmatprep.subr.bf16.mxu0 %v411_v12 }
  0x11   :  { %414 = vmatpush3.bf16.msra.mxu0 %v411_v12 }
  0x12   :  { %416 = vmatprep.subr.bf16.mxu0 %v415_v15 }
  0x15   :  { %418 = vmatpush3.bf16.msra.mxu0 %v415_v15 }
  0x16   :  { %420 = vmatprep.subr.bf16.mxu0 %v419_v18 }
  0x19   :  { %422 = vmatpush3.bf16.msra.mxu0 %v419_v18 }
  0x1c   :  { %385 = vmatmul.mubr.msk.f32.vlgmr.msra.gmra.mrb[0].mxu0 %vm45_vm0, %v32_v19 }
  0xef   :  { %v386_v23 = vpop.f32.mrb[0].mxu0 }
  0xf0   :  { %v128_v25 = vadd.f32 %v386_v23, %v30_v21  ;;  %v118_v26 = vpop.f32.mrb[1].mxu0 }
  0xf1   :  { %v127_v27 = vadd.f32 %v118_v26, %v29_v22 }
  0xf2   :  { %v137_v28 = vadd.f32 %v332_v24, %v128_v25 }
  0xf3   :  { %v136_v29 = vadd.f32 %v332_v24, %v127_v27 }
  0xf4   :  { %v139_v31 = vmax.f32 %v137_v28, 0.0 }
  0xf5   :  { %v138_v30 = vmax.f32 %v136_v29, 0.0 }
  0xf7   :  { %389 = vmatprep.mubr.msk.f32.mxu1 %vm148_vm1, %v138_v30 }
  0xf8   :  { %390 = vmatmul.mubr.msk.f32.vlgmr.msra.gmra.mrb[0].mxu1 %vm148_vm1, %v139_v31 }
  0xf9   :  { %426 = vmatpush3.bf16.msra.mxu1 %v423_v34 }
 0x1cb   :  { %v391_v36 = vpop.f32.mrb[0].mxu1 }
 0x1cc   :  { %v227_v37 = vadd.f32 %v391_v36, %v333_v35  ;;  %v221_v38 = vpop.f32.mrb[1].mxu1 }
 0x1cd   :  { %v222_v39 = vadd.f32 %v333_v35, %v221_v38 }
 0x1ce   :  { %v231_v41 = vmax.f32 %v227_v37, 0.0 }
 0x1cf   :  { %v230_v40 = vmax.f32 %v222_v39, 0.0 }
 0x1d1   :  { %396 = vmatprep.mubr.msk.f32.mxu1 %vm241_vm2, %v230_v40 }
 0x1d2   :  { %397 = vmatmul.mubr.msk.f32.vlgmr.msra.gmra.mrb[2].mxu1 %vm241_vm2, %v231_v41 }
 0x2a5   :  { %v398_v43 = vpop.f32.mrb[2].mxu1 }
 0x2a6   :  { %v320_v44 = vadd.f32 %v398_v43, %v336_v42  ;;  %v314_v45 = vpop.f32.mrb[3].mxu1 }
 0x2a7   :  { %v315_v46 = vadd.f32 %v336_v42, %v314_v45 }
 0x2a8   :  { %325 = vst.msk [vmem:[%s554_s8 + $0x8] sm:$0xff] %vm323_vm3, %v320_v44 }
 0x2a9   :  { %324 = vst.msk [vmem:[%s554_s8] sm:$0xff] %vm323_vm3, %v315_v46 }

// kernel: _lambda_.6
= control target key start
LH: loop header
LB: loop body
LE: loop exit
PB: predicated region body
PF: predicated region fallthrough
CT: control target
= control target key end

     0   :  { %v2704_v3 = vmov 0.0   ;;  %vm112_vm0 = vcmask 916480   ;;  %vm348_vm1 = vcmask 64512   ;;  %v102_v60 = vlaneseq  ;;  %s2705_s27 = smov 32   ;;  %s2707_s28 = smov 112   ;;  %s3404_s5 = inlined_call_operand.vmem [shape: f32[112,192], index: 5, kind: input, shape index: {}]   ;;  %s3405_s0 = inlined_call_operand.vmem [shape: f32[16,112], index: 0, kind: input, shape index: {}]   ;;  %s3406_s9 = inlined_call_operand.vmem [shape: f32[8,8], index: 9, kind: input, shape index: {}]   ;;  %s3407_s1 = inlined_call_operand.vmem [shape: f32[16,8], index: 1, kind: input, shape index: {}]   ;;  %s3408_s7 = inlined_call_operand.vmem [shape: f32[96,8], index: 7, kind: input, shape index: {}]   ;;  %s3409_s6 = inlined_call_operand.vmem [shape: f32[1,192], index: 6, kind: input, shape index: {}]   ;;  %s3410_s10 = inlined_call_operand.vmem [shape: f32[1,8], index: 10, kind: input, shape index: {}]   ;;  %s3411_s12 = inlined_call_operand.vmem [shape: f32[8,16], index: 12, kind: input, shape index: {}]   ;;  %s3412_s11 = inlined_call_operand.vmem [shape: f32[8,24], index: 11, kind: input, shape index: {}]   ;;  %s3413_s2 = inlined_call_operand.vmem [shape: f32[16,8], index: 2, kind: input, shape index: {}]   ;;  %s3414_s8 = inlined_call_operand.vmem [shape: f32[1,8], index: 8, kind: input, shape index: {}]   ;;  %s3415_s22 = inlined_call_operand.vmem [shape: f32[16,8], index: 22, kind: output, shape index: {1}]   ;;  %s3416_s13 = inlined_call_operand.vmem [shape: f32[8,8], index: 13, kind: input, shape index: {}]   ;;  %s3417_s14 = inlined_call_operand.vmem [shape: f32[1,24], index: 14, kind: input, shape index: {}]   ;;  %s3418_s15 = inlined_call_operand.vmem [shape: f32[8,8], index: 15, kind: input, shape index: {}]   ;;  %s3419_s16 = inlined_call_operand.vmem [shape: f32[1,8], index: 16, kind: input, shape index: {}]   ;;  %s3420_s3 = inlined_call_operand.vmem [shape: f32[16,16], index: 3, kind: input, shape index: {}]   ;;  %s3421_s4 = inlined_call_operand.vmem [shape: f32[16,16], index: 4, kind: input, shape index: {}]   ;;  %s3422_s17 = inlined_call_operand.vmem [shape: f32[288,96], index: 17, kind: input, shape index: {}]   ;;  %s3423_s18 = inlined_call_operand.vmem [shape: f32[1,96], index: 18, kind: input, shape index: {}]   ;;  %s3424_s19 = inlined_call_operand.vmem [shape: f32[16,96], index: 19, kind: input, shape index: {}]   ;;  %s3425_s20 = inlined_call_operand.vmem [shape: f32[16,96], index: 20, kind: input, shape index: {}]   ;;  %s3426_s21 = inlined_call_operand.vmem [shape: f32[16,96], index: 21, kind: output, shape index: {0}]  }
   0x1   :  { %3431 = sst [smem:[#allocation2_spill]] %s3404_s5  ;;  %183 = vmatprep.mubr.f32.mxu0 %v2704_v3  ;;  %vm234_vm2 = vcmask 261120   ;;  %vm255_vm3 = vcmask 785408   ;;  %s2711_s25 = smov 8   ;;  %vm3104_vm4 = vmpackc.low %vm348_vm1, %vm348_vm1  ;;  %vm973_vm5 = vcmask 130048   ;;  %vm1869_vm6 = vcmask 392192  }
   0x2   :  { %3432 = sst [smem:[#allocation3_spill]] %s3405_s0  ;;  %s3438_s29 = sld [smem:[#allocation2_spill]]  ;;  %v103_v61 = vshrl.u32 %v102_v60, 7  ;;  %vm1892_vm7 = vcmask 523264  }
   0x3   :  { %3433 = sst [smem:[#allocation4_spill]] %s3406_s9  ;;  %s3439_s30 = sld [smem:[#allocation3_spill]] }
   0x4   :  { %3434 = sst [smem:[#allocation5_spill]] %s3407_s1  ;;  %v104_v62 = vsub.s32 0, %v103_v61  ;;  %s2708_s0 = smov 104  }
   0x5   :  { %3435 = sst [smem:[#allocation6_spill]] %s3408_s7 }
   0x6   :  { %3436 = sst [smem:[#allocation7_spill]] %s3409_s6  ;;  %s3442_s1 = sld [smem:[#allocation6_spill]] }
   0x7   :  { %3437 = sst [smem:[#allocation8_spill]] %s3410_s10  ;;  %s3441_s10 = sld [smem:[#allocation5_spill]] }
   0x8   :  { %v73_v0 = vld [vmem:[%s3438_s29 + $0x8] sm:$0xff]  ;;  %v75_v1 = vld [vmem:[%s3438_s29 + $0x18] sm:$0xff]  ;;  %v72_v2 = vld [vmem:[%s3438_s29] sm:$0xff]  ;;  %s3443_s23 = sld [smem:[#allocation7_spill]] }
   0x9   :  { %v2464_v4 = vpack.c.bf16 %v75_v1, %v73_v0  ;;  %v74_v5 = vld [vmem:[%s3438_s29 + $0x10] sm:$0xff]  ;;  %v77_v6 = vld [vmem:[%s3438_s29 + $0x28] sm:$0xff]  ;;  %v79_v7 = vld [vmem:[%s3438_s29 + $0x38] sm:$0xff]  ;;  %v108_v0 = vsub.s32 1, %v103_v61 }
   0xa   :  { %v2466_v8 = vpack.c.bf16 %v74_v5, %v72_v2  ;;  %v2468_v9 = vpack.c.bf16 %v79_v7, %v77_v6  ;;  %v76_v10 = vld [vmem:[%s3438_s29 + $0x20] sm:$0xff]  ;;  %v78_v11 = vld [vmem:[%s3438_s29 + $0x30] sm:$0xff]  ;;  %v81_v12 = vld [vmem:[%s3438_s29 + $0x48] sm:$0xff] }
   0xb   :  { %2465 = vmatprep.subr.bf16.mxu0 %v2464_v4  ;;  %v83_v13 = vld [vmem:[%s3438_s29 + $0x58] sm:$0xff]  ;;  %v2470_v14 = vpack.c.bf16 %v78_v11, %v76_v10  ;;  %v80_v16 = vld [vmem:[%s3438_s29 + $0x40] sm:$0xff]  ;;  %v82_v17 = vld [vmem:[%s3438_s29 + $0x50] sm:$0xff] }
   0xc   :  { %2467 = vmatpush1.bf16.msra.mxu0 %v2466_v8  ;;  %v2472_v15 = vpack.c.bf16 %v83_v13, %v81_v12  ;;  %v85_v18 = vld [vmem:[%s3438_s29 + $0x68] sm:$0xff]  ;;  %v87_v19 = vld [vmem:[%s3438_s29 + $0x78] sm:$0xff]  ;;  %v2474_v20 = vpack.c.bf16 %v82_v17, %v80_v16  ;;  %v84_v22 = vld [vmem:[%s3438_s29 + $0x60] sm:$0xff] }
   0xd   :  { %2469 = vmatprep.subr.bf16.mxu0 %v2468_v9  ;;  %v2476_v21 = vpack.c.bf16 %v87_v19, %v85_v18  ;;  %v86_v23 = vld [vmem:[%s3438_s29 + $0x70] sm:$0xff]  ;;  %v89_v24 = vld [vmem:[%s3438_s29 + $0x88] sm:$0xff]  ;;  %v91_v25 = vld [vmem:[%s3438_s29 + $0x98] sm:$0xff] }
   0xe   :  { %v2478_v26 = vpack.c.bf16 %v86_v23, %v84_v22  ;;  %v2480_v27 = vpack.c.bf16 %v91_v25, %v89_v24  ;;  %v88_v28 = vld [vmem:[%s3438_s29 + $0x80] sm:$0xff]  ;;  %v90_v29 = vld [vmem:[%s3438_s29 + $0x90] sm:$0xff]  ;;  %v93_v30 = vld [vmem:[%s3438_s29 + $0xa8] sm:$0xff] }
   0xf   :  { %v95_v31 = vld [vmem:[%s3438_s29 + $0xb8] sm:$0xff]  ;;  %v2482_v32 = vpack.c.bf16 %v90_v29, %v88_v28  ;;  %v92_v34 = vld [vmem:[%s3438_s29 + $0xa0] sm:$0xff]  ;;  %v94_v35 = vld [vmem:[%s3438_s29 + $0xb0] sm:$0xff] }
  0x10   :  { %2471 = vmatpush1.bf16.msra.mxu0 %v2470_v14  ;;  %v2484_v33 = vpack.c.bf16 %v95_v31, %v93_v30  ;;  %v97_v36 = vld [vmem:[%s3438_s29 + $0xc8] sm:$0xff]  ;;  %v99_v37 = vld [vmem:[%s3438_s29 + $0xd8] sm:$0xff]  ;;  %v2486_v38 = vpack.c.bf16 %v94_v35, %v92_v34  ;;  %v96_v40 = vld [vmem:[%s3438_s29 + $0xc0] sm:$0xff] }
  0x11   :  { %2473 = vmatprep.subr.bf16.mxu0 %v2472_v15  ;;  %v2488_v39 = vpack.c.bf16 %v99_v37, %v97_v36  ;;  %v98_v41 = vld [vmem:[%s3438_s29 + $0xd0] sm:$0xff]  ;;  %v70_v43 = vld [vmem:[%s3439_s30] sm:$0xff]  ;;  %v71_v44 = vld [vmem:[%s3439_s30 + $0x8] sm:$0xff]  ;;  %s3440_s29 = sld [smem:[#allocation4_spill]] }
  0x12   :  { %v2490_v42 = vpack.c.bf16 %v98_v41, %v96_v40  ;;  %v351_v46 = vld [vmem:[%s3441_s10] sm:$0xff]  ;;  %v352_v47 = vld [vmem:[%s3441_s10 + $0x8] sm:$0xff]  ;;  %v245_v50 = vld [vmem:[%s3442_s1 + $0x10] sm:$0xff] }
  0x13   :  { %v243_v48 = vld [vmem:[%s3442_s1] sm:$0xff]  ;;  %v244_v49 = vld [vmem:[%s3442_s1 + $0x8] sm:$0xff]  ;;  %v246_v52 = vld [vmem:[%s3442_s1 + $0x18] sm:$0xff] }
  0x14   :  { %2475 = vmatpush1.bf16.msra.mxu0 %v2474_v20  ;;  %v2492_v51 = vpack.c.bf16 %v244_v49, %v243_v48  ;;  %v2496_v53 = vpack.c.bf16 %v246_v52, %v245_v50  ;;  %v247_v54 = vld [vmem:[%s3442_s1 + $0x20] sm:$0xff]  ;;  %v248_v55 = vld [vmem:[%s3442_s1 + $0x28] sm:$0xff]  ;;  %v249_v57 = vld [vmem:[%s3442_s1 + $0x30] sm:$0xff] }
  0x15   :  { %2477 = vmatprep.subr.bf16.mxu0 %v2476_v21  ;;  %v2500_v56 = vpack.c.bf16 %v248_v55, %v247_v54  ;;  %v250_v58 = vld [vmem:[%s3442_s1 + $0x38] sm:$0xff]  ;;  %v100_v63 = vld [vmem:[%s3443_s23] sm:$0x3]  ;;  %v252_v17 = vld [vmem:[%s3442_s1 + $0x48] sm:$0xff]  ;;  %s3444_s23 = sld [smem:[#allocation8_spill]] }
  0x16   :  { %2493 = vmatprep.subr.bf16.mxu1 %v2492_v51  ;;  %v2504_v59 = vpack.c.bf16 %v250_v58, %v249_v57  ;;  %v105_v1 = vrot.slane %v100_v63, %v104_v62  ;;  %v109_v2 = vrot.slane %v100_v63, %v108_v0  ;;  %v251_v16 = vld [vmem:[%s3442_s1 + $0x40] sm:$0xff]  ;;  %v253_v25 = vld [vmem:[%s3442_s1 + $0x50] sm:$0xff] }
  0x17   :  { %v353_v45 = vld [vmem:[%s3440_s29] sm:$0xff]  ;;  %2495 = vmatpush3.bf16.msra.mxu1 %v2492_v51  ;;  %v2508_v20 = vpack.c.bf16 %v252_v17, %v251_v16  ;;  %s2713_s29 = smov 80  }
  0x18   :  { %2479 = vmatpush1.bf16.msra.mxu0 %v2478_v26  ;;  %2497 = vmatprep.subr.bf16.mxu1 %v2496_v53  ;;  %v254_v26 = vld [vmem:[%s3442_s1 + $0x58] sm:$0xff]  ;;  %s2706_s1 = smov 120   ;;  %v3000_v48 = vld [vmem:[%s3411_s12] sm:$0xff]  ;;  %s2709_s12 = smov 96  }
  0x19   :  { %2481 = vmatprep.subr.bf16.mxu0 %v2480_v27  ;;  %v2512_v27 = vpack.c.bf16 %v254_v26, %v253_v25  ;;  %v3005_v49 = vld [vmem:[%s3412_s11] sm:$0xff]  ;;  %s2710_s11 = smov 88  }
  0x1b   :  { %2499 = vmatpush3.bf16.msra.mxu1 %v2496_v53 }
  0x1c   :  { %2483 = vmatpush1.bf16.msra.mxu0 %v2482_v32  ;;  %2501 = vmatprep.subr.bf16.mxu1 %v2500_v56 }
  0x1d   :  { %2485 = vmatprep.subr.bf16.mxu0 %v2484_v33 }
  0x1f   :  { %2503 = vmatpush3.bf16.msra.mxu1 %v2500_v56 }
  0x20   :  { %2487 = vmatpush1.bf16.msra.mxu0 %v2486_v38  ;;  %2505 = vmatprep.subr.bf16.mxu1 %v2504_v59 }
  0x21   :  { %2489 = vmatprep.subr.bf16.mxu0 %v2488_v39 }
  0x23   :  { %2507 = vmatpush3.bf16.msra.mxu1 %v2504_v59 }
  0x24   :  { %2491 = vmatpush1.bf16.msra.mxu0 %v2490_v42  ;;  %2509 = vmatprep.subr.bf16.mxu1 %v2508_v20 }
  0x25   :  { %2366 = vmatprep.subr.mxu0 %v353_v45 }
  0x27   :  { %2177 = vmatmul.mubr.msk.f32.vlgmr.msra.gmra.mrb[0].mxu0 %vm112_vm0, %v70_v43  ;;  %2511 = vmatpush3.bf16.msra.mxu1 %v2508_v20  ;;  %v3064_v20 = vld [vmem:[%s3417_s14] ss:$0 sm:$0xff] }
  0x28   :  { %189 = vmatprep.mubr.f32.mxu0 %v2704_v3  ;;  %2367 = vmatpush3.msra.mxu0 %v353_v45 }
  0x29   :  { %2513 = vmatprep.subr.bf16.mxu1 %v2512_v27  ;;  %2376 = vmatprep.subr.mxu0 %v3000_v48 }
  0x2b   :  { %2178 = vmatmul.mubr.msk.f32.gmra.mrb[2].mxu0 %vm112_vm0, %v71_v44  ;;  %2515 = vmatpush3.bf16.msra.mxu1 %v2512_v27  ;;  %v2186_v44 = vld [vmem:[%s3444_s23] ss:$0 sm:$0xff] }
  0x2c   :  { %2368 = vmatprep.mubr.msk.f32.mxu0 %vm348_vm1, %v351_v46  ;;  %2371 = vmatprep.subr.mxu1 %v3005_v49 }
  0x2f   :  { %2369 = vmatmul.mubr.msk.f32.vlgmr.msra.gmra.mrb[4].mxu0 %vm348_vm1, %v352_v47 }
  0x30   :  { %2377 = vmatpush3.msra.mxu0 %v3000_v48 }
  0xfa   :  { %v185_v3 = vpop.f32.mrb[0].mxu0 }
  0xfb   :  { %v186_v4 = vadd.f32 %v185_v3, %v105_v1  ;;  %v187_v5 = vpop.f32.mrb[1].mxu0 }
  0xfc   :  { %v188_v6 = vadd.f32 %v187_v5, %v109_v2 }
  0xfd   :  { %v2179_v7 = vmul.f32 -1.442695, %v186_v4 }
  0xfe   :  { %v2180_v8 = vmul.f32 -1.442695, %v188_v6  ;;  %v191_v9 = vpop.f32.mrb[2].mxu0 }
  0xff   :  { %2614 = vpow2.f32 %v2179_v7  ;;  %v192_v10 = vadd.f32 %v191_v9, %v105_v1  ;;  %v193_v11 = vpop.f32.mrb[3].mxu0  ;;  %v241_v9 = vld [vmem:[%s3413_s2] sm:$0xff] }
 0x100   :  { %2616 = vpow2.f32 %v2180_v8  ;;  %v194_v12 = vadd.f32 %v193_v11, %v109_v2  ;;  %v242_v8 = vld [vmem:[%s3413_s2 + $0x8] sm:$0xff]  ;;  %v2185_v11 = vld [vmem:[%s3414_s8] ss:$0 sm:$0xff]  ;;  %s2715_s2 = smov 64  }
 0x101   :  { %v2181_v13 = vmul.f32 -1.442695, %v192_v10 }
 0x102   :  { %v2182_v14 = vmul.f32 -1.442695, %v194_v12  ;;  %v2370_v43 = vpop.f32.mrb[4].mxu0 }
 0x103   :  { %2618 = vpow2.f32 %v2181_v13  ;;  %v433_v45 = vpop.f32.mrb[5].mxu0  ;;  %v2990_v46 = vadd.f32 %v2370_v43, %v2186_v44 }
 0x104   :  { %2620 = vpow2.f32 %v2182_v14  ;;  %v2992_v47 = vadd.f32 %v2186_v44, %v433_v45 }
 0x106   :  { %2378 = vmatprep.mubr.msk.f32.mxu0 %vm348_vm1, %v2992_v47 }
 0x107   :  { %2379 = vmatmul.mubr.msk.f32.vlgmr.msra.gmra.mrb[6].mxu0 %vm348_vm1, %v2990_v46 }
 0x109   :  { %v2615_v15 = vpop.eup %2614 }
 0x10a   :  { %v2617_v18 = vpop.eup %2616  ;;  %v210_v19 = vadd.f32 1.0, %v2615_v15 }
 0x10b   :  { %v211_v21 = vadd.f32 1.0, %v2617_v18 }
 0x10c   :  { %2622 = vrcp.f32 %v210_v19  ;;  %v3056_v19 = vld [vmem:[%s3416_s13] sm:$0xff]  ;;  %s2712_s13 = smov 16  }
 0x10d   :  { %v2619_v22 = vpop.eup %2618  ;;  %2624 = vrcp.f32 %v211_v21 }
 0x10e   :  { %v2621_v23 = vpop.eup %2620  ;;  %v212_v24 = vadd.f32 1.0, %v2619_v22 }
 0x10f   :  { %v213_v28 = vadd.f32 1.0, %v2621_v23 }
 0x110   :  { %2626 = vrcp.f32 %v212_v24 }
 0x111   :  { %2628 = vrcp.f32 %v213_v28 }
 0x112   :  { %2630 = vtanh.f32 %v186_v4 }
 0x113   :  { %2632 = vtanh.f32 %v192_v10 }
 0x116   :  { %v2623_v29 = vpop.eup %2622 }
 0x117   :  { %226 = vrot.lane.b32.xlu0 %v2623_v29, %s2705_s27  ;;  %v2625_v30 = vpop.eup %2624 }
 0x11a   :  { %v2627_v31 = vpop.eup %2626 }
 0x11b   :  { %230 = vrot.lane.b32.xlu1 %v2627_v31, %s2705_s27  ;;  %228 = vrot.lane.b32.xlu0 %v2625_v30, %s2705_s27  ;;  %v2629_v32 = vpop.eup %2628 }
 0x11c   :  { %v2631_v36 = vpop.eup %2630 }
 0x11d   :  { %v2633_v40 = vpop.eup %2632 }
 0x11f   :  { %232 = vrot.lane.b32.xlu1 %v2629_v32, %s2705_s27 }
 0x189   :  { %v227_v33 = vpop.permute.xlu0 %226 }
 0x18d   :  { %v231_v34 = vpop.permute.xlu1 %230  ;;  %v229_v35 = vpop.permute.xlu0 %228 }
 0x18e   :  { %v235_v37 = vsel %vm234_vm2, %v227_v33, %v229_v35 }
 0x18f   :  { %v2972_v38 = vmul.f32 %v2631_v36, %v235_v37 }
 0x191   :  { %v233_v39 = vpop.permute.xlu1 %232  ;;  %452 = vrot.lane.b32.xlu0 %v2972_v38, %s2706_s1  ;;  %2363 = vmatprep.mubr.msk.f32.mxu1 %vm255_vm3, %v2972_v38 }
 0x192   :  { %v236_v41 = vsel %vm234_vm2, %v231_v34, %v233_v39 }
 0x193   :  { %v2979_v42 = vmul.f32 %v2633_v40, %v236_v41 }
 0x195   :  { %454 = vrot.lane.b32.xlu1 %v2979_v42, %s2706_s1  ;;  %460 = vrot.lane.b32.xlu0 %v2972_v38, %s2707_s28 }
 0x196   :  { %2364 = vmatmul.mubr.msk.f32.vlgmr.msra.gmra.mrb[0].mxu1 %vm255_vm3, %v2979_v42 }
 0x197   :  { %2372 = vmatpush3.msra.mxu1 %v3005_v49 }
 0x198   :  { %2381 = vmatprep.subr.mxu1 %v3056_v19 }
 0x199   :  { %462 = vrot.lane.b32.xlu1 %v2979_v42, %s2707_s28  ;;  %468 = vrot.lane.b32.xlu0 %v2972_v38, %s2708_s0 }
 0x19d   :  { %470 = vrot.lane.b32.xlu1 %v2979_v42, %s2708_s0  ;;  %476 = vrot.lane.b32.xlu0 %v2972_v38, %s2709_s12 }
 0x1a1   :  { %478 = vrot.lane.b32.xlu1 %v2979_v42, %s2709_s12  ;;  %484 = vrot.lane.b32.xlu0 %v2972_v38, %s2710_s11 }
 0x1a5   :  { %486 = vrot.lane.b32.xlu1 %v2979_v42, %s2710_s11  ;;  %676 = vrot.lane.b32.xlu0 %v2992_v47, %s2711_s25 }
 0x1a9   :  { %678 = vrot.lane.b32.xlu1 %v2990_v46, %s2711_s25 }
 0x1da   :  { %v2380_v17 = vpop.f32.mrb[6].mxu0 }
 0x1db   :  { %v653_v18 = vpop.f32.mrb[7].mxu0 }
 0x203   :  { %v453_v50 = vpop.permute.xlu0 %452 }
 0x204   :  { %v458_v55 = vadd.f32 %v453_v50, %v2972_v38 }
 0x207   :  { %v455_v51 = vpop.permute.xlu1 %454  ;;  %v461_v52 = vpop.permute.xlu0 %460 }
 0x208   :  { %v466_v56 = vadd.f32 %v461_v52, %v458_v55  ;;  %v459_v59 = vadd.f32 %v455_v51, %v2979_v42 }
 0x20b   :  { %v463_v53 = vpop.permute.xlu1 %462  ;;  %v469_v54 = vpop.permute.xlu0 %468 }
 0x20c   :  { %v474_v60 = vadd.f32 %v469_v54, %v466_v56  ;;  %v467_v61 = vadd.f32 %v463_v53, %v459_v59  ;;  %v3079_v53 = vld [vmem:[%s3418_s15] sm:$0xff] }
 0x20d   :  { %2386 = vmatprep.subr.mxu0 %v3079_v53 }
 0x20e   :  { %2387 = vmatpush3.msra.mxu0 %v3079_v53 }
 0x20f   :  { %v471_v57 = vpop.permute.xlu1 %470  ;;  %v477_v58 = vpop.permute.xlu0 %476 }
 0x210   :  { %v482_v62 = vadd.f32 %v477_v58, %v474_v60  ;;  %v475_v1 = vadd.f32 %v471_v57, %v467_v61 }
 0x213   :  { %v479_v63 = vpop.permute.xlu1 %478  ;;  %v485_v0 = vpop.permute.xlu0 %484 }
 0x214   :  { %v490_v2 = vadd.f32 %v485_v0, %v482_v62  ;;  %v483_v3 = vadd.f32 %v479_v63, %v475_v1  ;;  %v3098_v1 = vld [vmem:[%s3419_s16] ss:$0 sm:$0xff] }
 0x216   :  { %v3028_v4 = vmul.f32 0.16666667, %v490_v2 }
 0x217   :  { %v487_v5 = vpop.permute.xlu1 %486  ;;  %v677_v36 = vpop.permute.xlu0 %676 }
 0x218   :  { %v491_v6 = vadd.f32 %v487_v5, %v483_v3  ;;  %2373 = vmatprep.mubr.msk.f32.mxu1 %vm348_vm1, %v3028_v4 }
 0x21a   :  { %v3032_v7 = vmul.f32 0.16666667, %v491_v6 }
 0x21b   :  { %v679_v34 = vpop.permute.xlu1 %678 }
 0x21c   :  { %2374 = vmatmul.mubr.msk.f32.vlgmr.msra.gmra.mrb[2].mxu1 %vm348_vm1, %v3032_v7 }
 0x21d   :  { %2382 = vmatpush3.msra.mxu1 %v3056_v19 }
 0x21e   :  { %2412 = vmatprep.subr.mxu1 %v3005_v49 }
 0x269   :  { %v2365_v10 = vpop.f32.mrb[0].mxu1 }
 0x26a   :  { %v338_v12 = vadd.f32 %v2365_v10, %v242_v8  ;;  %v328_v13 = vpop.f32.mrb[1].mxu1  ;;  %v2522_v10 = vpack.c.bf16 %v2979_v42, %v2972_v38 }
 0x26b   :  { %v337_v14 = vadd.f32 %v328_v13, %v241_v9 }
 0x26c   :  { %v347_v15 = vadd.f32 %v2185_v11, %v338_v12 }
 0x26d   :  { %v346_v16 = vadd.f32 %v2185_v11, %v337_v14  ;;  %v3119_v14 = vld [vmem:[%s3420_s3 + $0x8] sm:$0xff] }
 0x26e   :  { %350 = vst.msk [vmem:[%s3415_s22 + $0x8] sm:$0xff] %vm348_vm1, %v347_v15 }
 0x26f   :  { %349 = vst.msk [vmem:[%s3415_s22] sm:$0xff] %vm348_vm1, %v346_v16 }
 0x2ef   :  { %v2375_v21 = vpop.f32.mrb[2].mxu1 }
 0x2f0   :  { %v578_v22 = vadd.f32 %v2375_v21, %v3064_v20  ;;  %v572_v23 = vpop.f32.mrb[3].mxu1 }
 0x2f1   :  { %v573_v24 = vadd.f32 %v3064_v20, %v572_v23 }
 0x2f2   :  { %v663_v25 = vadd.f32 %v2380_v17, %v578_v22  ;;  %v3124_v17 = vld [vmem:[%s3420_s3] sm:$0xff] }
 0x2f3   :  { %v662_v26 = vadd.f32 %v653_v18, %v573_v24 }
 0x2f4   :  { %v2195_v27 = vmul.f32 -1.442695, %v663_v25 }
 0x2f5   :  { %v2194_v28 = vmul.f32 -1.442695, %v662_v26 }
 0x2f6   :  { %2634 = vpow2.f32 %v2195_v27 }
 0x2f7   :  { %2636 = vpow2.f32 %v2194_v28 }
 0x300   :  { %v2635_v29 = vpop.eup %2634 }
 0x301   :  { %v2637_v30 = vpop.eup %2636  ;;  %v671_v31 = vadd.f32 1.0, %v2635_v29 }
 0x302   :  { %v670_v32 = vadd.f32 1.0, %v2637_v30 }
 0x303   :  { %2638 = vrcp.f32 %v671_v31 }
 0x304   :  { %2640 = vrcp.f32 %v670_v32 }
 0x30d   :  { %v2639_v33 = vpop.eup %2638 }
 0x30e   :  { %v2641_v35 = vpop.eup %2640  ;;  %v683_v37 = vmul.f32 %v2639_v33, %v679_v34  ;;  %v784_v55 = vsub.f32 1.0, %v2639_v33  ;;  %v782_v62 = vmul.f32 %v2639_v33, %v2990_v46 }
 0x30f   :  { %v682_v39 = vmul.f32 %v2641_v35, %v677_v36  ;;  %v783_v57 = vsub.f32 1.0, %v2641_v35  ;;  %v781_v60 = vmul.f32 %v2641_v35, %v2992_v47 }
 0x310   :  { %688 = vrot.lane.b32.xlu1 %v683_v37, %s2706_s1 }
 0x311   :  { %686 = vrot.lane.b32.xlu0 %v682_v39, %s2706_s1 }
 0x382   :  { %v689_v41 = vpop.permute.xlu1 %688 }
 0x383   :  { %v687_v40 = vpop.permute.xlu0 %686 }
 0x384   :  { %2383 = vmatprep.mubr.msk.f32.mxu1 %vm348_vm1, %v687_v40 }
 0x385   :  { %2384 = vmatmul.mubr.msk.f32.vlgmr.msra.gmra.mrb[4].mxu1 %vm348_vm1, %v689_v41  ;;  %v3137_v41 = vld [vmem:[%s3421_s4] sm:$0xff] }
 0x386   :  { %2413 = vmatpush3.msra.mxu1 %v3005_v49 }
 0x387   :  { %2422 = vmatprep.subr.mxu1 %v3056_v19 }
 0x458   :  { %v2385_v43 = vpop.f32.mrb[4].mxu1 }
 0x459   :  { %773 = vrot.lane.b32.xlu1 %v2385_v43, %s2712_s13  ;;  %v760_v44 = vpop.f32.mrb[5].mxu1 }
 0x45a   :  { %771 = vrot.lane.b32.xlu0 %v760_v44, %s2712_s13 }
 0x4cb   :  { %v774_v45 = vpop.permute.xlu1 %773 }
 0x4cc   :  { %v778_v50 = vadd.f32 %v774_v45, %v578_v22  ;;  %v772_v51 = vpop.permute.xlu0 %771 }
 0x4cd   :  { %v777_v52 = vadd.f32 %v772_v51, %v573_v24 }
 0x4ce   :  { %2642 = vtanh.f32 %v778_v50  ;;  %v3143_v50 = vld [vmem:[%s3421_s4 + $0x8] sm:$0xff]  ;;  %s2714_s4 = smov 48  }
 0x4cf   :  { %2644 = vtanh.f32 %v777_v52 }
 0x4d8   :  { %v2643_v49 = vpop.eup %2642 }
 0x4d9   :  { %v2645_v54 = vpop.eup %2644  ;;  %789 = vrot.lane.b32.xlu1 %v2643_v49, %s2707_s28 }
 0x4da   :  { %787 = vrot.lane.b32.xlu0 %v2645_v54, %s2707_s28 }
 0x54b   :  { %v790_v56 = vpop.permute.xlu1 %789 }
 0x54c   :  { %v794_v58 = vmul.f32 %v790_v56, %v784_v55  ;;  %v788_v59 = vpop.permute.xlu0 %787 }
 0x54d   :  { %v793_v61 = vmul.f32 %v788_v59, %v783_v57 }
 0x54e   :  { %v3089_v0 = vadd.f32 %v794_v58, %v782_v62 }
 0x54f   :  { %v3087_v63 = vadd.f32 %v793_v61, %v781_v60 }
 0x551   :  { %2388 = vmatprep.mubr.msk.f32.mxu0 %vm348_vm1, %v3087_v63 }
 0x552   :  { %2389 = vmatmul.mubr.msk.f32.vlgmr.msra.gmra.mrb[8].mxu0 %vm348_vm1, %v3089_v0 }
 0x625   :  { %v2390_v2 = vpop.f32.mrb[8].mxu0 }
 0x626   :  { %v881_v47 = vadd.f32 %v2390_v2, %v3098_v1  ;;  %v875_v3 = vpop.f32.mrb[9].mxu0 }
 0x627   :  { %v876_v46 = vadd.f32 %v3098_v1, %v875_v3 }
 0x628   :  { %2646 = vtanh.f32 %v881_v47  ;;  %v3163_v47 = vmul.f32 0.05, %v2979_v42 }
 0x629   :  { %2648 = vtanh.f32 %v876_v46 }
 0x632   :  { %v2647_v5 = vpop.eup %2646 }
 0x633   :  { %v2649_v6 = vpop.eup %2648 }
 0x634   :  { %2395 = vmatprep.mubr.msk.f32.mxu0 %vm348_vm1, %v2649_v6  ;;  %v2516_v9 = vpack.c.bf16 %v2647_v5, %v2649_v6 }
 0x636   :  { %2518 = vmatprep.subr.msk.bf16.mxu0 %vm3104_vm4, %v2516_v9 }
 0x637   :  { %2521 = vmatpush3.bf16.xpose.msk.msra.mxu0 %vm3104_vm4, %v2516_v9 }
 0x638   :  { %2523 = vmatprep.subr.bf16.mxu0 %v2522_v10 }
 0x63e   :  { %2396 = vmatmul.mubr.msk.f32.vlgmr.msra.gmra.mrb[10].mxu0 %vm348_vm1, %v2647_v5 }
 0x63f   :  { %2525 = vmatpush3.bf16.msra.mxu0 %v2522_v10 }
 0x711   :  { %v2397_v11 = vpop.f32.mrb[10].mxu0 }
 0x712   :  { %2650 = vtanh.f32 %v2397_v11  ;;  %v958_v12 = vpop.f32.mrb[11].mxu0 }
 0x713   :  { %2652 = vtanh.f32 %v958_v12 }
 0x71c   :  { %v2651_v13 = vpop.eup %2650 }
 0x71d   :  { %v2653_v15 = vpop.eup %2652  ;;  %v970_v16 = vmax.f32 %v2651_v13, 0.0 }
 0x71e   :  { %v969_v18 = vmax.f32 %v2653_v15, 0.0 }
 0x71f   :  { %v972_v21 = vmul.f32 %v970_v16, %v3119_v14 }
 0x720   :  { %v971_v22 = vmul.f32 %v969_v18, %v3124_v17 }
 0x721   :  { %v977_v23 = vsel %vm973_vm5, %v972_v21, -inf }
 0x722   :  { %978 = vmax.xlane.f32.xlu1 %v977_v23  ;;  %v974_v24 = vsel %vm973_vm5, %v971_v22, -inf }
 0x723   :  { %975 = vmax.xlane.f32.xlu0 %v974_v24 }
 0x7af   :  { %v979_v25 = vpop.xlane.xlu1 %978 }
 0x7b0   :  { %v981_v26 = vsub.f32 %v972_v21, %v979_v25  ;;  %v976_v27 = vpop.xlane.xlu0 %975 }
 0x7b1   :  { %v980_v28 = vsub.f32 %v971_v22, %v976_v27 }
 0x7b2   :  { %v984_v29 = vmul.f32 1.442695, %v981_v26 }
 0x7b3   :  { %v982_v30 = vmul.f32 1.442695, %v980_v28 }
 0x7b4   :  { %2654 = vpow2.f32 %v984_v29 }
 0x7b5   :  { %2656 = vpow2.f32 %v982_v30 }
 0x7be   :  { %v2655_v31 = vpop.eup %2654 }
 0x7bf   :  { %v2657_v32 = vpop.eup %2656  ;;  %v987_v35 = vmul.f32 %v2655_v31, %v3119_v14 }
 0x7c0   :  { %v986_v33 = vmul.f32 %v2657_v32, %v3124_v17 }
 0x7c1   :  { %v991_v36 = vsel %vm973_vm5, %v987_v35, 0.0 }
 0x7c2   :  { %v988_v34 = vsel %vm973_vm5, %v986_v33, 0.0 }
 0x7c3   :  { %989 = vadd.xlane.f32.xlu0 %v988_v34 }
 0x7c7   :  { %992 = vadd.xlane.f32.xlu0 %v991_v36 }
 0x850   :  { %v990_v37 = vpop.xlane.xlu0 %989 }
 0x851   :  { %2658 = vrcp.f32 %v990_v37 }
 0x854   :  { %v993_v39 = vpop.xlane.xlu0 %992 }
 0x855   :  { %2660 = vrcp.f32 %v993_v39 }
 0x85b   :  { %v2659_v40 = vpop.eup %2658 }
 0x85c   :  { %v995_v43 = vmul.f32 %v2659_v40, %v986_v33 }
 0x85e   :  { %v998_v44 = vadd.f32 %v995_v43, %v3137_v41 }
 0x85f   :  { %v2661_v45 = vpop.eup %2660 }
 0x860   :  { %v1000_v51 = vsel %vm973_vm5, %v998_v44, 0.0  ;;  %v997_v52 = vmul.f32 %v2661_v45, %v987_v35 }
 0x861   :  { %1001 = vadd.xlane.f32.xlu1 %v1000_v51 }
 0x862   :  { %v999_v49 = vadd.f32 %v997_v52, %v3143_v50 }
 0x864   :  { %v1003_v54 = vsel %vm973_vm5, %v999_v49, 0.0 }
 0x865   :  { %1004 = vadd.xlane.f32.xlu0 %v1003_v54 }
 0x872   :  { %1176 = vrot.lane.b32.xlu1 %v3028_v4, %s2713_s29 }
 0x876   :  { %1348 = vrot.lane.b32.xlu1 %v3087_v63, %s2711_s25 }
 0x87a   :  { %1350 = vrot.lane.b32.xlu1 %v3089_v0, %s2711_s25 }
 0x87b   :  { %1178 = vrot.lane.b32.xlu0 %v3032_v7, %s2713_s29 }
 0x8ee   :  { %v1002_v55 = vpop.xlane.xlu1 %1001 }
 0x8ef   :  { %2662 = vrcp.f32 %v1002_v55 }
 0x8f2   :  { %v1177_v56 = vpop.permute.xlu1 %1176  ;;  %v1005_v57 = vpop.xlane.xlu0 %1004 }
 0x8f3   :  { %2664 = vrcp.f32 %v1005_v57  ;;  %2414 = vmatprep.mubr.msk.f32.mxu1 %vm348_vm1, %v1177_v56 }
 0x8f6   :  { %v1179_v58 = vpop.permute.xlu0 %1178  ;;  %v1349_v27 = vpop.permute.xlu1 %1348 }
 0x8f7   :  { %2415 = vmatmul.mubr.msk.f32.vlgmr.msra.gmra.mrb[6].mxu1 %vm348_vm1, %v1179_v58 }
 0x8f8   :  { %2423 = vmatpush3.msra.mxu1 %v3056_v19  ;;  %v3166_v19 = vmul.f32 0.05, %v2972_v38 }
 0x8f9   :  { %v2663_v4 = vpop.eup %2662 }
 0x8fa   :  { %v1007_v59 = vmul.f32 %v2663_v4, %v998_v44  ;;  %v1351_v29 = vpop.permute.xlu1 %1350 }
 0x8fc   :  { %2402 = vmatprep.mubr.msk.f32.mxu0 %vm973_vm5, %v1007_v59 }
 0x8fd   :  { %v2665_v60 = vpop.eup %2664 }
 0x8fe   :  { %v1009_v61 = vmul.f32 %v2665_v60, %v999_v49 }
 0x900   :  { %2403 = vmatmul.mubr.msk.f32.vlgmr.msra.gmra.mrb[12].mxu0 %vm973_vm5, %v1009_v61 }
 0x901   :  { %2409 = vmatprep.mubr.msk.f32.mxu0 %vm973_vm5, %v1007_v59 }
 0x9ca   :  { %v2416_v7 = vpop.f32.mrb[6].mxu1 }
 0x9cb   :  { %v1250_v62 = vpop.f32.mrb[7].mxu1  ;;  %v1256_v13 = vadd.f32 %v2416_v7, %v3064_v20 }
 0x9cc   :  { %v1251_v15 = vadd.f32 %v3064_v20, %v1250_v62 }
 0x9d3   :  { %v2404_v2 = vpop.f32.mrb[12].mxu0 }
 0x9d4   :  { %v1094_v3 = vmul.f32 0.95, %v2404_v2  ;;  %v1084_v46 = vpop.f32.mrb[13].mxu0 }
 0x9d5   :  { %v1093_v5 = vmul.f32 0.95, %v1084_v46 }
 0x9d6   :  { %v3169_v6 = vadd.f32 %v1094_v3, %v3163_v47 }
 0x9d7   :  { %v3172_v9 = vadd.f32 %v1093_v5, %v3166_v19 }
 0x9d9   :  { %v2526_v10 = vpack.c.bf16 %v3169_v6, %v3172_v9 }
 0x9db   :  { %2527 = vmatprep.subr.bf16.mxu0 %v2526_v10 }
 0x9dc   :  { %2529 = vmatpush3.bf16.msra.mxu0 %v2526_v10 }
 0x9dd   :  { %2417 = vmatprep.subr.mxu0 %v3000_v48 }
 0x9df   :  { %2410 = vmatmul.mubr.msk.f32.vlgmr.msra.gmra.mrb[14].mxu0 %vm973_vm5, %v1009_v61 }
 0x9e0   :  { %2418 = vmatpush3.msra.mxu0 %v3000_v48  ;;  %2419 = vmatprep.mubr.msk.f32.mxu0 %vm348_vm1, %v3087_v63 }
 0x9e1   :  { %2427 = vmatprep.subr.mxu0 %v3079_v53 }
 0x9e3   :  { %2420 = vmatmul.mubr.msk.f32.vlgmr.msra.gmra.mrb[16].mxu0 %vm348_vm1, %v3089_v0 }
 0x9e4   :  { %2428 = vmatpush3.msra.mxu0 %v3079_v53 }
 0xab2   :  { %v3185_v11 = vpop.f32.mrb[14].mxu0 }
 0xab3   :  { %v3187_v12 = vpop.f32.mrb[15].mxu0 }
 0xab6   :  { %v2421_v16 = vpop.f32.mrb[16].mxu0 }
 0xab7   :  { %v1335_v48 = vadd.f32 %v2421_v16, %v1256_v13  ;;  %v1325_v18 = vpop.f32.mrb[17].mxu0 }
 0xab8   :  { %v1334_v21 = vadd.f32 %v1325_v18, %v1251_v15 }
 0xab9   :  { %v2214_v22 = vmul.f32 -1.442695, %v1335_v48 }
 0xaba   :  { %v2213_v23 = vmul.f32 -1.442695, %v1334_v21 }
 0xabb   :  { %2666 = vpow2.f32 %v2214_v22 }
 0xabc   :  { %2668 = vpow2.f32 %v2213_v23 }
 0xac5   :  { %v2667_v24 = vpop.eup %2666 }
 0xac6   :  { %v2669_v25 = vpop.eup %2668  ;;  %v1343_v26 = vadd.f32 1.0, %v2667_v24 }
 0xac7   :  { %v1342_v53 = vadd.f32 1.0, %v2669_v25 }
 0xac8   :  { %2670 = vrcp.f32 %v1343_v26 }
 0xac9   :  { %2672 = vrcp.f32 %v1342_v53 }
 0xad2   :  { %v2671_v28 = vpop.eup %2670 }
 0xad3   :  { %v2673_v30 = vpop.eup %2672  ;;  %v1355_v31 = vmul.f32 %v2671_v28, %v1351_v29  ;;  %v1456_v45 = vsub.f32 1.0, %v2671_v28  ;;  %v1454_v57 = vmul.f32 %v2671_v28, %v3089_v0 }
 0xad4   :  { %v1354_v20 = vmul.f32 %v2673_v30, %v1349_v27  ;;  %v1455_v52 = vsub.f32 1.0, %v2673_v30  ;;  %v1453_v55 = vmul.f32 %v2673_v30, %v3087_v63 }
 0xad5   :  { %1360 = vrot.lane.b32.xlu1 %v1355_v31, %s2706_s1 }
 0xad6   :  { %1358 = vrot.lane.b32.xlu0 %v1354_v20, %s2706_s1 }
 0xb47   :  { %v1361_v33 = vpop.permute.xlu1 %1360 }
 0xb48   :  { %v1359_v32 = vpop.permute.xlu0 %1358 }
 0xb49   :  { %2424 = vmatprep.mubr.msk.f32.mxu1 %vm348_vm1, %v1359_v32 }
 0xb4a   :  { %2425 = vmatmul.mubr.msk.f32.vlgmr.msra.gmra.mrb[8].mxu1 %vm348_vm1, %v1361_v33 }
 0xc1d   :  { %v2426_v34 = vpop.f32.mrb[8].mxu1 }
 0xc1e   :  { %1445 = vrot.lane.b32.xlu1 %v2426_v34, %s2712_s13  ;;  %v1432_v35 = vpop.f32.mrb[9].mxu1 }
 0xc1f   :  { %1443 = vrot.lane.b32.xlu0 %v1432_v35, %s2712_s13 }
 0xc90   :  { %v1446_v36 = vpop.permute.xlu1 %1445 }
 0xc91   :  { %v1450_v37 = vadd.f32 %v1446_v36, %v1256_v13  ;;  %v1444_v39 = vpop.permute.xlu0 %1443 }
 0xc92   :  { %v1449_v40 = vadd.f32 %v1444_v39, %v1251_v15 }
 0xc93   :  { %2674 = vtanh.f32 %v1450_v37  ;;  %v2604_v37 = vpack.i.bf16 %v2979_v42, %v2972_v38 }
 0xc94   :  { %2676 = vtanh.f32 %v1449_v40 }
 0xc9d   :  { %v2675_v43 = vpop.eup %2674 }
 0xc9e   :  { %v2677_v44 = vpop.eup %2676  ;;  %1461 = vrot.lane.b32.xlu1 %v2675_v43, %s2707_s28 }
 0xc9f   :  { %1459 = vrot.lane.b32.xlu0 %v2677_v44, %s2707_s28 }
 0xd10   :  { %v1462_v51 = vpop.permute.xlu1 %1461 }
 0xd11   :  { %v1466_v49 = vmul.f32 %v1462_v51, %v1456_v45  ;;  %v1460_v54 = vpop.permute.xlu0 %1459 }
 0xd12   :  { %v1465_v56 = vmul.f32 %v1460_v54, %v1455_v52 }
 0xd13   :  { %v1468_v4 = vadd.f32 %v1466_v49, %v1454_v57 }
 0xd14   :  { %v1467_v58 = vadd.f32 %v1465_v56, %v1453_v55 }
 0xd16   :  { %2429 = vmatprep.mubr.msk.f32.mxu0 %vm348_vm1, %v1467_v58 }
 0xd17   :  { %2430 = vmatmul.mubr.msk.f32.vlgmr.msra.gmra.mrb[18].mxu0 %vm348_vm1, %v1468_v4 }
 0xdea   :  { %v2431_v59 = vpop.f32.mrb[18].mxu0 }
 0xdeb   :  { %v1547_v60 = vadd.f32 %v2431_v59, %v3098_v1  ;;  %v1541_v61 = vpop.f32.mrb[19].mxu0 }
 0xdec   :  { %v1542_v7 = vadd.f32 %v3098_v1, %v1541_v61 }
 0xded   :  { %2678 = vtanh.f32 %v1547_v60 }
 0xdee   :  { %2680 = vtanh.f32 %v1542_v7 }
 0xdf7   :  { %v2679_v62 = vpop.eup %2678 }
 0xdf8   :  { %v2681_v2 = vpop.eup %2680 }
 0xdf9   :  { %2436 = vmatprep.mubr.msk.f32.mxu1 %vm348_vm1, %v2681_v2  ;;  %v2530_v63 = vpack.c.bf16 %v2679_v62, %v2681_v2 }
 0xdfb   :  { %2532 = vmatprep.subr.msk.bf16.mxu1 %vm3104_vm4, %v2530_v63 }
 0xdfc   :  { %2535 = vmatpush3.bf16.xpose.msk.msra.mxu1 %vm3104_vm4, %v2530_v63 }
 0xe03   :  { %2437 = vmatmul.mubr.msk.f32.vlgmr.msra.gmra.mrb[10].mxu1 %vm348_vm1, %v2679_v62 }
 0xed6   :  { %v2438_v0 = vpop.f32.mrb[10].mxu1 }
 0xed7   :  { %2682 = vtanh.f32 %v2438_v0  ;;  %v1624_v3 = vpop.f32.mrb[11].mxu1  ;;  %v1911_v0 = vld [vmem:[%s3422_s17 + $0x80] sm:$0xff] }
 0xed8   :  { %2684 = vtanh.f32 %v1624_v3  ;;  %v1912_v3 = vld [vmem:[%s3422_s17 + $0x88] sm:$0xff] }
 0xee1   :  { %v2683_v1 = vpop.eup %2682 }
 0xee2   :  { %v2685_v46 = vpop.eup %2684  ;;  %v1636_v5 = vmax.f32 %v2683_v1, 0.0  ;;  %v1895_v1 = vld [vmem:[%s3422_s17] sm:$0xff] }
 0xee3   :  { %v1635_v10 = vmax.f32 %v2685_v46, 0.0 }
 0xee4   :  { %v1638_v13 = vmul.f32 %v1636_v5, %v3119_v14  ;;  %v2544_v5 = vpack.c.bf16 %v1912_v3, %v1911_v0  ;;  %v1909_v0 = vld [vmem:[%s3422_s17 + $0x70] sm:$0xff]  ;;  %v1910_v3 = vld [vmem:[%s3422_s17 + $0x78] sm:$0xff] }
 0xee5   :  { %v1637_v15 = vmul.f32 %v1635_v10, %v3124_v17  ;;  %v1896_v10 = vld [vmem:[%s3422_s17 + $0x8] sm:$0xff] }
 0xee6   :  { %v1642_v16 = vsel %vm973_vm5, %v1638_v13, -inf  ;;  %2545 = vmatprep.subr.bf16.mxu1 %v2544_v5  ;;  %v1172_v5 = vmul.f32 0.95, %v3187_v12 }
 0xee7   :  { %1643 = vmax.xlane.f32.xlu1 %v1642_v16  ;;  %v1639_v8 = vsel %vm973_vm5, %v1637_v15, -inf }
 0xee8   :  { %1640 = vmax.xlane.f32.xlu0 %v1639_v8 }
 0xf74   :  { %v1644_v48 = vpop.xlane.xlu1 %1643 }
 0xf75   :  { %v1646_v18 = vsub.f32 %v1638_v13, %v1644_v48  ;;  %v1641_v21 = vpop.xlane.xlu0 %1640  ;;  %v1913_v13 = vld [vmem:[%s3422_s17 + $0x90] sm:$0xff]  ;;  %v2546_v48 = vpack.c.bf16 %v1896_v10, %v1895_v1  ;;  %v2574_v1 = vpack.c.bf16 %v1910_v3, %v1909_v0 }
 0xf76   :  { %v1645_v22 = vsub.f32 %v1637_v15, %v1641_v21  ;;  %v1914_v15 = vld [vmem:[%s3422_s17 + $0x98] sm:$0xff]  ;;  %v1897_v21 = vld [vmem:[%s3422_s17 + $0x10] sm:$0xff] }
 0xf77   :  { %v1649_v23 = vmul.f32 1.442695, %v1646_v18  ;;  %v2548_v18 = vpack.c.bf16 %v1914_v15, %v1913_v13  ;;  %2547 = vmatpush3.bf16.msra.mxu1 %v2546_v48 }
 0xf78   :  { %v1647_v24 = vmul.f32 1.442695, %v1645_v22  ;;  %v1898_v22 = vld [vmem:[%s3422_s17 + $0x18] sm:$0xff] }
 0xf79   :  { %2686 = vpow2.f32 %v1649_v23  ;;  %v1915_v23 = vld [vmem:[%s3422_s17 + $0xa0] sm:$0xff]  ;;  %2549 = vmatprep.subr.bf16.mxu1 %v2548_v18 }
 0xf7a   :  { %2688 = vpow2.f32 %v1647_v24 }
 0xf83   :  { %v2687_v25 = vpop.eup %2686 }
 0xf84   :  { %v2689_v26 = vpop.eup %2688  ;;  %v1652_v28 = vmul.f32 %v2687_v25, %v3119_v14  ;;  %v1916_v25 = vld [vmem:[%s3422_s17 + $0xa8] sm:$0xff] }
 0xf85   :  { %v1651_v53 = vmul.f32 %v2689_v26, %v3124_v17  ;;  %v2550_v26 = vpack.c.bf16 %v1898_v22, %v1897_v21 }
 0xf86   :  { %v1656_v29 = vsel %vm973_vm5, %v1652_v28, 0.0 }
 0xf87   :  { %v1653_v27 = vsel %vm973_vm5, %v1651_v53, 0.0  ;;  %2551 = vmatpush3.bf16.msra.mxu1 %v2550_v26 }
 0xf88   :  { %1654 = vadd.xlane.f32.xlu0 %v1653_v27  ;;  %v1899_v27 = vld [vmem:[%s3422_s17 + $0x20] sm:$0xff] }
 0xf8c   :  { %1657 = vadd.xlane.f32.xlu0 %v1656_v29  ;;  %v1917_v29 = vld [vmem:[%s3422_s17 + $0xb0] sm:$0xff] }
0x1015   :  { %v1655_v30 = vpop.xlane.xlu0 %1654 }
0x1016   :  { %2690 = vrcp.f32 %v1655_v30  ;;  %v1918_v30 = vld [vmem:[%s3422_s17 + $0xb8] sm:$0xff] }
0x1019   :  { %v1658_v31 = vpop.xlane.xlu0 %1657 }
0x101a   :  { %2692 = vrcp.f32 %v1658_v31 }
0x1020   :  { %v2691_v20 = vpop.eup %2690 }
0x1021   :  { %v1660_v32 = vmul.f32 %v2691_v20, %v1651_v53  ;;  %v2552_v53 = vpack.c.bf16 %v1916_v25, %v1915_v23 }
0x1023   :  { %v1663_v33 = vadd.f32 %v1660_v32, %v3137_v41  ;;  %v1927_v32 = vld [vmem:[%s3422_s17 + $0x100] sm:$0xff]  ;;  %2553 = vmatprep.subr.bf16.mxu1 %v2552_v53 }
0x1024   :  { %v2693_v34 = vpop.eup %2692 }
0x1025   :  { %v1665_v35 = vsel %vm973_vm5, %v1663_v33, 0.0  ;;  %v1662_v17 = vmul.f32 %v2693_v34, %v1652_v28  ;;  %v1900_v28 = vld [vmem:[%s3422_s17 + $0x28] sm:$0xff]  ;;  %v2556_v34 = vpack.c.bf16 %v1918_v30, %v1917_v29  ;;  %v2227_v29 = vld [vmem:[%s3423_s18] ss:$0 sm:$0xff] }
0x1026   :  { %1666 = vadd.xlane.f32.xlu1 %v1665_v35  ;;  %v2554_v20 = vpack.c.bf16 %v1900_v28, %v1899_v27  ;;  %v1901_v35 = vld [vmem:[%s3422_s17 + $0x30] sm:$0xff] }
0x1027   :  { %v1664_v36 = vadd.f32 %v1662_v17, %v3143_v50  ;;  %v1919_v17 = vld [vmem:[%s3422_s17 + $0xc0] sm:$0xff] }
0x1028   :  { %2555 = vmatpush3.bf16.msra.mxu1 %v2554_v20 }
0x1029   :  { %v1668_v14 = vsel %vm973_vm5, %v1664_v36, 0.0  ;;  %2557 = vmatprep.subr.bf16.mxu1 %v2556_v34 }
0x102a   :  { %1669 = vadd.xlane.f32.xlu0 %v1668_v14  ;;  %v1920_v14 = vld [vmem:[%s3422_s17 + $0xc8] sm:$0xff] }
0x1037   :  { %2605 = vrot.lane.b32.xlu1 %v2604_v37, %s2713_s29  ;;  %v1929_v37 = vld [vmem:[%s3422_s17 + $0x110] sm:$0xff] }
0x10b3   :  { %v1667_v39 = vpop.xlane.xlu1 %1666 }
0x10b4   :  { %2694 = vrcp.f32 %v1667_v39  ;;  %v1930_v39 = vld [vmem:[%s3422_s17 + $0x118] sm:$0xff] }
0x10b7   :  { %v2606_v40 = vpop.permute.xlu1 %2605  ;;  %v1670_v43 = vpop.xlane.xlu0 %1669 }
0x10b8   :  { %v2608_v41 = vunpack.i.h.bf16 %v2606_v40  ;;  %v2607_v44 = vunpack.i.l.bf16 %v2606_v40  ;;  %2696 = vrcp.f32 %v1670_v43  ;;  %v2580_v40 = vpack.c.bf16 %v1930_v39, %v1929_v37 }
0x10ba   :  { %v2536_v45 = vpack.c.bf16 %v2608_v41, %v2607_v44  ;;  %v2560_v41 = vpack.c.bf16 %v1920_v14, %v1919_v17  ;;  %v1903_v44 = vld [vmem:[%s3422_s17 + $0x40] sm:$0xff] }
0x10bc   :  { %2537 = vmatprep.subr.bf16.mxu0 %v2536_v45 }
0x10bd   :  { %2539 = vmatpush3.bf16.msra.mxu0 %v2536_v45  ;;  %v1904_v45 = vld [vmem:[%s3422_s17 + $0x48] sm:$0xff] }
0x10be   :  { %v2695_v51 = vpop.eup %2694 }
0x10bf   :  { %v1672_v50 = vmul.f32 %v2695_v51, %v1663_v33  ;;  %v1928_v33 = vld [vmem:[%s3422_s17 + $0x108] sm:$0xff]  ;;  %v1921_v51 = vld [vmem:[%s3422_s17 + $0xd0] sm:$0xff] }
0x10c1   :  { %2443 = vmatprep.mubr.msk.f32.mxu0 %vm973_vm5, %v1672_v50 }
0x10c2   :  { %v2697_v52 = vpop.eup %2696 }
0x10c3   :  { %v1674_v49 = vmul.f32 %v2697_v52, %v1664_v36  ;;  %v2576_v36 = vpack.c.bf16 %v1928_v33, %v1927_v32  ;;  %v2562_v52 = vpack.c.bf16 %v1904_v45, %v1903_v44 }
0x10c5   :  { %2444 = vmatmul.mubr.msk.f32.vlgmr.msra.gmra.mrb[20].mxu0 %vm973_vm5, %v1674_v49 }
0x10c6   :  { %2450 = vmatprep.mubr.msk.f32.mxu0 %vm973_vm5, %v1672_v50  ;;  %v1922_v50 = vld [vmem:[%s3422_s17 + $0xd8] sm:$0xff] }
0x1198   :  { %v2445_v54 = vpop.f32.mrb[20].mxu0 }
0x1199   :  { %v1763_v55 = vmul.f32 0.95, %v2445_v54  ;;  %v1753_v56 = vpop.f32.mrb[21].mxu0  ;;  %v1905_v54 = vld [vmem:[%s3422_s17 + $0x50] sm:$0xff] }
0x119a   :  { %v1762_v57 = vmul.f32 0.95, %v1753_v56  ;;  %v1923_v56 = vld [vmem:[%s3422_s17 + $0xe0] sm:$0xff] }
0x119b   :  { %1768 = vrot.lane.b32.xlu1 %v1763_v55, %s2714_s4  ;;  %v1906_v55 = vld [vmem:[%s3422_s17 + $0x58] sm:$0xff] }
0x119c   :  { %1766 = vrot.lane.b32.xlu0 %v1762_v57, %s2714_s4  ;;  %v1924_v57 = vld [vmem:[%s3422_s17 + $0xe8] sm:$0xff] }
0x120d   :  { %v1769_v58 = vpop.permute.xlu1 %1768 }
0x120e   :  { %v3232_v4 = vadd.f32 %v1769_v58, %v3163_v47  ;;  %v1767_v59 = vpop.permute.xlu0 %1766  ;;  %v2566_v58 = vpack.c.bf16 %v1906_v55, %v1905_v54 }
0x120f   :  { %v1772_v60 = vadd.f32 %v1767_v59, %v3166_v19  ;;  %v2568_v59 = vpack.c.bf16 %v1924_v57, %v1923_v56 }
0x1211   :  { %v2609_v61 = vpack.i.bf16 %v3232_v4, %v1772_v60  ;;  %v1870_v31 = vsel %vm1869_vm6, %v3172_v9, %v1772_v60  ;;  %v1902_v9 = vld [vmem:[%s3422_s17 + $0x38] sm:$0xff]  ;;  %v1907_v60 = vld [vmem:[%s3422_s17 + $0x60] sm:$0xff] }
0x1212   :  { %v2558_v43 = vpack.c.bf16 %v1902_v9, %v1901_v35 }
0x1213   :  { %2610 = vrot.lane.b32.xlu1 %v2609_v61, %s2713_s29  ;;  %v1908_v61 = vld [vmem:[%s3422_s17 + $0x68] sm:$0xff] }
0x1214   :  { %2559 = vmatpush3.bf16.msra.mxu1 %v2558_v43 }
0x1215   :  { %2561 = vmatprep.subr.bf16.mxu1 %v2560_v41 }
0x1218   :  { %2563 = vmatpush3.bf16.msra.mxu1 %v2562_v52 }
0x1285   :  { %v2611_v7 = vpop.permute.xlu1 %2610 }
0x1286   :  { %v2613_v62 = vunpack.i.h.bf16 %v2611_v7  ;;  %v2612_v2 = vunpack.i.l.bf16 %v2611_v7  ;;  %v1925_v7 = vld [vmem:[%s3422_s17 + $0xf0] sm:$0xff] }
0x1288   :  { %v2540_v63 = vpack.c.bf16 %v2613_v62, %v2612_v2  ;;  %v1926_v62 = vld [vmem:[%s3422_s17 + $0xf8] sm:$0xff]  ;;  %v2570_v2 = vpack.c.bf16 %v1908_v61, %v1907_v60 }
0x128a   :  { %2541 = vmatprep.subr.bf16.mxu0 %v2540_v63 }
0x128b   :  { %2543 = vmatpush3.bf16.msra.mxu0 %v2540_v63  ;;  %v2572_v63 = vpack.c.bf16 %v1926_v62, %v1925_v7 }
0x128c   :  { %2577 = vmatprep.subr.bf16.mxu0 %v2576_v36 }
0x128e   :  { %2451 = vmatmul.mubr.msk.f32.vlgmr.msra.gmra.mrb[22].mxu0 %vm973_vm5, %v1674_v49  ;;  %v2564_v49 = vpack.c.bf16 %v1922_v50, %v1921_v51 }
0x128f   :  { %2579 = vmatpush3.bf16.msra.mxu0 %v2576_v36 }
0x1290   :  { %2581 = vmatprep.subr.bf16.mxu0 %v2580_v40  ;;  %2565 = vmatprep.subr.bf16.mxu1 %v2564_v49 }
0x1291   :  { %2567 = vmatpush3.bf16.msra.mxu1 %v2566_v58 }
0x1292   :  { %2569 = vmatprep.subr.bf16.mxu1 %v2568_v59 }
0x1293   :  { %2583 = vmatpush3.bf16.msra.mxu0 %v2580_v40 }
0x1295   :  { %2571 = vmatpush3.bf16.msra.mxu1 %v2570_v2 }
0x1296   :  { %2573 = vmatprep.subr.bf16.mxu1 %v2572_v63 }
0x1299   :  { %2575 = vmatpush3.bf16.msra.mxu1 %v2574_v1 }
0x1361   :  { %v2452_v46 = vpop.f32.mrb[22].mxu0 }
0x1362   :  { %v1858_v16 = vmul.f32 0.95, %v2452_v46  ;;  %v1848_v8 = vpop.f32.mrb[23].mxu0  ;;  %v1173_v46 = vmul.f32 0.95, %v3185_v11  ;;  %v1871_v11 = vsel %vm1869_vm6, %v3169_v6, %v3232_v4 }
0x1363   :  { %v1857_v24 = vmul.f32 0.95, %v1848_v8  ;;  %v1174_v8 = vadd.f32 %v1172_v5, %v3166_v19 }
0x1364   :  { %1863 = vrot.lane.b32.xlu1 %v1858_v16, %s2714_s4  ;;  %v1175_v13 = vadd.f32 %v1173_v46, %v3163_v47 }
0x1365   :  { %1861 = vrot.lane.b32.xlu0 %v1857_v24, %s2714_s4 }
0x1369   :  { %1876 = vrot.lane.b32.xlu0 %v1870_v31, %s2709_s12 }
0x13d6   :  { %v1864_v10 = vpop.permute.xlu1 %1863 }
0x13d7   :  { %v1868_v15 = vadd.f32 %v1864_v10, %v3163_v47  ;;  %v1862_v16 = vpop.permute.xlu0 %1861  ;;  %v2702_v47 = vld [vmem:[%s3439_s30] sm:$0xff] }
0x13d8   :  { %v1867_v48 = vadd.f32 %v1862_v16, %v3166_v19  ;;  %v2703_v19 = vld [vmem:[%s3439_s30 + $0x8] sm:$0xff] }
0x13d9   :  { %v1873_v18 = vsel %vm1869_vm6, %v1175_v13, %v1868_v15 }
0x13da   :  { %1886 = vrot.lane.b32.xlu0 %v1873_v18, %s2715_s2  ;;  %v1872_v21 = vsel %vm1869_vm6, %v1174_v8, %v1867_v48 }
0x13db   :  { %1884 = vrot.lane.b32.xlu1 %v1872_v21, %s2715_s2  ;;  %v1877_v12 = vpop.permute.xlu0 %1876 }
0x13dc   :  { %v1890_v4 = vsel %vm255_vm3, %v2972_v38, %v1877_v12 }
0x13de   :  { %2092 = vrot.lane.b32.xlu0 %v2702_v47, %s2707_s28  ;;  %v2100_v47 = vld [vmem:[%s3424_s19] sm:$0xff] }
0x13df   :  { %1878 = vrot.lane.b32.xlu1 %v1871_v11, %s2709_s12 }
0x13e2   :  { %2094 = vrot.lane.b32.xlu0 %v2703_v19, %s2707_s28 }
0x144c   :  { %v1887_v23 = vpop.permute.xlu0 %1886 }
0x144d   :  { %v1885_v22 = vpop.permute.xlu1 %1884 }
0x144e   :  { %2461 = vmatprep.mubr.msk.f32.mxu0 %vm234_vm2, %v1885_v22  ;;  %v1893_v6 = vsel %vm1892_vm7, %v1877_v12, %v1885_v22  ;;  %v2102_v12 = vld [vmem:[%s3425_s20] sm:$0xff] }
0x144f   :  { %2006 = vmatprep.mubr.f32.mxu1 %v1893_v6  ;;  %2462 = vmatmul.mubr.msk.f32.vlgmr.msra.gmra.mrb[24].mxu0 %vm234_vm2, %v1887_v23 }
0x1450   :  { %2007 = vmatmul.mubr.f32.vlgmr.msra.gmra.mrb[12].mxu1 %v1890_v4  ;;  %v2093_v31 = vpop.permute.xlu0 %2092 }
0x1451   :  { %v1879_v24 = vpop.permute.xlu1 %1878 }
0x1452   :  { %v1894_v25 = vsel %vm1892_vm7, %v1879_v24, %v1887_v23  ;;  %v1891_v26 = vsel %vm255_vm3, %v2979_v42, %v1879_v24 }
0x1453   :  { %2011 = vmatprep.mubr.f32.mxu1 %v1894_v25 }
0x1454   :  { %2012 = vmatmul.mubr.f32.gmra.mrb[14].mxu1 %v1891_v26  ;;  %v2095_v42 = vpop.permute.xlu0 %2094 }
0x1522   :  { %v2463_v53 = vpop.f32.mrb[24].mxu0 }
0x1523   :  { %v2327_v27 = vpop.f32.mrb[12].mxu1  ;;  %v2083_v28 = vpop.f32.mrb[25].mxu0 }
0x1524   :  { %v2328_v30 = vpop.f32.mrb[13].mxu1 }
0x1525   :  { %v2329_v38 = vadd.f32 %v2328_v30, %v2327_v27 }
0x1527   :  { %v2009_v20 = vadd.f32 %v2329_v38, %v2227_v29  ;;  %v2330_v32 = vpop.f32.mrb[14].mxu1 }
0x1528   :  { %v2331_v33 = vpop.f32.mrb[15].mxu1 }
0x1529   :  { %v2332_v34 = vadd.f32 %v2331_v33, %v2330_v32  ;;  %v2084_v35 = vadd.f32 %v2083_v28, %v2009_v20  ;;  %v2103_v32 = vld [vmem:[%s3425_s20 + $0x8] sm:$0xff] }
0x152b   :  { %v2014_v9 = vadd.f32 %v2332_v34, %v2227_v29  ;;  %v2098_v17 = vadd.f32 %v2093_v31, %v2084_v35  ;;  %v2101_v31 = vld [vmem:[%s3424_s19 + $0x8] sm:$0xff] }
0x152d   :  { %v2104_v36 = vsel %vm255_vm3, %v2098_v17, 0.0  ;;  %v2089_v14 = vadd.f32 %v2463_v53, %v2014_v9 }
0x152e   :  { %2105 = vadd.xlane.f32.xlu1 %v2104_v36 }
0x152f   :  { %v2099_v37 = vadd.f32 %v2095_v42, %v2089_v14 }
0x1531   :  { %v2136_v39 = vsel %vm255_vm3, %v2099_v37, 0.0 }
0x1532   :  { %2137 = vadd.xlane.f32.xlu1 %v2136_v39 }
0x15bb   :  { %v2106_v40 = vpop.xlane.xlu1 %2105 }
0x15bc   :  { %v2107_v43 = vrot.slane %v2106_v40, 4 }
0x15be   :  { %v2108_v41 = vadd.f32 %v2107_v43, %v2106_v40 }
0x15bf   :  { %v2138_v57 = vpop.xlane.xlu1 %2137 }
0x15c0   :  { %v2109_v44 = vrot.slane %v2108_v41, 2  ;;  %v2139_v58 = vrot.slane %v2138_v57, 4 }
0x15c2   :  { %v2110_v45 = vadd.f32 %v2109_v44, %v2108_v41  ;;  %v2140_v59 = vadd.f32 %v2139_v58, %v2138_v57 }
0x15c4   :  { %v2111_v51 = vrot.slane %v2110_v45, 1  ;;  %v2141_v60 = vrot.slane %v2140_v59, 2 }
0x15c6   :  { %v2112_v50 = vadd.f32 %v2111_v51, %v2110_v45  ;;  %v2142_v2 = vadd.f32 %v2141_v60, %v2140_v59 }
0x15c8   :  { %2584 = vpush %v2112_v50  ;;  %v2143_v3 = vrot.slane %v2142_v2, 1 }
0x15ca   :  { %v2144_v5 = vadd.f32 %v2143_v3, %v2142_v2 }
0x15f9   :  { %s2585_s18 = spop %2584 }
0x15fa   :  { %v2114_v52 = vstv %s2585_s18 }
0x15fb   :  { %v2116_v49 = vmul.f32 0.0013020834, %v2114_v52 }
0x15fd   :  { %v2117_v54 = vsub.f32 %v2098_v17, %v2116_v49 }
0x15ff   :  { %v2118_v55 = vmul.f32 %v2117_v54, %v2117_v54 }
0x1601   :  { %v2119_v56 = vsel %vm255_vm3, %v2118_v55, 0.0 }
0x1602   :  { %2120 = vadd.xlane.f32.xlu0 %v2119_v56 }
0x168f   :  { %v2121_v61 = vpop.xlane.xlu0 %2120 }
0x1690   :  { %v2122_v7 = vrot.slane %v2121_v61, 4 }
0x1692   :  { %v2123_v62 = vadd.f32 %v2122_v7, %v2121_v61 }
0x1694   :  { %v2124_v63 = vrot.slane %v2123_v62, 2 }
0x1696   :  { %v2125_v0 = vadd.f32 %v2124_v63, %v2123_v62 }
0x1698   :  { %v2126_v1 = vrot.slane %v2125_v0, 1 }
0x169a   :  { %v2127_v46 = vadd.f32 %v2126_v1, %v2125_v0 }
0x169c   :  { %2586 = vpush %v2127_v46 }
0x169d   :  { %2588 = vpush %v2144_v5 }
0x16cd   :  { %s2587_s12 = spop %2586 }
0x16ce   :  { %v2129_v10 = vstv %s2587_s12  ;;  %s2589_s11 = spop %2588 }
0x16cf   :  { %v2130_v13 = vmul.f32 0.0013020834, %v2129_v10  ;;  %v2146_v15 = vstv %s2589_s11 }
0x16d0   :  { %v2147_v16 = vmul.f32 0.0013020834, %v2146_v15 }
0x16d1   :  { %v2131_v8 = vadd.f32 1e-05, %v2130_v13 }
0x16d2   :  { %v2148_v48 = vsub.f32 %v2099_v37, %v2147_v16 }
0x16d3   :  { %2698 = vrsqrt.f32 %v2131_v8 }
0x16d4   :  { %v2149_v18 = vmul.f32 %v2148_v48, %v2148_v48 }
0x16d6   :  { %v2150_v21 = vsel %vm255_vm3, %v2149_v18, 0.0 }
0x16d7   :  { %2151 = vadd.xlane.f32.xlu0 %v2150_v21 }
0x16dd   :  { %v2699_v11 = vpop.eup %2698 }
0x16de   :  { %v2133_v19 = vmul.f32 %v2699_v11, %v2117_v54 }
0x16e0   :  { %v2134_v22 = vmul.f32 %v2133_v19, %v2100_v47 }
0x16e2   :  { %v2135_v23 = vadd.f32 %v2134_v22, %v2102_v12 }
0x16e4   :  { %2167 = vst.msk [vmem:[%s3426_s21] sm:$0xff] %vm255_vm3, %v2135_v23 }
0x1764   :  { %v2152_v6 = vpop.xlane.xlu0 %2151 }
0x1765   :  { %v2153_v4 = vrot.slane %v2152_v6, 4 }
0x1767   :  { %v2154_v24 = vadd.f32 %v2153_v4, %v2152_v6 }
0x1769   :  { %v2155_v25 = vrot.slane %v2154_v24, 2 }
0x176b   :  { %v2156_v26 = vadd.f32 %v2155_v25, %v2154_v24 }
0x176d   :  { %v2157_v53 = vrot.slane %v2156_v26, 1 }
0x176f   :  { %v2158_v27 = vadd.f32 %v2157_v53, %v2156_v26 }
0x1771   :  { %2590 = vpush %v2158_v27 }
0x17a2   :  { %s2591_s9 = spop %2590 }
0x17a3   :  { %v2160_v28 = vstv %s2591_s9 }
0x17a4   :  { %v2161_v29 = vmul.f32 0.0013020834, %v2160_v28 }
0x17a6   :  { %v2162_v30 = vadd.f32 1e-05, %v2161_v29 }
0x17a8   :  { %2700 = vrsqrt.f32 %v2162_v30 }
0x17b2   :  { %v2701_v38 = vpop.eup %2700 }
0x17b3   :  { %v2164_v20 = vmul.f32 %v2701_v38, %v2148_v48 }
0x17b5   :  { %v2165_v33 = vmul.f32 %v2164_v20, %v2101_v31 }
0x17b7   :  { %v2166_v34 = vadd.f32 %v2165_v33, %v2103_v32 }
0x17b9   :  { %2168 = vst.msk [vmem:[%s3426_s21 + $0x8] sm:$0xff] %vm255_vm3, %v2166_v34 }

// kernel: _lambda_.5
= control target key start
LH: loop header
LB: loop body
LE: loop exit
PB: predicated region body
PF: predicated region fallthrough
CT: control target
= control target key end

     0   :  { %v2760_v3 = vmov 0.0   ;;  %vm347_vm0 = vcmask 64512   ;;  %vm231_vm1 = vcmask 130048   ;;  %vm254_vm2 = vcmask 916480   ;;  %s2765_s23 = smov 96   ;;  %s2767_s26 = smov 80   ;;  %s3507_s5 = inlined_call_operand.vmem [shape: f32[128,224], index: 5, kind: input, shape index: {}]   ;;  %s3508_s9 = inlined_call_operand.vmem [shape: f32[8,8], index: 9, kind: input, shape index: {}]   ;;  %s3509_s0 = inlined_call_operand.vmem [shape: f32[16,128], index: 0, kind: input, shape index: {}]   ;;  %s3510_s1 = inlined_call_operand.vmem [shape: f32[16,8], index: 1, kind: input, shape index: {}]   ;;  %s3511_s7 = inlined_call_operand.vmem [shape: f32[112,8], index: 7, kind: input, shape index: {}]   ;;  %s3512_s6 = inlined_call_operand.vmem [shape: f32[1,224], index: 6, kind: input, shape index: {}]   ;;  %s3513_s10 = inlined_call_operand.vmem [shape: f32[1,8], index: 10, kind: input, shape index: {}]   ;;  %s3514_s12 = inlined_call_operand.vmem [shape: f32[8,16], index: 12, kind: input, shape index: {}]   ;;  %s3515_s15 = inlined_call_operand.vmem [shape: f32[8,8], index: 15, kind: input, shape index: {}]   ;;  %s3516_s11 = inlined_call_operand.vmem [shape: f32[8,24], index: 11, kind: input, shape index: {}]   ;;  %s3517_s2 = inlined_call_operand.vmem [shape: f32[16,8], index: 2, kind: input, shape index: {}]   ;;  %s3518_s8 = inlined_call_operand.vmem [shape: f32[1,8], index: 8, kind: input, shape index: {}]   ;;  %s3519_s22 = inlined_call_operand.vmem [shape: f32[16,8], index: 22, kind: output, shape index: {1}]   ;;  %s3520_s13 = inlined_call_operand.vmem [shape: f32[8,8], index: 13, kind: input, shape index: {}]   ;;  %s3521_s14 = inlined_call_operand.vmem [shape: f32[1,24], index: 14, kind: input, shape index: {}]   ;;  %s3522_s16 = inlined_call_operand.vmem [shape: f32[1,8], index: 16, kind: input, shape index: {}]   ;;  %s3523_s3 = inlined_call_operand.vmem [shape: f32[16,16], index: 3, kind: input, shape index: {}]   ;;  %s3524_s4 = inlined_call_operand.vmem [shape: f32[16,16], index: 4, kind: input, shape index: {}]   ;;  %s3525_s17 = inlined_call_operand.vmem [shape: f32[336,112], index: 17, kind: input, shape index: {}]   ;;  %s3526_s18 = inlined_call_operand.vmem [shape: f32[1,112], index: 18, kind: input, shape index: {}]   ;;  %s3527_s19 = inlined_call_operand.vmem [shape: f32[16,112], index: 19, kind: input, shape index: {}]   ;;  %s3528_s20 = inlined_call_operand.vmem [shape: f32[16,112], index: 20, kind: input, shape index: {}]   ;;  %s3529_s21 = inlined_call_operand.vmem [shape: f32[16,112], index: 21, kind: output, shape index: {0}]  }
   0x1   :  { %3534 = sst [smem:[#allocation2_spill]] %s3507_s5  ;;  %180 = vmatprep.mubr.f32.mxu0 %v2760_v3  ;;  %s2763_s5 = smov 112   ;;  %vm3188_vm3 = vmpackc.low %vm347_vm0, %vm347_vm0  ;;  %vm1875_vm4 = vcmask 457728   ;;  %vm1950_vm5 = vcmask 654336   ;;  %vm1898_vm6 = vcmask 785408  }
   0x2   :  { %3535 = sst [smem:[#allocation3_spill]] %s3508_s9  ;;  %s3541_s29 = sld [smem:[#allocation2_spill]] }
   0x3   :  { %3536 = sst [smem:[#allocation4_spill]] %s3509_s0  ;;  %s3542_s25 = sld [smem:[#allocation3_spill]] }
   0x4   :  { %3537 = sst [smem:[#allocation5_spill]] %s3510_s1  ;;  %s3543_s27 = sld [smem:[#allocation4_spill]] }
   0x5   :  { %3538 = sst [smem:[#allocation6_spill]] %s3511_s7  ;;  %s3544_s7 = sld [smem:[#allocation5_spill]] }
   0x6   :  { %3539 = sst [smem:[#allocation7_spill]] %s3512_s6  ;;  %s3545_s24 = sld [smem:[#allocation6_spill]] }
   0x7   :  { %3540 = sst [smem:[#allocation8_spill]] %s3513_s10  ;;  %s3546_s30 = sld [smem:[#allocation7_spill]] }
   0x8   :  { %v73_v0 = vld [vmem:[%s3541_s29 + $0x8] sm:$0xff]  ;;  %v75_v1 = vld [vmem:[%s3541_s29 + $0x18] sm:$0xff]  ;;  %v72_v2 = vld [vmem:[%s3541_s29] sm:$0xff]  ;;  %s3547_s28 = sld [smem:[#allocation8_spill]]  ;;  %s2764_s6 = smov 104  }
   0x9   :  { %v2501_v4 = vpack.c.bf16 %v75_v1, %v73_v0  ;;  %v74_v5 = vld [vmem:[%s3541_s29 + $0x10] sm:$0xff]  ;;  %v77_v6 = vld [vmem:[%s3541_s29 + $0x28] sm:$0xff]  ;;  %v79_v7 = vld [vmem:[%s3541_s29 + $0x38] sm:$0xff]  ;;  %s2768_s0 = smov 8  }
   0xa   :  { %v2503_v8 = vpack.c.bf16 %v74_v5, %v72_v2  ;;  %v2505_v9 = vpack.c.bf16 %v79_v7, %v77_v6  ;;  %v76_v10 = vld [vmem:[%s3541_s29 + $0x20] sm:$0xff]  ;;  %v78_v11 = vld [vmem:[%s3541_s29 + $0x30] sm:$0xff]  ;;  %v81_v12 = vld [vmem:[%s3541_s29 + $0x48] sm:$0xff]  ;;  %v106_v5 = vlaneseq }
   0xb   :  { %2502 = vmatprep.subr.bf16.mxu0 %v2501_v4  ;;  %v83_v13 = vld [vmem:[%s3541_s29 + $0x58] sm:$0xff]  ;;  %v2507_v14 = vpack.c.bf16 %v78_v11, %v76_v10  ;;  %v80_v16 = vld [vmem:[%s3541_s29 + $0x40] sm:$0xff]  ;;  %v82_v17 = vld [vmem:[%s3541_s29 + $0x50] sm:$0xff] }
   0xc   :  { %2504 = vmatpush1.bf16.msra.mxu0 %v2503_v8  ;;  %v2509_v15 = vpack.c.bf16 %v83_v13, %v81_v12  ;;  %v85_v18 = vld [vmem:[%s3541_s29 + $0x68] sm:$0xff]  ;;  %v87_v19 = vld [vmem:[%s3541_s29 + $0x78] sm:$0xff]  ;;  %v2511_v20 = vpack.c.bf16 %v82_v17, %v80_v16  ;;  %v84_v22 = vld [vmem:[%s3541_s29 + $0x60] sm:$0xff]  ;;  %v107_v6 = vshrl.u32 %v106_v5, 7 }
   0xd   :  { %2506 = vmatprep.subr.bf16.mxu0 %v2505_v9  ;;  %v2513_v21 = vpack.c.bf16 %v87_v19, %v85_v18  ;;  %v86_v23 = vld [vmem:[%s3541_s29 + $0x70] sm:$0xff]  ;;  %v89_v24 = vld [vmem:[%s3541_s29 + $0x88] sm:$0xff]  ;;  %v91_v25 = vld [vmem:[%s3541_s29 + $0x98] sm:$0xff] }
   0xe   :  { %v2515_v26 = vpack.c.bf16 %v86_v23, %v84_v22  ;;  %v2517_v27 = vpack.c.bf16 %v91_v25, %v89_v24  ;;  %v88_v28 = vld [vmem:[%s3541_s29 + $0x80] sm:$0xff]  ;;  %v90_v29 = vld [vmem:[%s3541_s29 + $0x90] sm:$0xff]  ;;  %v93_v30 = vld [vmem:[%s3541_s29 + $0xa8] sm:$0xff]  ;;  %v108_v7 = vsub.s32 0, %v107_v6  ;;  %v112_v9 = vsub.s32 1, %v107_v6 }
   0xf   :  { %v95_v31 = vld [vmem:[%s3541_s29 + $0xb8] sm:$0xff]  ;;  %v2519_v32 = vpack.c.bf16 %v90_v29, %v88_v28  ;;  %v92_v34 = vld [vmem:[%s3541_s29 + $0xa0] sm:$0xff]  ;;  %v94_v35 = vld [vmem:[%s3541_s29 + $0xb0] sm:$0xff] }
  0x10   :  { %2508 = vmatpush1.bf16.msra.mxu0 %v2507_v14  ;;  %v2521_v33 = vpack.c.bf16 %v95_v31, %v93_v30  ;;  %v97_v36 = vld [vmem:[%s3541_s29 + $0xc8] sm:$0xff]  ;;  %v99_v37 = vld [vmem:[%s3541_s29 + $0xd8] sm:$0xff]  ;;  %v2523_v38 = vpack.c.bf16 %v94_v35, %v92_v34  ;;  %v96_v40 = vld [vmem:[%s3541_s29 + $0xc0] sm:$0xff] }
  0x11   :  { %2510 = vmatprep.subr.bf16.mxu0 %v2509_v15  ;;  %v2525_v39 = vpack.c.bf16 %v99_v37, %v97_v36  ;;  %v98_v41 = vld [vmem:[%s3541_s29 + $0xd0] sm:$0xff]  ;;  %v101_v42 = vld [vmem:[%s3541_s29 + $0xe8] sm:$0xff]  ;;  %v103_v43 = vld [vmem:[%s3541_s29 + $0xf8] sm:$0xff] }
  0x12   :  { %v2527_v44 = vpack.c.bf16 %v98_v41, %v96_v40  ;;  %v2529_v45 = vpack.c.bf16 %v103_v43, %v101_v42  ;;  %v100_v46 = vld [vmem:[%s3541_s29 + $0xe0] sm:$0xff]  ;;  %v102_v47 = vld [vmem:[%s3541_s29 + $0xf0] sm:$0xff]  ;;  %v71_v51 = vld [vmem:[%s3543_s27 + $0x8] sm:$0xff] }
  0x13   :  { %v2531_v48 = vpack.c.bf16 %v102_v47, %v100_v46  ;;  %v352_v49 = vld [vmem:[%s3542_s25] sm:$0xff]  ;;  %v351_v53 = vld [vmem:[%s3544_s7 + $0x8] sm:$0xff]  ;;  %v242_v56 = vld [vmem:[%s3545_s24 + $0x10] sm:$0xff]  ;;  %s2766_s25 = smov 88  }
  0x14   :  { %2512 = vmatpush1.bf16.msra.mxu0 %v2511_v20  ;;  %v70_v50 = vld [vmem:[%s3543_s27] sm:$0xff]  ;;  %v241_v55 = vld [vmem:[%s3545_s24 + $0x8] sm:$0xff]  ;;  %v243_v58 = vld [vmem:[%s3545_s24 + $0x18] sm:$0xff] }
  0x15   :  { %2514 = vmatprep.subr.bf16.mxu0 %v2513_v21  ;;  %v350_v52 = vld [vmem:[%s3544_s7] sm:$0xff]  ;;  %v2537_v59 = vpack.c.bf16 %v243_v58, %v242_v56  ;;  %v245_v61 = vld [vmem:[%s3545_s24 + $0x28] sm:$0xff]  ;;  %v246_v63 = vld [vmem:[%s3545_s24 + $0x30] sm:$0xff] }
  0x16   :  { %v240_v54 = vld [vmem:[%s3545_s24] sm:$0xff]  ;;  %v247_v0 = vld [vmem:[%s3545_s24 + $0x38] sm:$0xff]  ;;  %v250_v25 = vld [vmem:[%s3545_s24 + $0x50] sm:$0xff] }
  0x17   :  { %v2533_v57 = vpack.c.bf16 %v241_v55, %v240_v54  ;;  %v244_v60 = vld [vmem:[%s3545_s24 + $0x20] sm:$0xff]  ;;  %v2545_v1 = vpack.c.bf16 %v247_v0, %v246_v63  ;;  %v253_v35 = vld [vmem:[%s3545_s24 + $0x68] sm:$0xff] }
  0x18   :  { %2516 = vmatpush1.bf16.msra.mxu0 %v2515_v26  ;;  %v2541_v62 = vpack.c.bf16 %v245_v61, %v244_v60  ;;  %v248_v2 = vld [vmem:[%s3545_s24 + $0x40] sm:$0xff]  ;;  %v251_v26 = vld [vmem:[%s3545_s24 + $0x58] sm:$0xff] }
  0x19   :  { %2518 = vmatprep.subr.bf16.mxu0 %v2517_v27  ;;  %2534 = vmatprep.subr.bf16.mxu1 %v2533_v57  ;;  %v104_v8 = vld [vmem:[%s3546_s30] sm:$0x3]  ;;  %v2553_v29 = vpack.c.bf16 %v251_v26, %v250_v25 }
  0x1a   :  { %2536 = vmatpush3.bf16.msra.mxu1 %v2533_v57  ;;  %v109_v10 = vrot.slane %v104_v8, %v108_v7  ;;  %v113_v11 = vrot.slane %v104_v8, %v112_v9  ;;  %v252_v34 = vld [vmem:[%s3545_s24 + $0x60] sm:$0xff] }
  0x1b   :  { %2538 = vmatprep.subr.bf16.mxu1 %v2537_v59  ;;  %v2557_v36 = vpack.c.bf16 %v253_v35, %v252_v34  ;;  %v3054_v42 = vld [vmem:[%s3514_s12] sm:$0xff]  ;;  %s2761_s12 = smov 16  }
  0x1c   :  { %2520 = vmatpush1.bf16.msra.mxu0 %v2519_v32  ;;  %v3105_v60 = vld [vmem:[%s3516_s11] sm:$0xff] }
  0x1d   :  { %2522 = vmatprep.subr.bf16.mxu0 %v2521_v33  ;;  %v238_v25 = vld [vmem:[%s3517_s2] sm:$0xff] }
  0x1e   :  { %2540 = vmatpush3.bf16.msra.mxu1 %v2537_v59  ;;  %v3149_v34 = vld [vmem:[%s3520_s13] sm:$0xff] }
  0x1f   :  { %2542 = vmatprep.subr.bf16.mxu1 %v2541_v62  ;;  %v3156_v35 = vld [vmem:[%s3521_s14] ss:$0 sm:$0xff] }
  0x20   :  { %2524 = vmatpush1.bf16.msra.mxu0 %v2523_v38 }
  0x21   :  { %2526 = vmatprep.subr.bf16.mxu0 %v2525_v39  ;;  %v2199_v39 = vld [vmem:[%s3547_s28] ss:$0 sm:$0xff] }
  0x22   :  { %2544 = vmatpush3.bf16.msra.mxu1 %v2541_v62 }
  0x23   :  { %2546 = vmatprep.subr.bf16.mxu1 %v2545_v1 }
  0x24   :  { %2528 = vmatpush1.bf16.msra.mxu0 %v2527_v44  ;;  %v3063_v44 = vld [vmem:[%s3515_s15] sm:$0xff]  ;;  %s2762_s15 = smov 120  }
  0x25   :  { %2530 = vmatprep.subr.bf16.mxu0 %v2529_v45 }
  0x26   :  { %2548 = vmatpush3.bf16.msra.mxu1 %v2545_v1 }
  0x28   :  { %2532 = vmatpush1.bf16.msra.mxu0 %v2531_v48 }
  0x29   :  { %2391 = vmatprep.subr.mxu0 %v352_v49 }
  0x2b   :  { %181 = vmatmul.mubr.f32.vlgmr.msra.gmra.mrb[0].mxu0 %v70_v50 }
  0x2c   :  { %186 = vmatprep.mubr.f32.mxu0 %v2760_v3  ;;  %2392 = vmatpush3.msra.mxu0 %v352_v49  ;;  %v249_v3 = vld [vmem:[%s3545_s24 + $0x48] sm:$0xff]  ;;  %s2769_s24 = smov 72  }
  0x2d   :  { %v2549_v4 = vpack.c.bf16 %v249_v3, %v248_v2  ;;  %2401 = vmatprep.subr.mxu0 %v3054_v42 }
  0x2f   :  { %187 = vmatmul.mubr.f32.gmra.mrb[2].mxu0 %v71_v51  ;;  %2550 = vmatprep.subr.bf16.mxu1 %v2549_v4 }
  0x30   :  { %2393 = vmatprep.mubr.msk.f32.mxu0 %vm347_vm0, %v350_v52  ;;  %2552 = vmatpush3.bf16.msra.mxu1 %v2549_v4 }
  0x31   :  { %2554 = vmatprep.subr.bf16.mxu1 %v2553_v29 }
  0x33   :  { %2394 = vmatmul.mubr.msk.f32.vlgmr.msra.gmra.mrb[4].mxu0 %vm347_vm0, %v351_v53 }
  0x34   :  { %2556 = vmatpush3.bf16.msra.mxu1 %v2553_v29  ;;  %2402 = vmatpush3.msra.mxu0 %v3054_v42 }
  0x35   :  { %2558 = vmatprep.subr.bf16.mxu1 %v2557_v36  ;;  %2411 = vmatprep.subr.mxu0 %v3063_v44 }
  0x38   :  { %2560 = vmatpush3.bf16.msra.mxu1 %v2557_v36 }
  0x39   :  { %2396 = vmatprep.subr.mxu1 %v3105_v60 }
  0xfe   :  { %v182_v12 = vpop.f32.mrb[0].mxu0 }
  0xff   :  { %v183_v13 = vadd.f32 %v182_v12, %v109_v10  ;;  %v184_v14 = vpop.f32.mrb[1].mxu0 }
 0x100   :  { %v185_v15 = vadd.f32 %v184_v14, %v113_v11 }
 0x101   :  { %v2192_v16 = vmul.f32 -1.442695, %v183_v13 }
 0x102   :  { %v2193_v17 = vmul.f32 -1.442695, %v185_v15  ;;  %v188_v18 = vpop.f32.mrb[2].mxu0 }
 0x103   :  { %2670 = vpow2.f32 %v2192_v16  ;;  %v189_v19 = vadd.f32 %v188_v18, %v109_v10  ;;  %v190_v20 = vpop.f32.mrb[3].mxu0 }
 0x104   :  { %2672 = vpow2.f32 %v2193_v17  ;;  %v191_v21 = vadd.f32 %v190_v20, %v113_v11 }
 0x105   :  { %v2194_v22 = vmul.f32 -1.442695, %v189_v19 }
 0x106   :  { %v2195_v23 = vmul.f32 -1.442695, %v191_v21  ;;  %v2395_v37 = vpop.f32.mrb[4].mxu0 }
 0x107   :  { %2674 = vpow2.f32 %v2194_v22  ;;  %v3049_v40 = vadd.f32 %v2395_v37, %v2199_v39  ;;  %v432_v41 = vpop.f32.mrb[5].mxu0 }
 0x108   :  { %2676 = vpow2.f32 %v2195_v23  ;;  %v3056_v43 = vadd.f32 %v2199_v39, %v432_v41 }
 0x10a   :  { %2403 = vmatprep.mubr.msk.f32.mxu0 %vm347_vm0, %v3056_v43 }
 0x10b   :  { %2404 = vmatmul.mubr.msk.f32.vlgmr.msra.gmra.mrb[6].mxu0 %vm347_vm0, %v3049_v40 }
 0x10c   :  { %2412 = vmatpush3.msra.mxu0 %v3063_v44 }
 0x10d   :  { %v2671_v24 = vpop.eup %2670 }
 0x10e   :  { %v2673_v27 = vpop.eup %2672  ;;  %v207_v28 = vadd.f32 1.0, %v2671_v24  ;;  %v239_v24 = vld [vmem:[%s3517_s2 + $0x8] sm:$0xff] }
 0x10f   :  { %v208_v30 = vadd.f32 1.0, %v2673_v27  ;;  %v2198_v27 = vld [vmem:[%s3518_s8] ss:$0 sm:$0xff] }
 0x110   :  { %2678 = vrcp.f32 %v207_v28 }
 0x111   :  { %v2675_v31 = vpop.eup %2674  ;;  %2680 = vrcp.f32 %v208_v30 }
 0x112   :  { %v2677_v32 = vpop.eup %2676  ;;  %v209_v33 = vadd.f32 1.0, %v2675_v31 }
 0x113   :  { %v210_v38 = vadd.f32 1.0, %v2677_v32 }
 0x114   :  { %2682 = vrcp.f32 %v209_v33 }
 0x115   :  { %2684 = vrcp.f32 %v210_v38 }
 0x116   :  { %2686 = vtanh.f32 %v183_v13 }
 0x117   :  { %2688 = vtanh.f32 %v189_v19 }
 0x11a   :  { %v2679_v45 = vpop.eup %2678 }
 0x11b   :  { %223 = vrot.lane.b32.xlu0 %v2679_v45, %s2761_s12  ;;  %v2681_v46 = vpop.eup %2680 }
 0x11e   :  { %v2683_v47 = vpop.eup %2682 }
 0x11f   :  { %227 = vrot.lane.b32.xlu1 %v2683_v47, %s2761_s12  ;;  %225 = vrot.lane.b32.xlu0 %v2681_v46, %s2761_s12  ;;  %v2685_v48 = vpop.eup %2684 }
 0x120   :  { %v2687_v52 = vpop.eup %2686 }
 0x121   :  { %v2689_v56 = vpop.eup %2688 }
 0x123   :  { %229 = vrot.lane.b32.xlu1 %v2685_v48, %s2761_s12 }
 0x18d   :  { %v224_v49 = vpop.permute.xlu0 %223 }
 0x191   :  { %v228_v50 = vpop.permute.xlu1 %227  ;;  %v226_v51 = vpop.permute.xlu0 %225 }
 0x192   :  { %v232_v53 = vsel %vm231_vm1, %v224_v49, %v226_v51 }
 0x193   :  { %v3076_v54 = vmul.f32 %v2687_v52, %v232_v53 }
 0x195   :  { %v230_v55 = vpop.permute.xlu1 %229  ;;  %451 = vrot.lane.b32.xlu0 %v3076_v54, %s2762_s15  ;;  %2388 = vmatprep.mubr.msk.f32.mxu1 %vm254_vm2, %v3076_v54 }
 0x196   :  { %v233_v57 = vsel %vm231_vm1, %v228_v50, %v230_v55 }
 0x197   :  { %v3083_v58 = vmul.f32 %v2689_v56, %v233_v57 }
 0x199   :  { %453 = vrot.lane.b32.xlu1 %v3083_v58, %s2762_s15  ;;  %459 = vrot.lane.b32.xlu0 %v3076_v54, %s2763_s5  ;;  %v3091_v59 = vpack.c.bf16 %v3083_v58, %v3076_v54 }
 0x19a   :  { %2389 = vmatmul.mubr.msk.f32.vlgmr.msra.gmra.mrb[0].mxu1 %vm254_vm2, %v3083_v58 }
 0x19b   :  { %2568 = vmatprep.subr.bf16.mxu0 %v3091_v59  ;;  %2397 = vmatpush3.msra.mxu1 %v3105_v60 }
 0x19c   :  { %2406 = vmatprep.subr.mxu1 %v3149_v34 }
 0x19d   :  { %461 = vrot.lane.b32.xlu1 %v3083_v58, %s2763_s5  ;;  %467 = vrot.lane.b32.xlu0 %v3076_v54, %s2764_s6 }
 0x1a1   :  { %469 = vrot.lane.b32.xlu1 %v3083_v58, %s2764_s6  ;;  %475 = vrot.lane.b32.xlu0 %v3076_v54, %s2765_s23 }
 0x1a5   :  { %477 = vrot.lane.b32.xlu1 %v3083_v58, %s2765_s23  ;;  %483 = vrot.lane.b32.xlu0 %v3076_v54, %s2766_s25 }
 0x1a9   :  { %485 = vrot.lane.b32.xlu1 %v3083_v58, %s2766_s25  ;;  %491 = vrot.lane.b32.xlu0 %v3076_v54, %s2767_s26 }
 0x1ad   :  { %493 = vrot.lane.b32.xlu1 %v3083_v58, %s2767_s26  ;;  %683 = vrot.lane.b32.xlu0 %v3056_v43, %s2768_s0 }
 0x1b1   :  { %685 = vrot.lane.b32.xlu1 %v3049_v40, %s2768_s0 }
 0x1de   :  { %v2405_v61 = vpop.f32.mrb[6].mxu0 }
 0x1df   :  { %v660_v33 = vpop.f32.mrb[7].mxu0 }
 0x207   :  { %v452_v62 = vpop.permute.xlu0 %451 }
 0x208   :  { %v457_v3 = vadd.f32 %v452_v62, %v3076_v54 }
 0x20b   :  { %v454_v63 = vpop.permute.xlu1 %453  ;;  %v460_v0 = vpop.permute.xlu0 %459 }
 0x20c   :  { %v465_v6 = vadd.f32 %v460_v0, %v457_v3  ;;  %v458_v7 = vadd.f32 %v454_v63, %v3083_v58 }
 0x20f   :  { %v462_v1 = vpop.permute.xlu1 %461  ;;  %v468_v2 = vpop.permute.xlu0 %467 }
 0x210   :  { %v473_v8 = vadd.f32 %v468_v2, %v465_v6  ;;  %v466_v11 = vadd.f32 %v462_v1, %v458_v7 }
 0x213   :  { %v470_v4 = vpop.permute.xlu1 %469  ;;  %v476_v5 = vpop.permute.xlu0 %475 }
 0x214   :  { %v481_v12 = vadd.f32 %v476_v5, %v473_v8  ;;  %v474_v13 = vadd.f32 %v470_v4, %v466_v11 }
 0x217   :  { %v478_v9 = vpop.permute.xlu1 %477  ;;  %v484_v10 = vpop.permute.xlu0 %483 }
 0x218   :  { %v489_v14 = vadd.f32 %v484_v10, %v481_v12  ;;  %v482_v17 = vadd.f32 %v478_v9, %v474_v13 }
 0x21b   :  { %v486_v15 = vpop.permute.xlu1 %485  ;;  %v492_v16 = vpop.permute.xlu0 %491 }
 0x21c   :  { %v497_v18 = vadd.f32 %v492_v16, %v489_v14  ;;  %v490_v19 = vadd.f32 %v486_v15, %v482_v17 }
 0x21e   :  { %v3121_v20 = vmul.f32 0.14285715, %v497_v18  ;;  %v3182_v18 = vld [vmem:[%s3522_s16] ss:$0 sm:$0xff] }
 0x21f   :  { %v494_v21 = vpop.permute.xlu1 %493  ;;  %v684_v56 = vpop.permute.xlu0 %683 }
 0x220   :  { %v498_v22 = vadd.f32 %v494_v21, %v490_v19  ;;  %2398 = vmatprep.mubr.msk.f32.mxu1 %vm347_vm0, %v3121_v20 }
 0x222   :  { %v3125_v23 = vmul.f32 0.14285715, %v498_v22 }
 0x223   :  { %v686_v53 = vpop.permute.xlu1 %685 }
 0x224   :  { %2399 = vmatmul.mubr.msk.f32.vlgmr.msra.gmra.mrb[2].mxu1 %vm347_vm0, %v3125_v23 }
 0x225   :  { %2407 = vmatpush3.msra.mxu1 %v3149_v34 }
 0x26d   :  { %v2390_v26 = vpop.f32.mrb[0].mxu1 }
 0x26e   :  { %v337_v28 = vadd.f32 %v2390_v26, %v239_v24  ;;  %v327_v29 = vpop.f32.mrb[1].mxu1 }
 0x26f   :  { %v336_v30 = vadd.f32 %v327_v29, %v238_v25  ;;  %v3204_v29 = vld [vmem:[%s3523_s3 + $0x8] sm:$0xff] }
 0x270   :  { %v346_v31 = vadd.f32 %v2198_v27, %v337_v28 }
 0x271   :  { %v345_v32 = vadd.f32 %v2198_v27, %v336_v30 }
 0x272   :  { %349 = vst.msk [vmem:[%s3519_s22 + $0x8] sm:$0xff] %vm347_vm0, %v346_v31 }
 0x273   :  { %348 = vst.msk [vmem:[%s3519_s22] sm:$0xff] %vm347_vm0, %v345_v32  ;;  %v3209_v32 = vld [vmem:[%s3523_s3] sm:$0xff] }
 0x2f7   :  { %v2400_v36 = vpop.f32.mrb[2].mxu1 }
 0x2f8   :  { %v585_v37 = vadd.f32 %v2400_v36, %v3156_v35  ;;  %v579_v38 = vpop.f32.mrb[3].mxu1 }
 0x2f9   :  { %v580_v39 = vadd.f32 %v3156_v35, %v579_v38 }
 0x2fa   :  { %v670_v41 = vadd.f32 %v2405_v61, %v585_v37 }
 0x2fb   :  { %v669_v45 = vadd.f32 %v660_v33, %v580_v39 }
 0x2fc   :  { %v2208_v46 = vmul.f32 -1.442695, %v670_v41 }
 0x2fd   :  { %v2207_v47 = vmul.f32 -1.442695, %v669_v45 }
 0x2fe   :  { %2690 = vpow2.f32 %v2208_v46 }
 0x2ff   :  { %2692 = vpow2.f32 %v2207_v47 }
 0x308   :  { %v2691_v48 = vpop.eup %2690 }
 0x309   :  { %v2693_v49 = vpop.eup %2692  ;;  %v678_v50 = vadd.f32 1.0, %v2691_v48 }
 0x30a   :  { %v677_v51 = vadd.f32 1.0, %v2693_v49 }
 0x30b   :  { %2694 = vrcp.f32 %v678_v50 }
 0x30c   :  { %2696 = vrcp.f32 %v677_v51 }
 0x315   :  { %v2695_v52 = vpop.eup %2694 }
 0x316   :  { %v2697_v55 = vpop.eup %2696  ;;  %v690_v57 = vmul.f32 %v2695_v52, %v686_v53  ;;  %v791_v8 = vsub.f32 1.0, %v2695_v52  ;;  %v789_v15 = vmul.f32 %v2695_v52, %v3049_v40 }
 0x317   :  { %v689_v62 = vmul.f32 %v2697_v55, %v684_v56  ;;  %v790_v10 = vsub.f32 1.0, %v2697_v55  ;;  %v788_v13 = vmul.f32 %v2697_v55, %v3056_v43 }
 0x318   :  { %695 = vrot.lane.b32.xlu1 %v690_v57, %s2762_s15 }
 0x319   :  { %693 = vrot.lane.b32.xlu0 %v689_v62, %s2762_s15 }
 0x38a   :  { %v696_v63 = vpop.permute.xlu1 %695 }
 0x38b   :  { %v694_v61 = vpop.permute.xlu0 %693 }
 0x38c   :  { %2408 = vmatprep.mubr.msk.f32.mxu1 %vm347_vm0, %v694_v61  ;;  %v3222_v61 = vld [vmem:[%s3524_s4] sm:$0xff] }
 0x38d   :  { %2409 = vmatmul.mubr.msk.f32.vlgmr.msra.gmra.mrb[4].mxu1 %vm347_vm0, %v696_v63 }
 0x460   :  { %v2410_v0 = vpop.f32.mrb[4].mxu1 }
 0x461   :  { %780 = vrot.lane.b32.xlu1 %v2410_v0, %s2761_s12  ;;  %v767_v1 = vpop.f32.mrb[5].mxu1 }
 0x462   :  { %778 = vrot.lane.b32.xlu0 %v767_v1, %s2761_s12 }
 0x4d3   :  { %v781_v2 = vpop.permute.xlu1 %780 }
 0x4d4   :  { %v785_v3 = vadd.f32 %v781_v2, %v585_v37  ;;  %v779_v4 = vpop.permute.xlu0 %778  ;;  %v3228_v2 = vld [vmem:[%s3524_s4 + $0x8] sm:$0xff]  ;;  %s2770_s4 = smov 56  }
 0x4d5   :  { %v784_v5 = vadd.f32 %v779_v4, %v580_v39 }
 0x4d6   :  { %2698 = vtanh.f32 %v785_v3 }
 0x4d7   :  { %2700 = vtanh.f32 %v784_v5 }
 0x4e0   :  { %v2699_v6 = vpop.eup %2698 }
 0x4e1   :  { %v2701_v7 = vpop.eup %2700  ;;  %796 = vrot.lane.b32.xlu1 %v2699_v6, %s2763_s5 }
 0x4e2   :  { %794 = vrot.lane.b32.xlu0 %v2701_v7, %s2763_s5 }
 0x553   :  { %v797_v9 = vpop.permute.xlu1 %796 }
 0x554   :  { %v801_v11 = vmul.f32 %v797_v9, %v791_v8  ;;  %v795_v12 = vpop.permute.xlu0 %794 }
 0x555   :  { %v800_v14 = vmul.f32 %v795_v12, %v790_v10 }
 0x556   :  { %v3172_v17 = vadd.f32 %v801_v11, %v789_v15 }
 0x557   :  { %v3170_v16 = vadd.f32 %v800_v14, %v788_v13 }
 0x559   :  { %2413 = vmatprep.mubr.msk.f32.mxu0 %vm347_vm0, %v3170_v16 }
 0x55a   :  { %2414 = vmatmul.mubr.msk.f32.vlgmr.msra.gmra.mrb[8].mxu0 %vm347_vm0, %v3172_v17 }
 0x55b   :  { %2570 = vmatpush3.bf16.msra.mxu0 %v3091_v59 }
 0x62d   :  { %v2415_v43 = vpop.f32.mrb[8].mxu0 }
 0x62e   :  { %v888_v40 = vadd.f32 %v2415_v43, %v3182_v18  ;;  %v882_v19 = vpop.f32.mrb[9].mxu0  ;;  %v3248_v43 = vmul.f32 0.05, %v3083_v58 }
 0x62f   :  { %v883_v21 = vadd.f32 %v3182_v18, %v882_v19 }
 0x630   :  { %2702 = vtanh.f32 %v888_v40 }
 0x631   :  { %2704 = vtanh.f32 %v883_v21 }
 0x63a   :  { %v2703_v22 = vpop.eup %2702 }
 0x63b   :  { %v2705_v24 = vpop.eup %2704 }
 0x63c   :  { %2420 = vmatprep.mubr.msk.f32.mxu1 %vm347_vm0, %v2705_v24  ;;  %v2561_v59 = vpack.c.bf16 %v2703_v22, %v2705_v24 }
 0x63e   :  { %2563 = vmatprep.subr.msk.bf16.mxu1 %vm3188_vm3, %v2561_v59 }
 0x63f   :  { %2566 = vmatpush3.bf16.xpose.msk.msra.mxu1 %vm3188_vm3, %v2561_v59 }
 0x640   :  { %2437 = vmatprep.subr.mxu1 %v3105_v60 }
 0x646   :  { %2421 = vmatmul.mubr.msk.f32.vlgmr.msra.gmra.mrb[6].mxu1 %vm347_vm0, %v2703_v22 }
 0x647   :  { %2438 = vmatpush3.msra.mxu1 %v3105_v60 }
 0x648   :  { %2447 = vmatprep.subr.mxu1 %v3149_v34 }
 0x719   :  { %v2422_v26 = vpop.f32.mrb[6].mxu1 }
 0x71a   :  { %2706 = vtanh.f32 %v2422_v26  ;;  %v965_v27 = vpop.f32.mrb[7].mxu1 }
 0x71b   :  { %2708 = vtanh.f32 %v965_v27 }
 0x724   :  { %v2707_v28 = vpop.eup %2706 }
 0x725   :  { %v2709_v30 = vpop.eup %2708  ;;  %v977_v31 = vmax.f32 %v2707_v28, 0.0 }
 0x726   :  { %v976_v60 = vmax.f32 %v2709_v30, 0.0 }
 0x727   :  { %v979_v33 = vmul.f32 %v977_v31, %v3204_v29 }
 0x728   :  { %v978_v36 = vmul.f32 %v976_v60, %v3209_v32 }
 0x729   :  { %v983_v37 = vsel %vm231_vm1, %v979_v33, -inf }
 0x72a   :  { %984 = vmax.xlane.f32.xlu1 %v983_v37  ;;  %v980_v38 = vsel %vm231_vm1, %v978_v36, -inf }
 0x72b   :  { %981 = vmax.xlane.f32.xlu0 %v980_v38 }
 0x7b7   :  { %v985_v39 = vpop.xlane.xlu1 %984 }
 0x7b8   :  { %v987_v41 = vsub.f32 %v979_v33, %v985_v39  ;;  %v982_v45 = vpop.xlane.xlu0 %981 }
 0x7b9   :  { %v986_v46 = vsub.f32 %v978_v36, %v982_v45 }
 0x7ba   :  { %v990_v47 = vmul.f32 1.442695, %v987_v41 }
 0x7bb   :  { %v988_v48 = vmul.f32 1.442695, %v986_v46 }
 0x7bc   :  { %2710 = vpow2.f32 %v990_v47 }
 0x7bd   :  { %2712 = vpow2.f32 %v988_v48 }
 0x7c6   :  { %v2711_v49 = vpop.eup %2710 }
 0x7c7   :  { %v2713_v50 = vpop.eup %2712  ;;  %v993_v53 = vmul.f32 %v2711_v49, %v3204_v29 }
 0x7c8   :  { %v992_v51 = vmul.f32 %v2713_v50, %v3209_v32 }
 0x7c9   :  { %v997_v55 = vsel %vm231_vm1, %v993_v53, 0.0 }
 0x7ca   :  { %v994_v52 = vsel %vm231_vm1, %v992_v51, 0.0 }
 0x7cb   :  { %995 = vadd.xlane.f32.xlu0 %v994_v52 }
 0x7cf   :  { %998 = vadd.xlane.f32.xlu0 %v997_v55 }
 0x858   :  { %v996_v56 = vpop.xlane.xlu0 %995 }
 0x859   :  { %2714 = vrcp.f32 %v996_v56 }
 0x85c   :  { %v999_v57 = vpop.xlane.xlu0 %998 }
 0x85d   :  { %2716 = vrcp.f32 %v999_v57 }
 0x863   :  { %v2715_v62 = vpop.eup %2714 }
 0x864   :  { %v1001_v63 = vmul.f32 %v2715_v62, %v992_v51 }
 0x866   :  { %v1004_v0 = vadd.f32 %v1001_v63, %v3222_v61 }
 0x867   :  { %v2717_v1 = vpop.eup %2716 }
 0x868   :  { %v1006_v3 = vsel %vm231_vm1, %v1004_v0, 0.0  ;;  %v1003_v4 = vmul.f32 %v2717_v1, %v993_v53 }
 0x869   :  { %1007 = vadd.xlane.f32.xlu1 %v1006_v3 }
 0x86a   :  { %v1005_v5 = vadd.f32 %v1003_v4, %v3228_v2 }
 0x86c   :  { %v1009_v6 = vsel %vm231_vm1, %v1005_v5, 0.0 }
 0x86d   :  { %1010 = vadd.xlane.f32.xlu0 %v1009_v6 }
 0x87a   :  { %1182 = vrot.lane.b32.xlu1 %v3121_v20, %s2769_s24 }
 0x87e   :  { %1354 = vrot.lane.b32.xlu1 %v3170_v16, %s2768_s0 }
 0x882   :  { %1356 = vrot.lane.b32.xlu1 %v3172_v17, %s2768_s0 }
 0x883   :  { %1184 = vrot.lane.b32.xlu0 %v3125_v23, %s2769_s24 }
 0x8f6   :  { %v1008_v7 = vpop.xlane.xlu1 %1007 }
 0x8f7   :  { %2718 = vrcp.f32 %v1008_v7 }
 0x8fa   :  { %v1183_v8 = vpop.permute.xlu1 %1182  ;;  %v1011_v9 = vpop.xlane.xlu0 %1010 }
 0x8fb   :  { %2720 = vrcp.f32 %v1011_v9  ;;  %2439 = vmatprep.mubr.msk.f32.mxu1 %vm347_vm0, %v1183_v8 }
 0x8fe   :  { %v1185_v10 = vpop.permute.xlu0 %1184  ;;  %v1355_v45 = vpop.permute.xlu1 %1354 }
 0x8ff   :  { %2440 = vmatmul.mubr.msk.f32.vlgmr.msra.gmra.mrb[8].mxu1 %vm347_vm0, %v1185_v10 }
 0x900   :  { %2448 = vmatpush3.msra.mxu1 %v3149_v34  ;;  %v3251_v34 = vmul.f32 0.05, %v3076_v54 }
 0x901   :  { %v2719_v20 = vpop.eup %2718 }
 0x902   :  { %v1013_v11 = vmul.f32 %v2719_v20, %v1004_v0  ;;  %v1357_v47 = vpop.permute.xlu1 %1356 }
 0x904   :  { %2427 = vmatprep.mubr.msk.f32.mxu0 %vm231_vm1, %v1013_v11 }
 0x905   :  { %v2721_v12 = vpop.eup %2720 }
 0x906   :  { %v1015_v13 = vmul.f32 %v2721_v12, %v1005_v5 }
 0x908   :  { %2428 = vmatmul.mubr.msk.f32.vlgmr.msra.gmra.mrb[10].mxu0 %vm231_vm1, %v1015_v13 }
 0x909   :  { %2434 = vmatprep.mubr.msk.f32.mxu0 %vm231_vm1, %v1013_v11 }
 0x9d2   :  { %v2441_v23 = vpop.f32.mrb[8].mxu1 }
 0x9d3   :  { %v1256_v14 = vpop.f32.mrb[9].mxu1  ;;  %v1262_v28 = vadd.f32 %v2441_v23, %v3156_v35 }
 0x9d4   :  { %v1257_v30 = vadd.f32 %v3156_v35, %v1256_v14 }
 0x9db   :  { %v2429_v15 = vpop.f32.mrb[10].mxu0 }
 0x9dc   :  { %v1100_v40 = vmul.f32 0.95, %v2429_v15  ;;  %v1090_v19 = vpop.f32.mrb[11].mxu0 }
 0x9dd   :  { %v1099_v21 = vmul.f32 0.95, %v1090_v19 }
 0x9de   :  { %v3254_v22 = vadd.f32 %v1100_v40, %v3248_v43 }
 0x9df   :  { %v3257_v24 = vadd.f32 %v1099_v21, %v3251_v34 }
 0x9e1   :  { %v2571_v59 = vpack.c.bf16 %v3254_v22, %v3257_v24 }
 0x9e3   :  { %2572 = vmatprep.subr.bf16.mxu0 %v2571_v59 }
 0x9e4   :  { %2574 = vmatpush3.bf16.msra.mxu0 %v2571_v59 }
 0x9e5   :  { %2442 = vmatprep.subr.mxu0 %v3054_v42 }
 0x9e7   :  { %2435 = vmatmul.mubr.msk.f32.vlgmr.msra.gmra.mrb[12].mxu0 %vm231_vm1, %v1015_v13 }
 0x9e8   :  { %2443 = vmatpush3.msra.mxu0 %v3054_v42  ;;  %2444 = vmatprep.mubr.msk.f32.mxu0 %vm347_vm0, %v3170_v16 }
 0x9e9   :  { %2452 = vmatprep.subr.mxu0 %v3063_v44 }
 0x9eb   :  { %2445 = vmatmul.mubr.msk.f32.vlgmr.msra.gmra.mrb[14].mxu0 %vm347_vm0, %v3172_v17 }
 0x9ec   :  { %2453 = vmatpush3.msra.mxu0 %v3063_v44 }
 0xaba   :  { %v3270_v26 = vpop.f32.mrb[12].mxu0 }
 0xabb   :  { %v3272_v27 = vpop.f32.mrb[13].mxu0 }
 0xabe   :  { %v2446_v31 = vpop.f32.mrb[14].mxu0 }
 0xabf   :  { %v1341_v42 = vadd.f32 %v2446_v31, %v1262_v28  ;;  %v1331_v60 = vpop.f32.mrb[15].mxu0 }
 0xac0   :  { %v1340_v33 = vadd.f32 %v1331_v60, %v1257_v30 }
 0xac1   :  { %v2227_v36 = vmul.f32 -1.442695, %v1341_v42 }
 0xac2   :  { %v2226_v37 = vmul.f32 -1.442695, %v1340_v33 }
 0xac3   :  { %2722 = vpow2.f32 %v2227_v36 }
 0xac4   :  { %2724 = vpow2.f32 %v2226_v37 }
 0xacd   :  { %v2723_v38 = vpop.eup %2722 }
 0xace   :  { %v2725_v39 = vpop.eup %2724  ;;  %v1349_v41 = vadd.f32 1.0, %v2723_v38 }
 0xacf   :  { %v1348_v44 = vadd.f32 1.0, %v2725_v39 }
 0xad0   :  { %2726 = vrcp.f32 %v1349_v41 }
 0xad1   :  { %2728 = vrcp.f32 %v1348_v44 }
 0xada   :  { %v2727_v46 = vpop.eup %2726 }
 0xadb   :  { %v2729_v48 = vpop.eup %2728  ;;  %v1361_v49 = vmul.f32 %v2727_v46, %v1357_v47  ;;  %v1462_v1 = vsub.f32 1.0, %v2727_v46  ;;  %v1460_v9 = vmul.f32 %v2727_v46, %v3172_v17 }
 0xadc   :  { %v1360_v35 = vmul.f32 %v2729_v48, %v1355_v45  ;;  %v1461_v4 = vsub.f32 1.0, %v2729_v48  ;;  %v1459_v7 = vmul.f32 %v2729_v48, %v3170_v16 }
 0xadd   :  { %1366 = vrot.lane.b32.xlu1 %v1361_v49, %s2762_s15 }
 0xade   :  { %1364 = vrot.lane.b32.xlu0 %v1360_v35, %s2762_s15 }
 0xb4f   :  { %v1367_v51 = vpop.permute.xlu1 %1366 }
 0xb50   :  { %v1365_v50 = vpop.permute.xlu0 %1364 }
 0xb51   :  { %2449 = vmatprep.mubr.msk.f32.mxu1 %vm347_vm0, %v1365_v50 }
 0xb52   :  { %2450 = vmatmul.mubr.msk.f32.vlgmr.msra.gmra.mrb[10].mxu1 %vm347_vm0, %v1367_v51 }
 0xc25   :  { %v2451_v52 = vpop.f32.mrb[10].mxu1 }
 0xc26   :  { %1451 = vrot.lane.b32.xlu1 %v2451_v52, %s2761_s12  ;;  %v1438_v53 = vpop.f32.mrb[11].mxu1 }
 0xc27   :  { %1449 = vrot.lane.b32.xlu0 %v1438_v53, %s2761_s12 }
 0xc98   :  { %v1452_v55 = vpop.permute.xlu1 %1451 }
 0xc99   :  { %v1456_v56 = vadd.f32 %v1452_v55, %v1262_v28  ;;  %v1450_v57 = vpop.permute.xlu0 %1449 }
 0xc9a   :  { %v1455_v62 = vadd.f32 %v1450_v57, %v1257_v30 }
 0xc9b   :  { %2730 = vtanh.f32 %v1456_v56  ;;  %v2660_v56 = vpack.i.bf16 %v3083_v58, %v3076_v54 }
 0xc9c   :  { %2732 = vtanh.f32 %v1455_v62 }
 0xca5   :  { %v2731_v63 = vpop.eup %2730 }
 0xca6   :  { %v2733_v0 = vpop.eup %2732  ;;  %1467 = vrot.lane.b32.xlu1 %v2731_v63, %s2763_s5 }
 0xca7   :  { %1465 = vrot.lane.b32.xlu0 %v2733_v0, %s2763_s5 }
 0xd18   :  { %v1468_v3 = vpop.permute.xlu1 %1467 }
 0xd19   :  { %v1472_v5 = vmul.f32 %v1468_v3, %v1462_v1  ;;  %v1466_v6 = vpop.permute.xlu0 %1465 }
 0xd1a   :  { %v1471_v8 = vmul.f32 %v1466_v6, %v1461_v4 }
 0xd1b   :  { %v1474_v20 = vadd.f32 %v1472_v5, %v1460_v9 }
 0xd1c   :  { %v1473_v10 = vadd.f32 %v1471_v8, %v1459_v7 }
 0xd1e   :  { %2454 = vmatprep.mubr.msk.f32.mxu0 %vm347_vm0, %v1473_v10 }
 0xd1f   :  { %2455 = vmatmul.mubr.msk.f32.vlgmr.msra.gmra.mrb[16].mxu0 %vm347_vm0, %v1474_v20 }
 0xdf2   :  { %v2456_v11 = vpop.f32.mrb[16].mxu0 }
 0xdf3   :  { %v1553_v12 = vadd.f32 %v2456_v11, %v3182_v18  ;;  %v1547_v13 = vpop.f32.mrb[17].mxu0 }
 0xdf4   :  { %v1548_v23 = vadd.f32 %v3182_v18, %v1547_v13 }
 0xdf5   :  { %2734 = vtanh.f32 %v1553_v12 }
 0xdf6   :  { %2736 = vtanh.f32 %v1548_v23 }
 0xdff   :  { %v2735_v14 = vpop.eup %2734 }
 0xe00   :  { %v2737_v15 = vpop.eup %2736 }
 0xe01   :  { %2461 = vmatprep.mubr.msk.f32.mxu1 %vm347_vm0, %v2737_v15  ;;  %v2575_v16 = vpack.c.bf16 %v2735_v14, %v2737_v15 }
 0xe03   :  { %2577 = vmatprep.subr.msk.bf16.mxu1 %vm3188_vm3, %v2575_v16 }
 0xe04   :  { %2580 = vmatpush3.bf16.xpose.msk.msra.mxu1 %vm3188_vm3, %v2575_v16 }
 0xe0b   :  { %2462 = vmatmul.mubr.msk.f32.vlgmr.msra.gmra.mrb[12].mxu1 %vm347_vm0, %v2735_v14 }
 0xede   :  { %v2463_v17 = vpop.f32.mrb[12].mxu1 }
 0xedf   :  { %2738 = vtanh.f32 %v2463_v17  ;;  %v1630_v40 = vpop.f32.mrb[13].mxu1  ;;  %v1917_v17 = vld [vmem:[%s3525_s17 + $0x80] sm:$0xff] }
 0xee0   :  { %2740 = vtanh.f32 %v1630_v40  ;;  %v1918_v40 = vld [vmem:[%s3525_s17 + $0x88] sm:$0xff] }
 0xee9   :  { %v2739_v18 = vpop.eup %2738 }
 0xeea   :  { %v2741_v19 = vpop.eup %2740  ;;  %v1642_v21 = vmax.f32 %v2739_v18, 0.0  ;;  %v1901_v18 = vld [vmem:[%s3525_s17] sm:$0xff] }
 0xeeb   :  { %v1641_v59 = vmax.f32 %v2741_v19, 0.0 }
 0xeec   :  { %v1644_v28 = vmul.f32 %v1642_v21, %v3204_v29  ;;  %v2589_v21 = vpack.c.bf16 %v1918_v40, %v1917_v17  ;;  %v1930_v17 = vld [vmem:[%s3525_s17 + $0xe8] sm:$0xff] }
 0xeed   :  { %v1643_v30 = vmul.f32 %v1641_v59, %v3209_v32  ;;  %v1902_v59 = vld [vmem:[%s3525_s17 + $0x8] sm:$0xff] }
 0xeee   :  { %v1648_v31 = vsel %vm231_vm1, %v1644_v28, -inf  ;;  %2590 = vmatprep.subr.bf16.mxu1 %v2589_v21  ;;  %v1914_v21 = vld [vmem:[%s3525_s17 + $0x68] sm:$0xff] }
 0xeef   :  { %1649 = vmax.xlane.f32.xlu1 %v1648_v31  ;;  %v1645_v25 = vsel %vm231_vm1, %v1643_v30, -inf }
 0xef0   :  { %1646 = vmax.xlane.f32.xlu0 %v1645_v25 }
 0xf7c   :  { %v1650_v42 = vpop.xlane.xlu1 %1649 }
 0xf7d   :  { %v1652_v60 = vsub.f32 %v1644_v28, %v1650_v42  ;;  %v1647_v33 = vpop.xlane.xlu0 %1646  ;;  %v1919_v28 = vld [vmem:[%s3525_s17 + $0x90] sm:$0xff]  ;;  %v2591_v42 = vpack.c.bf16 %v1902_v59, %v1901_v18 }
 0xf7e   :  { %v1651_v36 = vsub.f32 %v1643_v30, %v1647_v33  ;;  %v1920_v30 = vld [vmem:[%s3525_s17 + $0x98] sm:$0xff]  ;;  %v1903_v33 = vld [vmem:[%s3525_s17 + $0x10] sm:$0xff] }
 0xf7f   :  { %v1655_v37 = vmul.f32 1.442695, %v1652_v60  ;;  %v2593_v60 = vpack.c.bf16 %v1920_v30, %v1919_v28  ;;  %2592 = vmatpush3.bf16.msra.mxu1 %v2591_v42  ;;  %v1931_v59 = vld [vmem:[%s3525_s17 + $0xf0] sm:$0xff]  ;;  %v1932_v28 = vld [vmem:[%s3525_s17 + $0xf8] sm:$0xff] }
 0xf80   :  { %v1653_v38 = vmul.f32 1.442695, %v1651_v36  ;;  %v1904_v36 = vld [vmem:[%s3525_s17 + $0x18] sm:$0xff] }
 0xf81   :  { %2742 = vpow2.f32 %v1655_v37  ;;  %v1921_v37 = vld [vmem:[%s3525_s17 + $0xa0] sm:$0xff]  ;;  %2594 = vmatprep.subr.bf16.mxu1 %v2593_v60  ;;  %v1916_v42 = vld [vmem:[%s3525_s17 + $0x78] sm:$0xff] }
 0xf82   :  { %2744 = vpow2.f32 %v1653_v38 }
 0xf8b   :  { %v2743_v39 = vpop.eup %2742 }
 0xf8c   :  { %v2745_v41 = vpop.eup %2744  ;;  %v1658_v46 = vmul.f32 %v2743_v39, %v3204_v29  ;;  %v1922_v39 = vld [vmem:[%s3525_s17 + $0xa8] sm:$0xff] }
 0xf8d   :  { %v1657_v44 = vmul.f32 %v2745_v41, %v3209_v32  ;;  %v2595_v41 = vpack.c.bf16 %v1904_v36, %v1903_v33  ;;  %v1179_v33 = vmul.f32 0.95, %v3270_v26  ;;  %v1178_v36 = vmul.f32 0.95, %v3272_v27 }
 0xf8e   :  { %v1662_v47 = vsel %vm231_vm1, %v1658_v46, 0.0 }
 0xf8f   :  { %v1659_v45 = vsel %vm231_vm1, %v1657_v44, 0.0  ;;  %2596 = vmatpush3.bf16.msra.mxu1 %v2595_v41 }
 0xf90   :  { %1660 = vadd.xlane.f32.xlu0 %v1659_v45  ;;  %v1934_v45 = vld [vmem:[%s3525_s17 + $0x108] sm:$0xff] }
 0xf94   :  { %1663 = vadd.xlane.f32.xlu0 %v1662_v47  ;;  %v1905_v47 = vld [vmem:[%s3525_s17 + $0x20] sm:$0xff] }
0x101d   :  { %v1661_v48 = vpop.xlane.xlu0 %1660 }
0x101e   :  { %2746 = vrcp.f32 %v1661_v48  ;;  %v1906_v48 = vld [vmem:[%s3525_s17 + $0x28] sm:$0xff] }
0x1021   :  { %v1664_v49 = vpop.xlane.xlu0 %1663 }
0x1022   :  { %2748 = vrcp.f32 %v1664_v49 }
0x1028   :  { %v2747_v35 = vpop.eup %2746 }
0x1029   :  { %v1666_v50 = vmul.f32 %v2747_v35, %v1657_v44  ;;  %v1933_v44 = vld [vmem:[%s3525_s17 + $0x100] sm:$0xff]  ;;  %v1923_v35 = vld [vmem:[%s3525_s17 + $0xb0] sm:$0xff] }
0x102a   :  { %v2621_v49 = vpack.c.bf16 %v1934_v45, %v1933_v44  ;;  %v1180_v44 = vadd.f32 %v1178_v36, %v3251_v34 }
0x102b   :  { %v1669_v51 = vadd.f32 %v1666_v50, %v3222_v61  ;;  %v1924_v50 = vld [vmem:[%s3525_s17 + $0xb8] sm:$0xff] }
0x102c   :  { %v2749_v52 = vpop.eup %2748 }
0x102d   :  { %v1671_v53 = vsel %vm231_vm1, %v1669_v51, 0.0  ;;  %v1668_v32 = vmul.f32 %v2749_v52, %v1658_v46  ;;  %v2597_v46 = vpack.c.bf16 %v1922_v39, %v1921_v37  ;;  %v1936_v52 = vld [vmem:[%s3525_s17 + $0x118] sm:$0xff] }
0x102e   :  { %1672 = vadd.xlane.f32.xlu1 %v1671_v53 }
0x102f   :  { %v1670_v55 = vadd.f32 %v1668_v32, %v3228_v2  ;;  %2598 = vmatprep.subr.bf16.mxu1 %v2597_v46 }
0x1031   :  { %v1674_v29 = vsel %vm231_vm1, %v1670_v55, 0.0 }
0x1032   :  { %1675 = vadd.xlane.f32.xlu0 %v1674_v29  ;;  %v1937_v29 = vld [vmem:[%s3525_s17 + $0x120] sm:$0xff] }
0x103f   :  { %2661 = vrot.lane.b32.xlu1 %v2660_v56, %s2769_s24  ;;  %v1938_v56 = vld [vmem:[%s3525_s17 + $0x128] sm:$0xff] }
0x10bb   :  { %v1673_v57 = vpop.xlane.xlu1 %1672 }
0x10bc   :  { %2750 = vrcp.f32 %v1673_v57  ;;  %v2601_v57 = vpack.c.bf16 %v1924_v50, %v1923_v35 }
0x10bf   :  { %v2662_v62 = vpop.permute.xlu1 %2661  ;;  %v1676_v63 = vpop.xlane.xlu0 %1675 }
0x10c0   :  { %v2664_v61 = vunpack.i.h.bf16 %v2662_v62  ;;  %v2663_v0 = vunpack.i.l.bf16 %v2662_v62  ;;  %2752 = vrcp.f32 %v1676_v63  ;;  %v1907_v62 = vld [vmem:[%s3525_s17 + $0x30] sm:$0xff]  ;;  %v1925_v63 = vld [vmem:[%s3525_s17 + $0xc0] sm:$0xff] }
0x10c2   :  { %v2581_v1 = vpack.c.bf16 %v2664_v61, %v2663_v0  ;;  %v2629_v61 = vpack.c.bf16 %v1938_v56, %v1937_v29  ;;  %v1926_v0 = vld [vmem:[%s3525_s17 + $0xc8] sm:$0xff] }
0x10c4   :  { %2582 = vmatprep.subr.bf16.mxu0 %v2581_v1 }
0x10c5   :  { %2584 = vmatpush3.bf16.msra.mxu0 %v2581_v1  ;;  %v1939_v1 = vld [vmem:[%s3525_s17 + $0x130] sm:$0xff] }
0x10c6   :  { %v2751_v3 = vpop.eup %2750 }
0x10c7   :  { %v1678_v2 = vmul.f32 %v2751_v3, %v1669_v51  ;;  %v1935_v51 = vld [vmem:[%s3525_s17 + $0x110] sm:$0xff]  ;;  %v1940_v3 = vld [vmem:[%s3525_s17 + $0x138] sm:$0xff] }
0x10c8   :  { %v2625_v53 = vpack.c.bf16 %v1936_v52, %v1935_v51 }
0x10c9   :  { %2468 = vmatprep.mubr.msk.f32.mxu0 %vm231_vm1, %v1678_v2 }
0x10ca   :  { %v2753_v4 = vpop.eup %2752 }
0x10cb   :  { %v1680_v5 = vmul.f32 %v2753_v4, %v1670_v55  ;;  %v2599_v55 = vpack.c.bf16 %v1906_v48, %v1905_v47  ;;  %v2605_v4 = vpack.c.bf16 %v1926_v0, %v1925_v63 }
0x10cd   :  { %2469 = vmatmul.mubr.msk.f32.vlgmr.msra.gmra.mrb[18].mxu0 %vm231_vm1, %v1680_v5  ;;  %2600 = vmatpush3.bf16.msra.mxu1 %v2599_v55  ;;  %v2240_v55 = vld [vmem:[%s3526_s18] ss:$0 sm:$0xff] }
0x10ce   :  { %2475 = vmatprep.mubr.msk.f32.mxu0 %vm231_vm1, %v1678_v2  ;;  %2602 = vmatprep.subr.bf16.mxu1 %v2601_v57 }
0x11a0   :  { %v2470_v6 = vpop.f32.mrb[18].mxu0 }
0x11a1   :  { %v1769_v7 = vmul.f32 0.95, %v2470_v6  ;;  %v1759_v8 = vpop.f32.mrb[19].mxu0  ;;  %v1910_v6 = vld [vmem:[%s3525_s17 + $0x48] sm:$0xff] }
0x11a2   :  { %v1768_v9 = vmul.f32 0.95, %v1759_v8  ;;  %v2633_v8 = vpack.c.bf16 %v1940_v3, %v1939_v1 }
0x11a3   :  { %1774 = vrot.lane.b32.xlu1 %v1769_v7, %s2770_s4  ;;  %v1927_v7 = vld [vmem:[%s3525_s17 + $0xd0] sm:$0xff] }
0x11a4   :  { %1772 = vrot.lane.b32.xlu0 %v1768_v9, %s2770_s4  ;;  %v1928_v9 = vld [vmem:[%s3525_s17 + $0xd8] sm:$0xff] }
0x1215   :  { %v1775_v10 = vpop.permute.xlu1 %1774 }
0x1216   :  { %v3317_v20 = vadd.f32 %v1775_v10, %v3248_v43  ;;  %v1773_v11 = vpop.permute.xlu0 %1772  ;;  %v1941_v10 = vld [vmem:[%s3525_s17 + $0x140] sm:$0xff] }
0x1217   :  { %v1778_v12 = vadd.f32 %v1773_v11, %v3251_v34  ;;  %v1942_v11 = vld [vmem:[%s3525_s17 + $0x148] sm:$0xff] }
0x1218   :  { %v1877_v26 = vsel %vm1875_vm4, %v3254_v22, %v3317_v20 }
0x1219   :  { %v2665_v13 = vpack.i.bf16 %v3317_v20, %v1778_v12  ;;  %v1876_v32 = vsel %vm1875_vm4, %v3257_v24, %v1778_v12  ;;  %v1908_v24 = vld [vmem:[%s3525_s17 + $0x38] sm:$0xff] }
0x121a   :  { %v2603_v2 = vpack.c.bf16 %v1908_v24, %v1907_v62 }
0x121b   :  { %2666 = vrot.lane.b32.xlu1 %v2665_v13, %s2769_s24  ;;  %v2609_v13 = vpack.c.bf16 %v1928_v9, %v1927_v7 }
0x121c   :  { %2604 = vmatpush3.bf16.msra.mxu1 %v2603_v2 }
0x121d   :  { %2606 = vmatprep.subr.bf16.mxu1 %v2605_v4 }
0x128d   :  { %v2667_v23 = vpop.permute.xlu1 %2666 }
0x128e   :  { %v2669_v14 = vunpack.i.h.bf16 %v2667_v23  ;;  %v2668_v15 = vunpack.i.l.bf16 %v2667_v23  ;;  %v1911_v23 = vld [vmem:[%s3525_s17 + $0x50] sm:$0xff] }
0x1290   :  { %v2585_v16 = vpack.c.bf16 %v2669_v14, %v2668_v15  ;;  %v1912_v14 = vld [vmem:[%s3525_s17 + $0x58] sm:$0xff]  ;;  %v2637_v15 = vpack.c.bf16 %v1942_v11, %v1941_v10 }
0x1291   :  { %v2611_v40 = vpack.c.bf16 %v1912_v14, %v1911_v23 }
0x1292   :  { %2586 = vmatprep.subr.bf16.mxu0 %v2585_v16 }
0x1293   :  { %2588 = vmatpush3.bf16.msra.mxu0 %v2585_v16  ;;  %v1929_v16 = vld [vmem:[%s3525_s17 + $0xe0] sm:$0xff] }
0x1294   :  { %2622 = vmatprep.subr.bf16.mxu0 %v2621_v49  ;;  %v2613_v18 = vpack.c.bf16 %v1930_v17, %v1929_v16 }
0x1296   :  { %2476 = vmatmul.mubr.msk.f32.vlgmr.msra.gmra.mrb[20].mxu0 %vm231_vm1, %v1680_v5  ;;  %v1909_v5 = vld [vmem:[%s3525_s17 + $0x40] sm:$0xff] }
0x1297   :  { %2624 = vmatpush3.bf16.msra.mxu0 %v2621_v49  ;;  %v2607_v12 = vpack.c.bf16 %v1910_v6, %v1909_v5 }
0x1298   :  { %2626 = vmatprep.subr.bf16.mxu0 %v2625_v53 }
0x1299   :  { %2608 = vmatpush3.bf16.msra.mxu1 %v2607_v12 }
0x129a   :  { %2610 = vmatprep.subr.bf16.mxu1 %v2609_v13 }
0x129b   :  { %2628 = vmatpush3.bf16.msra.mxu0 %v2625_v53 }
0x129c   :  { %2630 = vmatprep.subr.bf16.mxu0 %v2629_v61 }
0x129d   :  { %2612 = vmatpush3.bf16.msra.mxu1 %v2611_v40 }
0x129e   :  { %2614 = vmatprep.subr.bf16.mxu1 %v2613_v18 }
0x129f   :  { %2632 = vmatpush3.bf16.msra.mxu0 %v2629_v61 }
0x12a0   :  { %2634 = vmatprep.subr.bf16.mxu0 %v2633_v8 }
0x12a3   :  { %2636 = vmatpush3.bf16.msra.mxu0 %v2633_v8 }
0x12a4   :  { %2638 = vmatprep.subr.bf16.mxu0 %v2637_v15 }
0x12a7   :  { %2640 = vmatpush3.bf16.msra.mxu0 %v2637_v15 }
0x1369   :  { %v2477_v19 = vpop.f32.mrb[20].mxu0 }
0x136a   :  { %v1864_v31 = vmul.f32 0.95, %v2477_v19  ;;  %v1854_v25 = vpop.f32.mrb[21].mxu0  ;;  %v1913_v19 = vld [vmem:[%s3525_s17 + $0x60] sm:$0xff] }
0x136b   :  { %v1863_v38 = vmul.f32 0.95, %v1854_v25  ;;  %v2615_v30 = vpack.c.bf16 %v1914_v21, %v1913_v19  ;;  %v1915_v25 = vld [vmem:[%s3525_s17 + $0x70] sm:$0xff] }
0x136c   :  { %1869 = vrot.lane.b32.xlu1 %v1864_v31, %s2770_s4  ;;  %v2617_v31 = vpack.c.bf16 %v1932_v28, %v1931_v59  ;;  %v2619_v60 = vpack.c.bf16 %v1916_v42, %v1915_v25 }
0x136d   :  { %1867 = vrot.lane.b32.xlu0 %v1863_v38, %s2770_s4  ;;  %2616 = vmatpush3.bf16.msra.mxu1 %v2615_v30  ;;  %v1181_v38 = vadd.f32 %v1179_v33, %v3248_v43 }
0x136e   :  { %2618 = vmatprep.subr.bf16.mxu1 %v2617_v31 }
0x1371   :  { %1882 = vrot.lane.b32.xlu0 %v1876_v32, %s2763_s5  ;;  %2620 = vmatpush3.bf16.msra.mxu1 %v2619_v60 }
0x13de   :  { %v1870_v37 = vpop.permute.xlu1 %1869 }
0x13df   :  { %v1874_v39 = vadd.f32 %v1870_v37, %v3248_v43  ;;  %v1868_v41 = vpop.permute.xlu0 %1867  ;;  %v2758_v43 = vld [vmem:[%s3543_s27] sm:$0xff] }
0x13e0   :  { %v1873_v45 = vadd.f32 %v1868_v41, %v3251_v34  ;;  %v2759_v34 = vld [vmem:[%s3543_s27 + $0x8] sm:$0xff] }
0x13e1   :  { %v1879_v46 = vsel %vm1875_vm4, %v1181_v38, %v1874_v39 }
0x13e2   :  { %1892 = vrot.lane.b32.xlu0 %v1879_v46, %s2765_s23  ;;  %v1878_v47 = vsel %vm1875_vm4, %v1180_v44, %v1873_v45 }
0x13e3   :  { %1890 = vrot.lane.b32.xlu1 %v1878_v47, %s2765_s23  ;;  %v1883_v27 = vpop.permute.xlu0 %1882 }
0x13e4   :  { %v1896_v20 = vsel %vm254_vm2, %v3076_v54, %v1883_v27 }
0x13e6   :  { %2107 = vrot.lane.b32.xlu0 %v2758_v43, %s2763_s5  ;;  %v2115_v43 = vld [vmem:[%s3527_s19] sm:$0xff] }
0x13e7   :  { %1884 = vrot.lane.b32.xlu1 %v1877_v26, %s2763_s5 }
0x13ea   :  { %2109 = vrot.lane.b32.xlu0 %v2759_v34, %s2763_s5 }
0x1454   :  { %v1893_v49 = vpop.permute.xlu0 %1892 }
0x1455   :  { %v1891_v48 = vpop.permute.xlu1 %1890 }
0x1456   :  { %2498 = vmatprep.mubr.msk.f32.mxu0 %vm1950_vm5, %v1891_v48  ;;  %v1899_v22 = vsel %vm1898_vm6, %v1883_v27, %v1891_v48  ;;  %v2117_v27 = vld [vmem:[%s3528_s20] sm:$0xff] }
0x1457   :  { %2019 = vmatprep.mubr.f32.mxu1 %v1899_v22  ;;  %2499 = vmatmul.mubr.msk.f32.vlgmr.msra.gmra.mrb[22].mxu0 %vm1950_vm5, %v1893_v49 }
0x1458   :  { %2020 = vmatmul.mubr.f32.vlgmr.msra.gmra.mrb[14].mxu1 %v1896_v20  ;;  %v2108_v54 = vpop.permute.xlu0 %2107 }
0x1459   :  { %v1885_v35 = vpop.permute.xlu1 %1884 }
0x145a   :  { %v1900_v50 = vsel %vm1898_vm6, %v1885_v35, %v1893_v49  ;;  %v1897_v51 = vsel %vm254_vm2, %v3083_v58, %v1885_v35 }
0x145b   :  { %2024 = vmatprep.mubr.f32.mxu1 %v1900_v50 }
0x145c   :  { %2025 = vmatmul.mubr.f32.gmra.mrb[16].mxu1 %v1897_v51  ;;  %v2110_v58 = vpop.permute.xlu0 %2109 }
0x152a   :  { %v2500_v52 = vpop.f32.mrb[22].mxu0 }
0x152b   :  { %v2342_v53 = vpop.f32.mrb[14].mxu1  ;;  %v2096_v32 = vpop.f32.mrb[23].mxu0 }
0x152c   :  { %v2343_v29 = vpop.f32.mrb[15].mxu1 }
0x152d   :  { %v2344_v56 = vadd.f32 %v2343_v29, %v2342_v53 }
0x152f   :  { %v2022_v57 = vadd.f32 %v2344_v56, %v2240_v55  ;;  %v2345_v62 = vpop.f32.mrb[16].mxu1 }
0x1530   :  { %v2346_v24 = vpop.f32.mrb[17].mxu1 }
0x1531   :  { %v2347_v63 = vadd.f32 %v2346_v24, %v2345_v62  ;;  %v2097_v61 = vadd.f32 %v2096_v32, %v2022_v57  ;;  %v2118_v62 = vld [vmem:[%s3528_s20 + $0x8] sm:$0xff] }
0x1533   :  { %v2027_v0 = vadd.f32 %v2347_v63, %v2240_v55  ;;  %v2113_v1 = vadd.f32 %v2108_v54, %v2097_v61  ;;  %v2116_v54 = vld [vmem:[%s3527_s19 + $0x8] sm:$0xff] }
0x1535   :  { %v2119_v3 = vsel %vm254_vm2, %v2113_v1, 0.0  ;;  %v2102_v2 = vadd.f32 %v2500_v52, %v2027_v0 }
0x1536   :  { %2120 = vadd.xlane.f32.xlu1 %v2119_v3 }
0x1537   :  { %v2114_v4 = vadd.f32 %v2110_v58, %v2102_v2 }
0x1539   :  { %v2151_v5 = vsel %vm254_vm2, %v2114_v4, 0.0 }
0x153a   :  { %2152 = vadd.xlane.f32.xlu1 %v2151_v5 }
0x15c3   :  { %v2121_v6 = vpop.xlane.xlu1 %2120 }
0x15c4   :  { %v2122_v7 = vrot.slane %v2121_v6, 4 }
0x15c6   :  { %v2123_v8 = vadd.f32 %v2122_v7, %v2121_v6 }
0x15c7   :  { %v2153_v17 = vpop.xlane.xlu1 %2152 }
0x15c8   :  { %v2124_v9 = vrot.slane %v2123_v8, 2  ;;  %v2154_v40 = vrot.slane %v2153_v17, 4 }
0x15ca   :  { %v2125_v10 = vadd.f32 %v2124_v9, %v2123_v8  ;;  %v2155_v18 = vadd.f32 %v2154_v40, %v2153_v17 }
0x15cc   :  { %v2126_v11 = vrot.slane %v2125_v10, 1  ;;  %v2156_v19 = vrot.slane %v2155_v18, 2 }
0x15ce   :  { %v2127_v12 = vadd.f32 %v2126_v11, %v2125_v10  ;;  %v2157_v30 = vadd.f32 %v2156_v19, %v2155_v18 }
0x15d0   :  { %2641 = vpush %v2127_v12  ;;  %v2158_v42 = vrot.slane %v2157_v30, 1 }
0x15d2   :  { %v2159_v36 = vadd.f32 %v2158_v42, %v2157_v30 }
0x1601   :  { %s2642_s18 = spop %2641 }
0x1602   :  { %v2129_v13 = vstv %s2642_s18 }
0x1603   :  { %v2131_v23 = vmul.f32 0.0011160715, %v2129_v13 }
0x1605   :  { %v2132_v14 = vsub.f32 %v2113_v1, %v2131_v23 }
0x1607   :  { %v2133_v15 = vmul.f32 %v2132_v14, %v2132_v14 }
0x1609   :  { %v2134_v16 = vsel %vm254_vm2, %v2133_v15, 0.0 }
0x160a   :  { %2135 = vadd.xlane.f32.xlu0 %v2134_v16 }
0x1697   :  { %v2136_v21 = vpop.xlane.xlu0 %2135 }
0x1698   :  { %v2137_v59 = vrot.slane %v2136_v21, 4 }
0x169a   :  { %v2138_v28 = vadd.f32 %v2137_v59, %v2136_v21 }
0x169c   :  { %v2139_v31 = vrot.slane %v2138_v28, 2 }
0x169e   :  { %v2140_v25 = vadd.f32 %v2139_v31, %v2138_v28 }
0x16a0   :  { %v2141_v60 = vrot.slane %v2140_v25, 1 }
0x16a2   :  { %v2142_v33 = vadd.f32 %v2141_v60, %v2140_v25 }
0x16a4   :  { %2643 = vpush %v2142_v33 }
0x16a5   :  { %2645 = vpush %v2159_v36 }
0x16d5   :  { %s2644_s23 = spop %2643 }
0x16d6   :  { %v2144_v37 = vstv %s2644_s23  ;;  %s2646_s28 = spop %2645 }
0x16d7   :  { %v2145_v38 = vmul.f32 0.0011160715, %v2144_v37  ;;  %v2161_v39 = vstv %s2646_s28 }
0x16d8   :  { %v2162_v41 = vmul.f32 0.0011160715, %v2161_v39 }
0x16d9   :  { %v2146_v44 = vadd.f32 1e-05, %v2145_v38 }
0x16da   :  { %v2163_v45 = vsub.f32 %v2114_v4, %v2162_v41 }
0x16db   :  { %2754 = vrsqrt.f32 %v2146_v44 }
0x16dc   :  { %v2164_v46 = vmul.f32 %v2163_v45, %v2163_v45 }
0x16de   :  { %v2165_v47 = vsel %vm254_vm2, %v2164_v46, 0.0 }
0x16df   :  { %2166 = vadd.xlane.f32.xlu0 %v2165_v47 }
0x16e5   :  { %v2755_v26 = vpop.eup %2754 }
0x16e6   :  { %v2148_v34 = vmul.f32 %v2755_v26, %v2132_v14 }
0x16e8   :  { %v2149_v48 = vmul.f32 %v2148_v34, %v2115_v43 }
0x16ea   :  { %v2150_v49 = vadd.f32 %v2149_v48, %v2117_v27 }
0x16ec   :  { %2182 = vst.msk [vmem:[%s3529_s21] sm:$0xff] %vm254_vm2, %v2150_v49 }
0x176c   :  { %v2167_v22 = vpop.xlane.xlu0 %2166 }
0x176d   :  { %v2168_v20 = vrot.slane %v2167_v22, 4 }
0x176f   :  { %v2169_v35 = vadd.f32 %v2168_v20, %v2167_v22 }
0x1771   :  { %v2170_v50 = vrot.slane %v2169_v35, 2 }
0x1773   :  { %v2171_v51 = vadd.f32 %v2170_v50, %v2169_v35 }
0x1775   :  { %v2172_v52 = vrot.slane %v2171_v51, 1 }
0x1777   :  { %v2173_v53 = vadd.f32 %v2172_v52, %v2171_v51 }
0x1779   :  { %2647 = vpush %v2173_v53 }
0x17aa   :  { %s2648_s7 = spop %2647 }
0x17ab   :  { %v2175_v32 = vstv %s2648_s7 }
0x17ac   :  { %v2176_v55 = vmul.f32 0.0011160715, %v2175_v32 }
0x17ae   :  { %v2177_v29 = vadd.f32 1e-05, %v2176_v55 }
0x17b0   :  { %2756 = vrsqrt.f32 %v2177_v29 }
0x17ba   :  { %v2757_v56 = vpop.eup %2756 }
0x17bb   :  { %v2179_v57 = vmul.f32 %v2757_v56, %v2163_v45 }
0x17bd   :  { %v2180_v24 = vmul.f32 %v2179_v57, %v2116_v54 }
0x17bf   :  { %v2181_v63 = vadd.f32 %v2180_v24, %v2118_v62 }
0x17c1   :  { %2183 = vst.msk [vmem:[%s3529_s21 + $0x8] sm:$0xff] %vm254_vm2, %v2181_v63 }

</bundles_post_ra>
